<compile_context>
chip_gen: v6e
topology: v6e:2x2x1
jax: 0.10.0
libtpu: 0.0.40
codegen_flags: <defaults>
</compile_context>

<pallas_src>
import jax
import jax.numpy as jnp
from jax import lax
from jax.experimental import pallas as pl
from jax.experimental.pallas import tpu as pltpu

HIDDEN   = 200   # LSTM hidden size (logical)
H_PAD    = 256   # padded hidden size (128-lane aligned gate blocks)
LSTM_IN  = 32    # LSTM input size
ACT_IN   = 20    # fc0 input
ACT_PAD  = 32    # padded actions width
FC0_OUT  = 48    # fc0 output
MID_OUT  = 124   # fcmid output / LayerNorm dim
FC1_OUT  = 40    # fc1 output
OUT_PAD  = 128   # lane-dense padded width (head slab cols / output cols)
LN_EPS   = 1e-5

# Row layout of the single "head" parameter slab (OUT_PAD columns):
ROW_WMID_H = 0                       # rows [0, 256)   : W_mid (hidden half)^T, hidden-padded
ROW_W_ACT  = H_PAD                   # rows [256, 288) : (Wfc0^T @ Wmid_a^T), action-padded
ROW_W_FC1  = ROW_W_ACT + ACT_PAD     # rows [288, 416) : W_fc1^T, padded to 128x128
ROW_VECS   = ROW_W_FC1 + OUT_PAD     # rows [416, 424) : b_act, ln_g, ln_b, b_fc1, w_fc2, b_fc2
HEAD_ROWS  = ROW_VECS + 8            # 424


def classifier_lstm_kernel(tac_ref, act_ref, wih_ref, whh_ref, head_ref,
                           out_ref, xw_ref):
    TB = tac_ref.shape[0]            # T * B (static)
    B = act_ref.shape[0]             # static
    T = TB // B                      # static

    # ---- Prologue (everything here is off the serial recurrent path) ----------
    # Input projection for all timesteps at once, combined LSTM bias folded in
    # (bias lives in row 32 of the wih slab).
    xw_ref[...] = (jnp.dot(tac_ref[...], wih_ref[0:LSTM_IN, :],
                           preferred_element_type=jnp.float32)
                   + wih_ref[LSTM_IN:LSTM_IN + 1, :])            # (T*B, 1024)

    # Actions branch (independent of h): fc0 folded into fcmid's action half,
    # computed ahead of the loop so its MXU fill/drain hides in prologue slack
    # instead of the epilogue after the last LSTM step.
    mid_a = (jnp.dot(act_ref[...], head_ref[ROW_W_ACT:ROW_W_FC1, :],
                     preferred_element_type=jnp.float32)
             + head_ref[ROW_VECS + 0:ROW_VECS + 1, :])           # (B, 128)

    # ---- Recurrence: T steps, fully unrolled, static xw slices -----------------
    h = jnp.zeros((B, H_PAD), jnp.float32)
    c = jnp.zeros((B, H_PAD), jnp.float32)
    for t in range(T):               # static Python loop -> xw slices are free views
        # Only h @ W_hh is on the serial path.  W_hh is re-read from VMEM every
        # step so Mosaic streams its tiles under the vmatmul pushes rather than
        # keeping a huge value live across the unrolled steps; operands are bf16
        # (f32 MXU is multi-pass on all generations), accumulate in f32.
        gates = (xw_ref[t * B:(t + 1) * B, :]
                 + jnp.dot(h.astype(jnp.bfloat16), whh_ref[...],
                           preferred_element_type=jnp.float32))  # (B, 1024)
        # PyTorch gate order [i, f, g, o]; 128-lane aligned slices.  Gate math in
        # f32 (v5e has no bf16 VPU/EUP; on v6e/v7x it hides under MXU drain).
        i_g = jax.nn.sigmoid(gates[:, 0 * H_PAD:1 * H_PAD])
        f_g = jax.nn.sigmoid(gates[:, 1 * H_PAD:2 * H_PAD])
        g_g = jnp.tanh(gates[:, 2 * H_PAD:3 * H_PAD])
        o_g = jax.nn.sigmoid(gates[:, 3 * H_PAD:4 * H_PAD])
        c = f_g * c + i_g * g_g
        h = o_g * jnp.tanh(c)
    # Padded hidden lanes (200:256) provably stay zero: their W/b columns are
    # zero-padded, so gate preact = 0 -> c_pad = 0.5*c_pad (= 0), h_pad = 0.5*tanh(0).

    # ---- Head: fcmid (hidden half) + LayerNorm + fc1/ReLU + fc2/Tanh -----------
    mid = (jnp.dot(h, head_ref[ROW_WMID_H:H_PAD, :],
                   preferred_element_type=jnp.float32)
           + mid_a)                                  # (B, 128); cols 124:128 == 0

    # LayerNorm over the 124 real lanes of the 128-wide padded slab.
    inv_n = 1.0 / float(MID_OUT)
    mu = jnp.sum(mid, axis=1, keepdims=True) * inv_n
    centered = mid - mu                              # padded lanes become -mu
    var = (jnp.sum(centered * centered, axis=1, keepdims=True)
           - float(OUT_PAD - MID_OUT) * (mu * mu)) * inv_n
    ln = (centered * lax.rsqrt(var + LN_EPS)
          * head_ref[ROW_VECS + 1:ROW_VECS + 2, :]   # gamma (padded lanes 0)
          + head_ref[ROW_VECS + 2:ROW_VECS + 3, :])  # beta  (padded lanes 0)
    # -> ln padded lanes are exactly 0.

    # fc1 + ReLU (padded output lanes are relu(0 + 0) = 0).
    fc1 = jnp.maximum(
        jnp.dot(ln, head_ref[ROW_W_FC1:ROW_VECS, :],
                preferred_element_type=jnp.float32)
        + head_ref[ROW_VECS + 3:ROW_VECS + 4, :],
        0.0)                                         # (B, 128)

    # TODO(synk): nn.Dropout(p=0.5) implemented as identity (eval-mode semantics).

    # fc2 (40 -> 1) + Tanh as a VPU multiply + lane reduction (no N=1 MXU matmul).
    fc2 = (jnp.sum(fc1 * head_ref[ROW_VECS + 4:ROW_VECS + 5, :],
                   axis=1, keepdims=True)
           + head_ref[ROW_VECS + 5:ROW_VECS + 6, 0:1])           # (B, 1)
    res = jnp.tanh(fc2)

    # Lane-dense (unmasked) store; wrapper slices column 0.
    out_ref[...] = jnp.broadcast_to(res, out_ref.shape)


def init_params(key):
    """Deterministic PyTorch-style uniform(-1/sqrt(fan_in), +1/sqrt(fan_in)) init.

    Returns raw PyTorch-shaped parameters (used by the pure-JAX reference)."""
    ks = jax.random.split(key, 16)

    def u(k, shape, fan_in):
        bound = 1.0 / jnp.sqrt(float(fan_in))
        return jax.random.uniform(k, shape, jnp.float32, -bound, bound)

    raw = dict(
        # LSTM(32, 200): weight_ih (800,32), weight_hh (800,200), biases (800,)
        w_ih=u(ks[0], (4 * HIDDEN, LSTM_IN), HIDDEN),
        w_hh=u(ks[1], (4 * HIDDEN, HIDDEN), HIDDEN),
        b_ih=u(ks[2], (4 * HIDDEN,), HIDDEN),
        b_hh=u(ks[3], (4 * HIDDEN,), HIDDEN),
        # fc0: Linear(20, 48)
        w_fc0=u(ks[4], (FC0_OUT, ACT_IN), ACT_IN),
        b_fc0=u(ks[5], (FC0_OUT,), ACT_IN),
        # fcmid: Linear(248, 124)
        w_mid=u(ks[6], (MID_OUT, HIDDEN + FC0_OUT), HIDDEN + FC0_OUT),
        b_mid=u(ks[7], (MID_OUT,), HIDDEN + FC0_OUT),
        # fc1: Linear(124, 40)
        w_fc1=u(ks[8], (FC1_OUT, MID_OUT), MID_OUT),
        b_fc1=u(ks[9], (FC1_OUT,), MID_OUT),
        # fc2: Linear(40, 1)
        w_fc2=u(ks[10], (1, FC1_OUT), FC1_OUT),
        b_fc2=u(ks[11], (1,), FC1_OUT),
        # LayerNorm(124): gamma=1, beta=0 (PyTorch default)
        ln_g=jnp.ones((MID_OUT,), jnp.float32),
        ln_b=jnp.zeros((MID_OUT,), jnp.float32),
    )
    return raw


def pack_params(raw):
    """Pre-transposed, gate/lane-padded, slab-packed kernel parameters (3 arrays).

    NOTE: the kernel's h/c padded-lane-stays-zero invariant relies on every
    padded weight/bias lane being exactly zero; all slabs are built from
    jnp.zeros + .at[].set to guarantee this."""
    f32 = jnp.float32
    hi = jax.lax.Precision.HIGHEST
    w_ih, w_hh = raw["w_ih"], raw["w_hh"]
    b_l = raw["b_ih"] + raw["b_hh"]

    # LSTM weights: gate blocks padded HIDDEN -> H_PAD (128-lane aligned offsets).
    # wih_slab rows 0:32 = W_ih^T, row 32 = combined bias  -> one DMA.
    wih_slab = jnp.zeros((40, 4 * H_PAD), f32)
    whh_p = jnp.zeros((H_PAD, 4 * H_PAD), f32)
    for k in range(4):
        src = slice(k * HIDDEN, (k + 1) * HIDDEN)
        dst = slice(k * H_PAD, k * H_PAD + HIDDEN)
        wih_slab = wih_slab.at[:LSTM_IN, dst].set(w_ih[src, :].T)
        wih_slab = wih_slab.at[LSTM_IN, dst].set(b_l[src])
        whh_p = whh_p.at[:HIDDEN, dst].set(w_hh[src, :].T)
    # bf16 recurrent weights: f32 MXU matmul is multi-pass on every generation
    # and h @ W_hh sits on the serial critical path T times.
    whh_bf16 = whh_p.astype(jnp.bfloat16)

    # fc0 has no nonlinearity before fcmid, so fold it into fcmid's action half:
    #   mid = h @ Wmid_h^T + actions @ (Wfc0^T @ Wmid_a^T) + (b_fc0 @ Wmid_a^T + b_mid)
    # (folded at HIGHEST precision so this is numerically exact to f32 roundoff).
    w_mid = raw["w_mid"]
    wmid_h_t = w_mid[:, :HIDDEN].T                                     # (200, 124)
    wmid_a_t = w_mid[:, HIDDEN:].T                                     # (48, 124)
    w_act = jnp.dot(raw["w_fc0"].T, wmid_a_t, precision=hi)            # (20, 124)
    b_act = jnp.dot(raw["b_fc0"], wmid_a_t, precision=hi) + raw["b_mid"]  # (124,)

    # Single lane-padded "head" slab -> one DMA for all post-LSTM parameters.
    head = jnp.zeros((HEAD_ROWS, OUT_PAD), f32)
    head = head.at[ROW_WMID_H:ROW_WMID_H + HIDDEN, :MID_OUT].set(wmid_h_t)
    head = head.at[ROW_W_ACT:ROW_W_ACT + ACT_IN, :MID_OUT].set(w_act)
    head = head.at[ROW_W_FC1:ROW_W_FC1 + MID_OUT, :FC1_OUT].set(raw["w_fc1"].T)
    head = head.at[ROW_VECS + 0, :MID_OUT].set(b_act)
    head = head.at[ROW_VECS + 1, :MID_OUT].set(raw["ln_g"])
    head = head.at[ROW_VECS + 2, :MID_OUT].set(raw["ln_b"])
    head = head.at[ROW_VECS + 3, :FC1_OUT].set(raw["b_fc1"])
    head = head.at[ROW_VECS + 4, :FC1_OUT].set(raw["w_fc2"][0])
    head = head.at[ROW_VECS + 5, 0].set(raw["b_fc2"][0])

    return dict(wih_slab=wih_slab, whh_bf16=whh_bf16, head=head)


def classifier_lstm_forward(tactiles, actions, kp):
    T, B, _ = tactiles.shape
    # Reshape/pad in the wrapper so the kernel sees a flat (T*B, 32) slab and a
    # K-aligned (B, 32) actions slab (padded action columns hit zero weight rows).
    tac2d = tactiles.reshape(T * B, LSTM_IN)
    act_pad = jnp.pad(actions, ((0, 0), (0, ACT_PAD - ACT_IN)))

    args = (tac2d, act_pad, kp["wih_slab"], kp["whh_bf16"], kp["head"])
    vmem = pl.BlockSpec(memory_space=pltpu.MemorySpace.VMEM)

    # Total footprint ~1.3 MiB << VMEM on every generation: whole problem
    # resident, no grid.  (For large batches on v7x, add a leading batch grid
    # with dimension_semantics=("parallel",) to use both TensorCores.)
    out_padded = pl.pallas_call(
        classifier_lstm_kernel,
        out_shape=jax.ShapeDtypeStruct((B, OUT_PAD), jnp.float32),
        in_specs=[vmem] * len(args),
        out_specs=vmem,
        scratch_shapes=[pltpu.VMEM((T * B, 4 * H_PAD), jnp.float32)],
    )(*args)
    return out_padded[:, :1]


def classifier_lstm_reference(tactiles, actions, raw, recur_dtype=jnp.float32):
    """Pure-JAX reference (unpadded, PyTorch layout).

    recur_dtype lets the h @ W_hh operands be cast to bf16 to mirror the
    kernel's recurrent-matmul numerics exactly (accumulation stays f32)."""
    T, B, _ = tactiles.shape
    h = jnp.zeros((B, HIDDEN), jnp.float32)
    c = jnp.zeros((B, HIDDEN), jnp.float32)
    wih_t = raw["w_ih"].T
    whh_t = raw["w_hh"].T.astype(recur_dtype)
    bl = (raw["b_ih"] + raw["b_hh"]).reshape(1, -1)
    for t in range(T):
        gates = (tactiles[t] @ wih_t + bl
                 + jnp.dot(h.astype(recur_dtype), whh_t,
                           preferred_element_type=jnp.float32))
        i_g = jax.nn.sigmoid(gates[:, 0 * HIDDEN:1 * HIDDEN])
        f_g = jax.nn.sigmoid(gates[:, 1 * HIDDEN:2 * HIDDEN])
        g_g = jnp.tanh(gates[:, 2 * HIDDEN:3 * HIDDEN])
        o_g = jax.nn.sigmoid(gates[:, 3 * HIDDEN:4 * HIDDEN])
        c = f_g * c + i_g * g_g
        h = o_g * jnp.tanh(c)
    out0 = actions @ raw["w_fc0"].T + raw["b_fc0"]
    mid = jnp.concatenate([h, out0], axis=1) @ raw["w_mid"].T + raw["b_mid"]
    mu = jnp.mean(mid, axis=1, keepdims=True)
    var = jnp.mean((mid - mu) ** 2, axis=1, keepdims=True)
    ln = (mid - mu) / jnp.sqrt(var + LN_EPS) * raw["ln_g"] + raw["ln_b"]
    fc1 = jnp.maximum(ln @ raw["w_fc1"].T + raw["b_fc1"], 0.0)
    return jnp.tanh(fc1 @ raw["w_fc2"].T + raw["b_fc2"])


if __name__ == "__main__":
    key = jax.random.PRNGKey(0)
    k_tac, k_act, k_par = jax.random.split(key, 3)

    T, B = 8, 8                                  # seq_len=8, batch=8
    tactiles = jax.random.normal(k_tac, (T, B, LSTM_IN), jnp.float32)
    actions = jax.random.normal(k_act, (B, ACT_IN), jnp.float32)

    raw = init_params(k_par)
    kp = pack_params(raw)

    out = classifier_lstm_forward(tactiles, actions, kp)
    out = jax.block_until_ready(out)
    assert out.shape == (B, 1)

    # Implementation check against a reference with the same bf16 recurrent-matmul
    # numerics (catches padding/indexing/folding bugs precisely).
    ref_bf16 = classifier_lstm_reference(tactiles, actions, raw, jnp.bfloat16)
    assert jnp.allclose(out, ref_bf16, atol=5e-3, rtol=5e-3), \
        "mismatch vs bf16-matched reference"

    # Numerics sanity against the full-f32 reference (bf16 recurrence -> loose tol).
    ref_f32 = classifier_lstm_reference(tactiles, actions, raw, jnp.float32)
    assert jnp.allclose(out, ref_f32, atol=5e-2, rtol=5e-2), \
        "mismatch vs f32 reference"

    print("KERNEL_OK")
</pallas_src>

<mosaic_0001>
module attributes {stable_mosaic.version = 11 : i64} {
  func.func @classifier_lstm_kernel(%arg0: memref<64x32xf32, #tpu.memory_space<vmem>>, %arg1: memref<8x32xf32, #tpu.memory_space<vmem>>, %arg2: memref<40x1024xf32, #tpu.memory_space<vmem>>, %arg3: memref<256x1024xbf16, #tpu.memory_space<vmem>>, %arg4: memref<424x128xf32, #tpu.memory_space<vmem>>, %arg5: memref<8x128xf32, #tpu.memory_space<vmem>>, %arg6: memref<64x1024xf32, #tpu.memory_space<vmem>>) attributes {dimension_semantics = [], scalar_prefetch = 0 : i64, scratch_operands = 1 : i64, tpu.core_type = #tpu.core_type<tc>} {
    %c0 = arith.constant 0 : index
    %c0_0 = arith.constant 0 : index
    %0 = vector.load %arg0[%c0, %c0_0] : memref<64x32xf32, #tpu.memory_space<vmem>>, vector<64x32xf32>
    %c0_1 = arith.constant 0 : index
    %c0_2 = arith.constant 0 : index
    %1 = vector.load %arg2[%c0_1, %c0_2] : memref<40x1024xf32, #tpu.memory_space<vmem>>, vector<32x1024xf32>
    %cst = arith.constant dense<0.000000e+00> : vector<64x1024xf32>
    %2 = tpu.matmul %0, %1, %cst {dimension_numbers = #tpu.dot_dimension_numbers<[1], [0], [0], [1], [0, 0, 1, 1], [], []>} : vector<64x32xf32>, vector<32x1024xf32>, vector<64x1024xf32> -> vector<64x1024xf32>
    %c32 = arith.constant 32 : index
    %c0_3 = arith.constant 0 : index
    %3 = vector.load %arg2[%c32, %c0_3] : memref<40x1024xf32, #tpu.memory_space<vmem>>, vector<1x1024xf32>
    %4 = vector.broadcast %3 : vector<1x1024xf32> to vector<64x1024xf32>
    %5 = arith.addf %2, %4 : vector<64x1024xf32>
    %c0_4 = arith.constant 0 : index
    %c0_5 = arith.constant 0 : index
    %6 = vector.load %arg6[%c0_4, %c0_5] : memref<64x1024xf32, #tpu.memory_space<vmem>>, vector<64x1024xf32>
    tpu.vector_store %arg6[%c0_4, %c0_5], %5 {strides = array<i32>} : memref<64x1024xf32, #tpu.memory_space<vmem>>, vector<64x1024xf32>,
    %c0_6 = arith.constant 0 : index
    %c0_7 = arith.constant 0 : index
    %7 = vector.load %arg1[%c0_6, %c0_7] : memref<8x32xf32, #tpu.memory_space<vmem>>, vector<8x32xf32>
    %c256 = arith.constant 256 : index
    %c0_8 = arith.constant 0 : index
    %8 = vector.load %arg4[%c256, %c0_8] : memref<424x128xf32, #tpu.memory_space<vmem>>, vector<32x128xf32>
    %cst_9 = arith.constant dense<0.000000e+00> : vector<8x128xf32>
    %9 = tpu.matmul %7, %8, %cst_9 {dimension_numbers = #tpu.dot_dimension_numbers<[1], [0], [0], [1], [0, 0, 1, 1], [], []>} : vector<8x32xf32>, vector<32x128xf32>, vector<8x128xf32> -> vector<8x128xf32>
    %c416 = arith.constant 416 : index
    %c0_10 = arith.constant 0 : index
    %10 = vector.load %arg4[%c416, %c0_10] : memref<424x128xf32, #tpu.memory_space<vmem>>, vector<1x128xf32>
    %11 = vector.broadcast %10 : vector<1x128xf32> to vector<8x128xf32>
    %12 = arith.addf %9, %11 : vector<8x128xf32>
    %cst_11 = arith.constant 0.000000e+00 : f32
    %13 = vector.broadcast %cst_11 : f32 to vector<8x256xf32>
    %cst_12 = arith.constant 0.000000e+00 : f32
    %14 = vector.broadcast %cst_12 : f32 to vector<8x256xf32>
    %c0_13 = arith.constant 0 : index
    %c0_14 = arith.constant 0 : index
    %15 = vector.load %arg6[%c0_13, %c0_14] : memref<64x1024xf32, #tpu.memory_space<vmem>>, vector<8x1024xf32>
    %16 = arith.truncf %13 : vector<8x256xf32> to vector<8x256xbf16>
    %c0_15 = arith.constant 0 : index
    %c0_16 = arith.constant 0 : index
    %17 = vector.load %arg3[%c0_15, %c0_16] : memref<256x1024xbf16, #tpu.memory_space<vmem>>, vector<256x1024xbf16>
    %cst_17 = arith.constant dense<0.000000e+00> : vector<8x1024xf32>
    %18 = tpu.matmul %16, %17, %cst_17 {dimension_numbers = #tpu.dot_dimension_numbers<[1], [0], [0], [1], [0, 0, 1, 1], [], []>} : vector<8x256xbf16>, vector<256x1024xbf16>, vector<8x1024xf32> -> vector<8x1024xf32>
    %19 = arith.addf %15, %18 : vector<8x1024xf32>
    %20 = vector.extract_strided_slice %19 {offsets = [0, 0], sizes = [8, 256], strides = [1, 1]} : vector<8x1024xf32> to vector<8x256xf32>
    %21 = arith.negf %20 : vector<8x256xf32>
    %22 = math.exp %21 : vector<8x256xf32>
    %cst_18 = arith.constant 1.000000e+00 : f32
    %23 = vector.broadcast %cst_18 : f32 to vector<8x256xf32>
    %24 = arith.addf %23, %22 : vector<8x256xf32>
    %25 = arith.divf %23, %24 : vector<8x256xf32>
    %26 = vector.extract_strided_slice %19 {offsets = [0, 256], sizes = [8, 256], strides = [1, 1]} : vector<8x1024xf32> to vector<8x256xf32>
    %27 = arith.negf %26 : vector<8x256xf32>
    %28 = math.exp %27 : vector<8x256xf32>
    %cst_19 = arith.constant 1.000000e+00 : f32
    %29 = vector.broadcast %cst_19 : f32 to vector<8x256xf32>
    %30 = arith.addf %29, %28 : vector<8x256xf32>
    %31 = arith.divf %29, %30 : vector<8x256xf32>
    %32 = vector.extract_strided_slice %19 {offsets = [0, 512], sizes = [8, 256], strides = [1, 1]} : vector<8x1024xf32> to vector<8x256xf32>
    %33 = math.tanh %32 : vector<8x256xf32>
    %34 = vector.extract_strided_slice %19 {offsets = [0, 768], sizes = [8, 256], strides = [1, 1]} : vector<8x1024xf32> to vector<8x256xf32>
    %35 = arith.negf %34 : vector<8x256xf32>
    %36 = math.exp %35 : vector<8x256xf32>
    %cst_20 = arith.constant 1.000000e+00 : f32
    %37 = vector.broadcast %cst_20 : f32 to vector<8x256xf32>
    %38 = arith.addf %37, %36 : vector<8x256xf32>
    %39 = arith.divf %37, %38 : vector<8x256xf32>
    %40 = arith.mulf %31, %14 : vector<8x256xf32>
    %41 = arith.mulf %25, %33 : vector<8x256xf32>
    %42 = arith.addf %40, %41 : vector<8x256xf32>
    %43 = math.tanh %42 : vector<8x256xf32>
    %44 = arith.mulf %39, %43 : vector<8x256xf32>
    %c8 = arith.constant 8 : index
    %c0_21 = arith.constant 0 : index
    %45 = vector.load %arg6[%c8, %c0_21] : memref<64x1024xf32, #tpu.memory_space<vmem>>, vector<8x1024xf32>
    %46 = arith.truncf %44 : vector<8x256xf32> to vector<8x256xbf16>
    %c0_22 = arith.constant 0 : index
    %c0_23 = arith.constant 0 : index
    %47 = vector.load %arg3[%c0_22, %c0_23] : memref<256x1024xbf16, #tpu.memory_space<vmem>>, vector<256x1024xbf16>
    %cst_24 = arith.constant dense<0.000000e+00> : vector<8x1024xf32>
    %48 = tpu.matmul %46, %47, %cst_24 {dimension_numbers = #tpu.dot_dimension_numbers<[1], [0], [0], [1], [0, 0, 1, 1], [], []>} : vector<8x256xbf16>, vector<256x1024xbf16>, vector<8x1024xf32> -> vector<8x1024xf32>
    %49 = arith.addf %45, %48 : vector<8x1024xf32>
    %50 = vector.extract_strided_slice %49 {offsets = [0, 0], sizes = [8, 256], strides = [1, 1]} : vector<8x1024xf32> to vector<8x256xf32>
    %51 = arith.negf %50 : vector<8x256xf32>
    %52 = math.exp %51 : vector<8x256xf32>
    %cst_25 = arith.constant 1.000000e+00 : f32
    %53 = vector.broadcast %cst_25 : f32 to vector<8x256xf32>
    %54 = arith.addf %53, %52 : vector<8x256xf32>
    %55 = arith.divf %53, %54 : vector<8x256xf32>
    %56 = vector.extract_strided_slice %49 {offsets = [0, 256], sizes = [8, 256], strides = [1, 1]} : vector<8x1024xf32> to vector<8x256xf32>
    %57 = arith.negf %56 : vector<8x256xf32>
    %58 = math.exp %57 : vector<8x256xf32>
    %cst_26 = arith.constant 1.000000e+00 : f32
    %59 = vector.broadcast %cst_26 : f32 to vector<8x256xf32>
    %60 = arith.addf %59, %58 : vector<8x256xf32>
    %61 = arith.divf %59, %60 : vector<8x256xf32>
    %62 = vector.extract_strided_slice %49 {offsets = [0, 512], sizes = [8, 256], strides = [1, 1]} : vector<8x1024xf32> to vector<8x256xf32>
    %63 = math.tanh %62 : vector<8x256xf32>
    %64 = vector.extract_strided_slice %49 {offsets = [0, 768], sizes = [8, 256], strides = [1, 1]} : vector<8x1024xf32> to vector<8x256xf32>
    %65 = arith.negf %64 : vector<8x256xf32>
    %66 = math.exp %65 : vector<8x256xf32>
    %cst_27 = arith.constant 1.000000e+00 : f32
    %67 = vector.broadcast %cst_27 : f32 to vector<8x256xf32>
    %68 = arith.addf %67, %66 : vector<8x256xf32>
    %69 = arith.divf %67, %68 : vector<8x256xf32>
    %70 = arith.mulf %61, %42 : vector<8x256xf32>
    %71 = arith.mulf %55, %63 : vector<8x256xf32>
    %72 = arith.addf %70, %71 : vector<8x256xf32>
    %73 = math.tanh %72 : vector<8x256xf32>
    %74 = arith.mulf %69, %73 : vector<8x256xf32>
    %c16 = arith.constant 16 : index
    %c0_28 = arith.constant 0 : index
    %75 = vector.load %arg6[%c16, %c0_28] : memref<64x1024xf32, #tpu.memory_space<vmem>>, vector<8x1024xf32>
    %76 = arith.truncf %74 : vector<8x256xf32> to vector<8x256xbf16>
    %c0_29 = arith.constant 0 : index
    %c0_30 = arith.constant 0 : index
    %77 = vector.load %arg3[%c0_29, %c0_30] : memref<256x1024xbf16, #tpu.memory_space<vmem>>, vector<256x1024xbf16>
    %cst_31 = arith.constant dense<0.000000e+00> : vector<8x1024xf32>
    %78 = tpu.matmul %76, %77, %cst_31 {dimension_numbers = #tpu.dot_dimension_numbers<[1], [0], [0], [1], [0, 0, 1, 1], [], []>} : vector<8x256xbf16>, vector<256x1024xbf16>, vector<8x1024xf32> -> vector<8x1024xf32>
    %79 = arith.addf %75, %78 : vector<8x1024xf32>
    %80 = vector.extract_strided_slice %79 {offsets = [0, 0], sizes = [8, 256], strides = [1, 1]} : vector<8x1024xf32> to vector<8x256xf32>
    %81 = arith.negf %80 : vector<8x256xf32>
    %82 = math.exp %81 : vector<8x256xf32>
    %cst_32 = arith.constant 1.000000e+00 : f32
    %83 = vector.broadcast %cst_32 : f32 to vector<8x256xf32>
    %84 = arith.addf %83, %82 : vector<8x256xf32>
    %85 = arith.divf %83, %84 : vector<8x256xf32>
    %86 = vector.extract_strided_slice %79 {offsets = [0, 256], sizes = [8, 256], strides = [1, 1]} : vector<8x1024xf32> to vector<8x256xf32>
    %87 = arith.negf %86 : vector<8x256xf32>
    %88 = math.exp %87 : vector<8x256xf32>
    %cst_33 = arith.constant 1.000000e+00 : f32
    %89 = vector.broadcast %cst_33 : f32 to vector<8x256xf32>
    %90 = arith.addf %89, %88 : vector<8x256xf32>
    %91 = arith.divf %89, %90 : vector<8x256xf32>
    %92 = vector.extract_strided_slice %79 {offsets = [0, 512], sizes = [8, 256], strides = [1, 1]} : vector<8x1024xf32> to vector<8x256xf32>
    %93 = math.tanh %92 : vector<8x256xf32>
    %94 = vector.extract_strided_slice %79 {offsets = [0, 768], sizes = [8, 256], strides = [1, 1]} : vector<8x1024xf32> to vector<8x256xf32>
    %95 = arith.negf %94 : vector<8x256xf32>
    %96 = math.exp %95 : vector<8x256xf32>
    %cst_34 = arith.constant 1.000000e+00 : f32
    %97 = vector.broadcast %cst_34 : f32 to vector<8x256xf32>
    %98 = arith.addf %97, %96 : vector<8x256xf32>
    %99 = arith.divf %97, %98 : vector<8x256xf32>
    %100 = arith.mulf %91, %72 : vector<8x256xf32>
    %101 = arith.mulf %85, %93 : vector<8x256xf32>
    %102 = arith.addf %100, %101 : vector<8x256xf32>
    %103 = math.tanh %102 : vector<8x256xf32>
    %104 = arith.mulf %99, %103 : vector<8x256xf32>
    %c24 = arith.constant 24 : index
    %c0_35 = arith.constant 0 : index
    %105 = vector.load %arg6[%c24, %c0_35] : memref<64x1024xf32, #tpu.memory_space<vmem>>, vector<8x1024xf32>
    %106 = arith.truncf %104 : vector<8x256xf32> to vector<8x256xbf16>
    %c0_36 = arith.constant 0 : index
    %c0_37 = arith.constant 0 : index
    %107 = vector.load %arg3[%c0_36, %c0_37] : memref<256x1024xbf16, #tpu.memory_space<vmem>>, vector<256x1024xbf16>
    %cst_38 = arith.constant dense<0.000000e+00> : vector<8x1024xf32>
    %108 = tpu.matmul %106, %107, %cst_38 {dimension_numbers = #tpu.dot_dimension_numbers<[1], [0], [0], [1], [0, 0, 1, 1], [], []>} : vector<8x256xbf16>, vector<256x1024xbf16>, vector<8x1024xf32> -> vector<8x1024xf32>
    %109 = arith.addf %105, %108 : vector<8x1024xf32>
    %110 = vector.extract_strided_slice %109 {offsets = [0, 0], sizes = [8, 256], strides = [1, 1]} : vector<8x1024xf32> to vector<8x256xf32>
    %111 = arith.negf %110 : vector<8x256xf32>
    %112 = math.exp %111 : vector<8x256xf32>
    %cst_39 = arith.constant 1.000000e+00 : f32
    %113 = vector.broadcast %cst_39 : f32 to vector<8x256xf32>
    %114 = arith.addf %113, %112 : vector<8x256xf32>
    %115 = arith.divf %113, %114 : vector<8x256xf32>
    %116 = vector.extract_strided_slice %109 {offsets = [0, 256], sizes = [8, 256], strides = [1, 1]} : vector<8x1024xf32> to vector<8x256xf32>
    %117 = arith.negf %116 : vector<8x256xf32>
    %118 = math.exp %117 : vector<8x256xf32>
    %cst_40 = arith.constant 1.000000e+00 : f32
    %119 = vector.broadcast %cst_40 : f32 to vector<8x256xf32>
    %120 = arith.addf %119, %118 : vector<8x256xf32>
    %121 = arith.divf %119, %120 : vector<8x256xf32>
    %122 = vector.extract_strided_slice %109 {offsets = [0, 512], sizes = [8, 256], strides = [1, 1]} : vector<8x1024xf32> to vector<8x256xf32>
    %123 = math.tanh %122 : vector<8x256xf32>
    %124 = vector.extract_strided_slice %109 {offsets = [0, 768], sizes = [8, 256], strides = [1, 1]} : vector<8x1024xf32> to vector<8x256xf32>
    %125 = arith.negf %124 : vector<8x256xf32>
    %126 = math.exp %125 : vector<8x256xf32>
    %cst_41 = arith.constant 1.000000e+00 : f32
    %127 = vector.broadcast %cst_41 : f32 to vector<8x256xf32>
    %128 = arith.addf %127, %126 : vector<8x256xf32>
    %129 = arith.divf %127, %128 : vector<8x256xf32>
    %130 = arith.mulf %121, %102 : vector<8x256xf32>
    %131 = arith.mulf %115, %123 : vector<8x256xf32>
    %132 = arith.addf %130, %131 : vector<8x256xf32>
    %133 = math.tanh %132 : vector<8x256xf32>
    %134 = arith.mulf %129, %133 : vector<8x256xf32>
    %c32_42 = arith.constant 32 : index
    %c0_43 = arith.constant 0 : index
    %135 = vector.load %arg6[%c32_42, %c0_43] : memref<64x1024xf32, #tpu.memory_space<vmem>>, vector<8x1024xf32>
    %136 = arith.truncf %134 : vector<8x256xf32> to vector<8x256xbf16>
    %c0_44 = arith.constant 0 : index
    %c0_45 = arith.constant 0 : index
    %137 = vector.load %arg3[%c0_44, %c0_45] : memref<256x1024xbf16, #tpu.memory_space<vmem>>, vector<256x1024xbf16>
    %cst_46 = arith.constant dense<0.000000e+00> : vector<8x1024xf32>
    %138 = tpu.matmul %136, %137, %cst_46 {dimension_numbers = #tpu.dot_dimension_numbers<[1], [0], [0], [1], [0, 0, 1, 1], [], []>} : vector<8x256xbf16>, vector<256x1024xbf16>, vector<8x1024xf32> -> vector<8x1024xf32>
    %139 = arith.addf %135, %138 : vector<8x1024xf32>
    %140 = vector.extract_strided_slice %139 {offsets = [0, 0], sizes = [8, 256], strides = [1, 1]} : vector<8x1024xf32> to vector<8x256xf32>
    %141 = arith.negf %140 : vector<8x256xf32>
    %142 = math.exp %141 : vector<8x256xf32>
    %cst_47 = arith.constant 1.000000e+00 : f32
    %143 = vector.broadcast %cst_47 : f32 to vector<8x256xf32>
    %144 = arith.addf %143, %142 : vector<8x256xf32>
    %145 = arith.divf %143, %144 : vector<8x256xf32>
    %146 = vector.extract_strided_slice %139 {offsets = [0, 256], sizes = [8, 256], strides = [1, 1]} : vector<8x1024xf32> to vector<8x256xf32>
    %147 = arith.negf %146 : vector<8x256xf32>
    %148 = math.exp %147 : vector<8x256xf32>
    %cst_48 = arith.constant 1.000000e+00 : f32
    %149 = vector.broadcast %cst_48 : f32 to vector<8x256xf32>
    %150 = arith.addf %149, %148 : vector<8x256xf32>
    %151 = arith.divf %149, %150 : vector<8x256xf32>
    %152 = vector.extract_strided_slice %139 {offsets = [0, 512], sizes = [8, 256], strides = [1, 1]} : vector<8x1024xf32> to vector<8x256xf32>
    %153 = math.tanh %152 : vector<8x256xf32>
    %154 = vector.extract_strided_slice %139 {offsets = [0, 768], sizes = [8, 256], strides = [1, 1]} : vector<8x1024xf32> to vector<8x256xf32>
    %155 = arith.negf %154 : vector<8x256xf32>
    %156 = math.exp %155 : vector<8x256xf32>
    %cst_49 = arith.constant 1.000000e+00 : f32
    %157 = vector.broadcast %cst_49 : f32 to vector<8x256xf32>
    %158 = arith.addf %157, %156 : vector<8x256xf32>
    %159 = arith.divf %157, %158 : vector<8x256xf32>
    %160 = arith.mulf %151, %132 : vector<8x256xf32>
    %161 = arith.mulf %145, %153 : vector<8x256xf32>
    %162 = arith.addf %160, %161 : vector<8x256xf32>
    %163 = math.tanh %162 : vector<8x256xf32>
    %164 = arith.mulf %159, %163 : vector<8x256xf32>
    %c40 = arith.constant 40 : index
    %c0_50 = arith.constant 0 : index
    %165 = vector.load %arg6[%c40, %c0_50] : memref<64x1024xf32, #tpu.memory_space<vmem>>, vector<8x1024xf32>
    %166 = arith.truncf %164 : vector<8x256xf32> to vector<8x256xbf16>
    %c0_51 = arith.constant 0 : index
    %c0_52 = arith.constant 0 : index
    %167 = vector.load %arg3[%c0_51, %c0_52] : memref<256x1024xbf16, #tpu.memory_space<vmem>>, vector<256x1024xbf16>
    %cst_53 = arith.constant dense<0.000000e+00> : vector<8x1024xf32>
    %168 = tpu.matmul %166, %167, %cst_53 {dimension_numbers = #tpu.dot_dimension_numbers<[1], [0], [0], [1], [0, 0, 1, 1], [], []>} : vector<8x256xbf16>, vector<256x1024xbf16>, vector<8x1024xf32> -> vector<8x1024xf32>
    %169 = arith.addf %165, %168 : vector<8x1024xf32>
    %170 = vector.extract_strided_slice %169 {offsets = [0, 0], sizes = [8, 256], strides = [1, 1]} : vector<8x1024xf32> to vector<8x256xf32>
    %171 = arith.negf %170 : vector<8x256xf32>
    %172 = math.exp %171 : vector<8x256xf32>
    %cst_54 = arith.constant 1.000000e+00 : f32
    %173 = vector.broadcast %cst_54 : f32 to vector<8x256xf32>
    %174 = arith.addf %173, %172 : vector<8x256xf32>
    %175 = arith.divf %173, %174 : vector<8x256xf32>
    %176 = vector.extract_strided_slice %169 {offsets = [0, 256], sizes = [8, 256], strides = [1, 1]} : vector<8x1024xf32> to vector<8x256xf32>
    %177 = arith.negf %176 : vector<8x256xf32>
    %178 = math.exp %177 : vector<8x256xf32>
    %cst_55 = arith.constant 1.000000e+00 : f32
    %179 = vector.broadcast %cst_55 : f32 to vector<8x256xf32>
    %180 = arith.addf %179, %178 : vector<8x256xf32>
    %181 = arith.divf %179, %180 : vector<8x256xf32>
    %182 = vector.extract_strided_slice %169 {offsets = [0, 512], sizes = [8, 256], strides = [1, 1]} : vector<8x1024xf32> to vector<8x256xf32>
    %183 = math.tanh %182 : vector<8x256xf32>
    %184 = vector.extract_strided_slice %169 {offsets = [0, 768], sizes = [8, 256], strides = [1, 1]} : vector<8x1024xf32> to vector<8x256xf32>
    %185 = arith.negf %184 : vector<8x256xf32>
    %186 = math.exp %185 : vector<8x256xf32>
    %cst_56 = arith.constant 1.000000e+00 : f32
    %187 = vector.broadcast %cst_56 : f32 to vector<8x256xf32>
    %188 = arith.addf %187, %186 : vector<8x256xf32>
    %189 = arith.divf %187, %188 : vector<8x256xf32>
    %190 = arith.mulf %181, %162 : vector<8x256xf32>
    %191 = arith.mulf %175, %183 : vector<8x256xf32>
    %192 = arith.addf %190, %191 : vector<8x256xf32>
    %193 = math.tanh %192 : vector<8x256xf32>
    %194 = arith.mulf %189, %193 : vector<8x256xf32>
    %c48 = arith.constant 48 : index
    %c0_57 = arith.constant 0 : index
    %195 = vector.load %arg6[%c48, %c0_57] : memref<64x1024xf32, #tpu.memory_space<vmem>>, vector<8x1024xf32>
    %196 = arith.truncf %194 : vector<8x256xf32> to vector<8x256xbf16>
    %c0_58 = arith.constant 0 : index
    %c0_59 = arith.constant 0 : index
    %197 = vector.load %arg3[%c0_58, %c0_59] : memref<256x1024xbf16, #tpu.memory_space<vmem>>, vector<256x1024xbf16>
    %cst_60 = arith.constant dense<0.000000e+00> : vector<8x1024xf32>
    %198 = tpu.matmul %196, %197, %cst_60 {dimension_numbers = #tpu.dot_dimension_numbers<[1], [0], [0], [1], [0, 0, 1, 1], [], []>} : vector<8x256xbf16>, vector<256x1024xbf16>, vector<8x1024xf32> -> vector<8x1024xf32>
    %199 = arith.addf %195, %198 : vector<8x1024xf32>
    %200 = vector.extract_strided_slice %199 {offsets = [0, 0], sizes = [8, 256], strides = [1, 1]} : vector<8x1024xf32> to vector<8x256xf32>
    %201 = arith.negf %200 : vector<8x256xf32>
    %202 = math.exp %201 : vector<8x256xf32>
    %cst_61 = arith.constant 1.000000e+00 : f32
    %203 = vector.broadcast %cst_61 : f32 to vector<8x256xf32>
    %204 = arith.addf %203, %202 : vector<8x256xf32>
    %205 = arith.divf %203, %204 : vector<8x256xf32>
    %206 = vector.extract_strided_slice %199 {offsets = [0, 256], sizes = [8, 256], strides = [1, 1]} : vector<8x1024xf32> to vector<8x256xf32>
    %207 = arith.negf %206 : vector<8x256xf32>
    %208 = math.exp %207 : vector<8x256xf32>
    %cst_62 = arith.constant 1.000000e+00 : f32
    %209 = vector.broadcast %cst_62 : f32 to vector<8x256xf32>
    %210 = arith.addf %209, %208 : vector<8x256xf32>
    %211 = arith.divf %209, %210 : vector<8x256xf32>
    %212 = vector.extract_strided_slice %199 {offsets = [0, 512], sizes = [8, 256], strides = [1, 1]} : vector<8x1024xf32> to vector<8x256xf32>
    %213 = math.tanh %212 : vector<8x256xf32>
    %214 = vector.extract_strided_slice %199 {offsets = [0, 768], sizes = [8, 256], strides = [1, 1]} : vector<8x1024xf32> to vector<8x256xf32>
    %215 = arith.negf %214 : vector<8x256xf32>
    %216 = math.exp %215 : vector<8x256xf32>
    %cst_63 = arith.constant 1.000000e+00 : f32
    %217 = vector.broadcast %cst_63 : f32 to vector<8x256xf32>
    %218 = arith.addf %217, %216 : vector<8x256xf32>
    %219 = arith.divf %217, %218 : vector<8x256xf32>
    %220 = arith.mulf %211, %192 : vector<8x256xf32>
    %221 = arith.mulf %205, %213 : vector<8x256xf32>
    %222 = arith.addf %220, %221 : vector<8x256xf32>
    %223 = math.tanh %222 : vector<8x256xf32>
    %224 = arith.mulf %219, %223 : vector<8x256xf32>
    %c56 = arith.constant 56 : index
    %c0_64 = arith.constant 0 : index
    %225 = vector.load %arg6[%c56, %c0_64] : memref<64x1024xf32, #tpu.memory_space<vmem>>, vector<8x1024xf32>
    %226 = arith.truncf %224 : vector<8x256xf32> to vector<8x256xbf16>
    %c0_65 = arith.constant 0 : index
    %c0_66 = arith.constant 0 : index
    %227 = vector.load %arg3[%c0_65, %c0_66] : memref<256x1024xbf16, #tpu.memory_space<vmem>>, vector<256x1024xbf16>
    %cst_67 = arith.constant dense<0.000000e+00> : vector<8x1024xf32>
    %228 = tpu.matmul %226, %227, %cst_67 {dimension_numbers = #tpu.dot_dimension_numbers<[1], [0], [0], [1], [0, 0, 1, 1], [], []>} : vector<8x256xbf16>, vector<256x1024xbf16>, vector<8x1024xf32> -> vector<8x1024xf32>
    %229 = arith.addf %225, %228 : vector<8x1024xf32>
    %230 = vector.extract_strided_slice %229 {offsets = [0, 0], sizes = [8, 256], strides = [1, 1]} : vector<8x1024xf32> to vector<8x256xf32>
    %231 = arith.negf %230 : vector<8x256xf32>
    %232 = math.exp %231 : vector<8x256xf32>
    %cst_68 = arith.constant 1.000000e+00 : f32
    %233 = vector.broadcast %cst_68 : f32 to vector<8x256xf32>
    %234 = arith.addf %233, %232 : vector<8x256xf32>
    %235 = arith.divf %233, %234 : vector<8x256xf32>
    %236 = vector.extract_strided_slice %229 {offsets = [0, 256], sizes = [8, 256], strides = [1, 1]} : vector<8x1024xf32> to vector<8x256xf32>
    %237 = arith.negf %236 : vector<8x256xf32>
    %238 = math.exp %237 : vector<8x256xf32>
    %cst_69 = arith.constant 1.000000e+00 : f32
    %239 = vector.broadcast %cst_69 : f32 to vector<8x256xf32>
    %240 = arith.addf %239, %238 : vector<8x256xf32>
    %241 = arith.divf %239, %240 : vector<8x256xf32>
    %242 = vector.extract_strided_slice %229 {offsets = [0, 512], sizes = [8, 256], strides = [1, 1]} : vector<8x1024xf32> to vector<8x256xf32>
    %243 = math.tanh %242 : vector<8x256xf32>
    %244 = vector.extract_strided_slice %229 {offsets = [0, 768], sizes = [8, 256], strides = [1, 1]} : vector<8x1024xf32> to vector<8x256xf32>
    %245 = arith.negf %244 : vector<8x256xf32>
    %246 = math.exp %245 : vector<8x256xf32>
    %cst_70 = arith.constant 1.000000e+00 : f32
    %247 = vector.broadcast %cst_70 : f32 to vector<8x256xf32>
    %248 = arith.addf %247, %246 : vector<8x256xf32>
    %249 = arith.divf %247, %248 : vector<8x256xf32>
    %250 = arith.mulf %241, %222 : vector<8x256xf32>
    %251 = arith.mulf %235, %243 : vector<8x256xf32>
    %252 = arith.addf %250, %251 : vector<8x256xf32>
    %253 = math.tanh %252 : vector<8x256xf32>
    %254 = arith.mulf %249, %253 : vector<8x256xf32>
    %c0_71 = arith.constant 0 : index
    %c0_72 = arith.constant 0 : index
    %255 = vector.load %arg4[%c0_71, %c0_72] : memref<424x128xf32, #tpu.memory_space<vmem>>, vector<256x128xf32>
    %cst_73 = arith.constant dense<0.000000e+00> : vector<8x128xf32>
    %256 = tpu.matmul %254, %255, %cst_73 {dimension_numbers = #tpu.dot_dimension_numbers<[1], [0], [0], [1], [0, 0, 1, 1], [], []>} : vector<8x256xf32>, vector<256x128xf32>, vector<8x128xf32> -> vector<8x128xf32>
    %257 = arith.addf %256, %12 : vector<8x128xf32>
    %cst_74 = arith.constant dense<0.000000e+00> : vector<8xf32>
    %258 = vector.multi_reduction <add>, %257, %cst_74 [1] : vector<8x128xf32> to vector<8xf32>
    %259 = vector.shape_cast %258 : vector<8xf32> to vector<8x1xf32>
    %cst_75 = arith.constant 0.00806451589 : f32
    %260 = vector.broadcast %cst_75 : f32 to vector<8x1xf32>
    %261 = arith.mulf %259, %260 : vector<8x1xf32>
    %262 = vector.broadcast %261 : vector<8x1xf32> to vector<8x128xf32>
    %263 = arith.subf %257, %262 : vector<8x128xf32>
    %264 = arith.mulf %263, %263 : vector<8x128xf32>
    %cst_76 = arith.constant dense<0.000000e+00> : vector<8xf32>
    %265 = vector.multi_reduction <add>, %264, %cst_76 [1] : vector<8x128xf32> to vector<8xf32>
    %266 = vector.shape_cast %265 : vector<8xf32> to vector<8x1xf32>
    %267 = arith.mulf %261, %261 : vector<8x1xf32>
    %cst_77 = arith.constant 4.000000e+00 : f32
    %268 = vector.broadcast %cst_77 : f32 to vector<8x1xf32>
    %269 = arith.mulf %268, %267 : vector<8x1xf32>
    %270 = arith.subf %266, %269 : vector<8x1xf32>
    %cst_78 = arith.constant 0.00806451589 : f32
    %271 = vector.broadcast %cst_78 : f32 to vector<8x1xf32>
    %272 = arith.mulf %270, %271 : vector<8x1xf32>
    %cst_79 = arith.constant 9.99999974E-6 : f32
    %273 = vector.broadcast %cst_79 : f32 to vector<8x1xf32>
    %274 = arith.addf %272, %273 : vector<8x1xf32>
    %275 = math.rsqrt %274 : vector<8x1xf32>
    %276 = vector.broadcast %275 : vector<8x1xf32> to vector<8x128xf32>
    %277 = arith.mulf %263, %276 : vector<8x128xf32>
    %c417 = arith.constant 417 : index
    %c0_80 = arith.constant 0 : index
    %278 = vector.load %arg4[%c417, %c0_80] : memref<424x128xf32, #tpu.memory_space<vmem>>, vector<1x128xf32>
    %279 = vector.broadcast %278 : vector<1x128xf32> to vector<8x128xf32>
    %280 = arith.mulf %277, %279 : vector<8x128xf32>
    %c418 = arith.constant 418 : index
    %c0_81 = arith.constant 0 : index
    %281 = vector.load %arg4[%c418, %c0_81] : memref<424x128xf32, #tpu.memory_space<vmem>>, vector<1x128xf32>
    %282 = vector.broadcast %281 : vector<1x128xf32> to vector<8x128xf32>
    %283 = arith.addf %280, %282 : vector<8x128xf32>
    %c288 = arith.constant 288 : index
    %c0_82 = arith.constant 0 : index
    %284 = vector.load %arg4[%c288, %c0_82] : memref<424x128xf32, #tpu.memory_space<vmem>>, vector<128x128xf32>
    %cst_83 = arith.constant dense<0.000000e+00> : vector<8x128xf32>
    %285 = tpu.matmul %283, %284, %cst_83 {dimension_numbers = #tpu.dot_dimension_numbers<[1], [0], [0], [1], [0, 0, 1, 1], [], []>} : vector<8x128xf32>, vector<128x128xf32>, vector<8x128xf32> -> vector<8x128xf32>
    %c419 = arith.constant 419 : index
    %c0_84 = arith.constant 0 : index
    %286 = vector.load %arg4[%c419, %c0_84] : memref<424x128xf32, #tpu.memory_space<vmem>>, vector<1x128xf32>
    %287 = vector.broadcast %286 : vector<1x128xf32> to vector<8x128xf32>
    %288 = arith.addf %285, %287 : vector<8x128xf32>
    %cst_85 = arith.constant 0.000000e+00 : f32
    %289 = vector.broadcast %cst_85 : f32 to vector<8x128xf32>
    %290 = arith.maximumf %288, %289 : vector<8x128xf32>
    %c420 = arith.constant 420 : index
    %c0_86 = arith.constant 0 : index
    %291 = vector.load %arg4[%c420, %c0_86] : memref<424x128xf32, #tpu.memory_space<vmem>>, vector<1x128xf32>
    %292 = vector.broadcast %291 : vector<1x128xf32> to vector<8x128xf32>
    %293 = arith.mulf %290, %292 : vector<8x128xf32>
    %cst_87 = arith.constant dense<0.000000e+00> : vector<8xf32>
    %294 = vector.multi_reduction <add>, %293, %cst_87 [1] : vector<8x128xf32> to vector<8xf32>
    %295 = vector.shape_cast %294 : vector<8xf32> to vector<8x1xf32>
    %c421 = arith.constant 421 : index
    %c0_88 = arith.constant 0 : index
    %296 = vector.load %arg4[%c421, %c0_88] : memref<424x128xf32, #tpu.memory_space<vmem>>, vector<1x1xf32>
    %297 = vector.broadcast %296 : vector<1x1xf32> to vector<8x1xf32>
    %298 = arith.addf %295, %297 : vector<8x1xf32>
    %299 = math.tanh %298 : vector<8x1xf32>
    %300 = vector.shape_cast %299 : vector<8x1xf32> to vector<8x1xf32>
    %301 = vector.broadcast %300 : vector<8x1xf32> to vector<8x128xf32>
    %c0_89 = arith.constant 0 : index
    %c0_90 = arith.constant 0 : index
    %302 = vector.load %arg5[%c0_89, %c0_90] : memref<8x128xf32, #tpu.memory_space<vmem>>, vector<8x128xf32>
    tpu.vector_store %arg5[%c0_89, %c0_90], %301 {strides = array<i32>} : memref<8x128xf32, #tpu.memory_space<vmem>>, vector<8x128xf32>,
    return
  }
}

</mosaic_0001>

<bundles_post_ra>
// kernel: tpu_custom_call.1
= control target key start
LH: loop header
LB: loop body
LE: loop exit
PB: predicated region body
PF: predicated region fallthrough
CT: control target
= control target key end

     0   :  { %10 = vsyncpa [#allocation4], 0  ;;  %s6214_s0 = inlined_call_operand.vmem [shape: f32[64,32], index: 0, kind: input, shape index: {}]   ;;  %s6215_s1 = inlined_call_operand.vmem [shape: f32[8,32], index: 1, kind: input, shape index: {}]   ;;  %s6216_s2 = inlined_call_operand.hbm [shape: f32[40,1024], index: 2, kind: input, shape index: {}]   ;;  %s6217_s3 = inlined_call_operand.hbm [shape: bf16[256,1024], index: 3, kind: input, shape index: {}]   ;;  %s6218_s4 = inlined_call_operand.hbm [shape: f32[424,128], index: 4, kind: input, shape index: {}]   ;;  %s6219_s5 = inlined_call_operand.hbm [shape: f32[8,128], index: 5, kind: output, shape index: {}]  }
   0x1   :  { %11 = vsyncpa [#allocation7], 0 }
   0x2   :  { %12 = vsyncpa [#allocation5], 0  ;;  %s4322_s18 = smov [#allocation6]  }
   0x3   :  { %s34_s19 = sshll.u32 %s4322_s18, 4  ;;  %s35_s19 = int_to_ptr.vmem [resolvable:$true] %s34_s19 }
   0x4   :  { %s4244_s20 = scalar_lea.vmem %s35_s19, 16384  ;;  %p4249_p1 = scmp.lt.s32.totalorder %s35_s19, %s35_s19 }
   0x5   :  { %p4245_p0 = scmp.ne.s32.totalorder %s35_s19, %s4244_s20  ;;  %p4250_p2 = scmp.lt.s32.totalorder %s4244_s20, %s4244_s20 }
   0x7   :  { %p4251_p3 = por %p4250_p2, %p4249_p1 }
   0x9   :  { %p4252_p4 = pnand %p4251_p3, %p4245_p0 }
   0xb   :  { %4255 = shalt.err (!%p4252_p4)
}
   0xc   :  { %s4323_s21 = smov 512   ;;  %s4324_s22 = smov 32  }
   0xd   :  { %40 = dma.hbm_to_vmem [thread:$0]  %s6217_s3, 16384, %s35_s19, [#allocation7], %s4323_s21, %s4323_s21, %s4324_s22  }
   0xe   :  { %s4325_s25 = smov [#allocation3]  }
   0xf   :  { %s22_s26 = sshll.u32 %s4325_s25, 4  ;;  %s23_s26 = int_to_ptr.vmem [resolvable:$true] %s22_s26 }
  0x10   :  { %s4264_s27 = scalar_lea.vmem %s23_s26, 5120  ;;  %p4269_p6 = scmp.lt.s32.totalorder %s23_s26, %s23_s26 }
  0x11   :  { %p4265_p5 = scmp.ne.s32.totalorder %s23_s26, %s4264_s27  ;;  %p4270_p7 = scmp.lt.s32.totalorder %s4264_s27, %s4264_s27 }
  0x13   :  { %p4271_p8 = por %p4270_p7, %p4269_p6 }
  0x15   :  { %p4272_p9 = pnand %p4271_p8, %p4265_p5 }
  0x17   :  { %4275 = shalt.err (!%p4272_p9)
}
  0x18   :  { %s4326_s28 = smov 1024   ;;  %s4327_s29 = smov 64  }
  0x19   :  { %28 = dma.hbm_to_vmem [thread:$0]  %s6216_s2, 5120, %s23_s26, [#allocation4], %s4326_s28, %s4326_s28, %s4327_s29  }
  0x1a   :  { %s4328_s7 = smov [#allocation8]  }
  0x1b   :  { %s46_s8 = sshll.u32 %s4328_s7, 4  ;;  %s47_s8 = int_to_ptr.vmem [resolvable:$true] %s46_s8 }
  0x1c   :  { %s4284_s3 = scalar_lea.vmem %s47_s8, 6784  ;;  %p4289_p11 = scmp.lt.s32.totalorder %s47_s8, %s47_s8 }
  0x1d   :  { %p4285_p10 = scmp.ne.s32.totalorder %s47_s8, %s4284_s3  ;;  %p4290_p12 = scmp.lt.s32.totalorder %s4284_s3, %s4284_s3 }
  0x1f   :  { %p4291_p13 = por %p4290_p12, %p4289_p11 }
  0x21   :  { %p4292_p0 = pnand %p4291_p13, %p4285_p10 }
  0x23   :  { %4295 = shalt.err (!%p4292_p0)
}
  0x24   :  { %s4329_s9 = smov 128   ;;  %s4330_s10 = smov 8  }
  0x25   :  { %52 = dma.hbm_to_vmem [thread:$0]  %s6218_s4, 6784, %s47_s8, [#allocation7], %s4329_s9, %s4329_s9, %s4330_s10  }
  0x26   :  { %4316 = dma.done.wait [#allocation4], 5120  }
  0x27   :  { %4317 = vsyncadd [#allocation4], 4294962176 }
  0x28   :  { %4318 = dma.done.wait [#allocation7], 23168  }
  0x29   :  { %4319 = vsyncadd [#allocation7], 4294944128  ;;  %v6220_v0 = vmov 0.0   ;;  %v6222_v1 = vmov 0   ;;  %v96_v2 = vld [vmem:[#allocation3 + $0xc8] sm:$0xff]  ;;  %v95_v3 = vld [vmem:[#allocation3 + $0xc0] sm:$0xff] }
  0x2a   :  { %237 = vmatprep.mubr.f32.mxu0 %v6220_v0  ;;  %261 = vmatprep.mubr.f32.mxu1 %v6220_v0  ;;  %v88_v4 = vld [vmem:[#allocation3 + $0x88] sm:$0xff]  ;;  %v87_v5 = vld [vmem:[#allocation3 + $0x80] sm:$0xff]  ;;  %vm148_vm0 = vcmask 261120   ;;  %v98_v12 = vld [vmem:[#allocation3 + $0xd8] sm:$0xff]  ;;  %vm4333_vm1 = vmmov 0  }
  0x2b   :  { %3974 = vset.pattern.permute.xlu1 %v6222_v1  ;;  %3975 = vset.pattern.permute.xlu0 %v6222_v1  ;;  %v80_v6 = vld [vmem:[#allocation3 + $0x48] sm:$0xff]  ;;  %v79_v7 = vld [vmem:[#allocation3 + $0x40] sm:$0xff]  ;;  %v97_v14 = vld [vmem:[#allocation3 + $0xd0] sm:$0xff] }
  0x2c   :  { %197 = vmatprep.subr.mxu0 %v96_v2  ;;  %3953 = vmatprep.subr.mxu1 %v96_v2  ;;  %v72_v8 = vld [vmem:[#allocation3 + $0x8] sm:$0xff]  ;;  %v71_v9 = vld [vmem:[#allocation3] sm:$0xff]  ;;  %v90_v18 = vld [vmem:[#allocation3 + $0x98] sm:$0xff] }
  0x2d   :  { %198 = vmatpush1.msra.mxu0 %v95_v3  ;;  %3957 = vmatpush1.msra.mxu1 %v95_v3  ;;  %v4381_v10 = vld [vmem:[%s6214_s0] sm:$0xff]  ;;  %v100_v13 = vld [vmem:[#allocation3 + $0xe8] sm:$0xff]  ;;  %v89_v20 = vld [vmem:[#allocation3 + $0x90] sm:$0xff] }
  0x2e   :  { %199 = vmatprep.subr.mxu0 %v88_v4  ;;  %3954 = vmatprep.subr.mxu1 %v88_v4  ;;  %v4386_v11 = vld [vmem:[%s6214_s0 + $0x20] sm:$0xff]  ;;  %v4395_v16 = vld [vmem:[%s6214_s0 + $0x8] sm:$0xff]  ;;  %v4411_v22 = vld [vmem:[%s6214_s0 + $0x10] sm:$0xff] }
  0x2f   :  { %200 = vmatpush1.msra.mxu0 %v87_v5  ;;  %3958 = vmatpush1.msra.mxu1 %v87_v5  ;;  %v99_v15 = vld [vmem:[#allocation3 + $0xe0] sm:$0xff]  ;;  %v4400_v17 = vld [vmem:[%s6214_s0 + $0x28] sm:$0xff]  ;;  %v4416_v23 = vld [vmem:[%s6214_s0 + $0x30] sm:$0xff] }
  0x30   :  { %201 = vmatprep.subr.mxu0 %v80_v6  ;;  %3955 = vmatprep.subr.mxu1 %v80_v6  ;;  %v92_v19 = vld [vmem:[#allocation3 + $0xa8] sm:$0xff]  ;;  %v91_v21 = vld [vmem:[#allocation3 + $0xa0] sm:$0xff]  ;;  %v82_v24 = vld [vmem:[#allocation3 + $0x58] sm:$0xff] }
  0x31   :  { %202 = vmatpush1.msra.mxu0 %v79_v7  ;;  %3959 = vmatpush1.msra.mxu1 %v79_v7  ;;  %v84_v25 = vld [vmem:[#allocation3 + $0x68] sm:$0xff]  ;;  %v81_v26 = vld [vmem:[#allocation3 + $0x50] sm:$0xff]  ;;  %v83_v27 = vld [vmem:[#allocation3 + $0x60] sm:$0xff] }
  0x32   :  { %203 = vmatprep.subr.mxu0 %v72_v8  ;;  %3956 = vmatprep.subr.mxu1 %v72_v8  ;;  %v4427_v28 = vld [vmem:[%s6214_s0 + $0x18] sm:$0xff]  ;;  %v76_v31 = vld [vmem:[#allocation3 + $0x28] sm:$0xff]  ;;  %v73_v32 = vld [vmem:[#allocation3 + $0x10] sm:$0xff] }
  0x33   :  { %204 = vmatpush1.msra.mxu0 %v71_v9  ;;  %3960 = vmatpush1.msra.mxu1 %v71_v9  ;;  %v4432_v29 = vld [vmem:[%s6214_s0 + $0x38] sm:$0xff]  ;;  %v75_v33 = vld [vmem:[#allocation3 + $0x20] sm:$0xff]  ;;  %v101_v35 = vld [vmem:[#allocation3 + $0xf0] sm:$0xff] }
  0x34   :  { %3635 = vmatmul.mubr.msk.f32.vlgmr.msra.gmra.mxu0 %vm148_vm0, %v4381_v10  ;;  %3639 = vmatmul.mubr.msk.f32.vlgmr.msra.gmra.mxu1 %vm148_vm0, %v4386_v11  ;;  %v74_v30 = vld [vmem:[#allocation3 + $0x18] sm:$0xff]  ;;  %v93_v38 = vld [vmem:[#allocation3 + $0xb0] sm:$0xff]  ;;  %v691_v42 = vld [vmem:[#allocation8 + $0x108] sm:$0xff] }
  0x35   :  { %310 = vmatprep.subr.mxu1 %v98_v12  ;;  %423 = vmatprep.subr.mxu0 %v100_v13  ;;  %v102_v34 = vld [vmem:[#allocation3 + $0xf8] sm:$0xff]  ;;  %v692_v39 = vld [vmem:[#allocation8 + $0x110] sm:$0xff]  ;;  %v836_v44 = vld [vmem:[#allocation6 + $0x1c0] sm:$0xff] }
  0x36   :  { %311 = vmatpush1.msra.mxu1 %v97_v14  ;;  %424 = vmatpush1.msra.mxu0 %v99_v15  ;;  %v693_v36 = vld [vmem:[#allocation8 + $0x118] sm:$0xff]  ;;  %v85_v41 = vld [vmem:[#allocation3 + $0x70] sm:$0xff]  ;;  %v840_v45 = vld [vmem:[#allocation6 + $0x1e0] sm:$0xff] }
  0x37   :  { %243 = vmatprep.mubr.f32.mxu0 %v6220_v0  ;;  %267 = vmatprep.mubr.f32.mxu1 %v6220_v0  ;;  %v94_v37 = vld [vmem:[#allocation3 + $0xb8] sm:$0xff]  ;;  %v837_v46 = vld [vmem:[#allocation6 + $0x1c8] sm:$0xff]  ;;  %v77_v48 = vld [vmem:[#allocation3 + $0x30] sm:$0xff]  ;;  %v4470_v50 = vcombine.high %v836_v44, %v840_v45  ;;  %v4504_v57 = vcombine.low %v836_v44, %v840_v45 }
  0x38   :  { %3636 = vmatmul.mubr.msk.f32.gmra.mxu0 %vm148_vm0, %v4395_v16  ;;  %3640 = vmatmul.mubr.msk.f32.gmra.mxu1 %vm148_vm0, %v4400_v17  ;;  %v86_v40 = vld [vmem:[#allocation3 + $0x78] sm:$0xff]  ;;  %v841_v47 = vld [vmem:[#allocation6 + $0x1e8] sm:$0xff]  ;;  %v690_v49 = vld [vmem:[#allocation8 + $0x100] sm:$0xff] }
  0x39   :  { %312 = vmatprep.subr.mxu1 %v90_v18  ;;  %425 = vmatprep.subr.mxu0 %v92_v19  ;;  %v78_v43 = vld [vmem:[#allocation3 + $0x38] sm:$0xff]  ;;  %6489 = vst [vmem:[#allocation13_spill] sm:$0xff] %v4470_v50  ;;  %v4472_v51 = vcombine.high %v837_v46, %v841_v47  ;;  %v828_v52 = vld [vmem:[#allocation6 + $0x180] sm:$0xff]  ;;  %v829_v54 = vld [vmem:[#allocation6 + $0x188] sm:$0xff]  ;;  %v4506_v58 = vcombine.low %v837_v46, %v841_v47 }
  0x3a   :  { %313 = vmatpush1.msra.mxu1 %v89_v20  ;;  %426 = vmatpush1.msra.mxu0 %v91_v21  ;;  %v832_v53 = vld [vmem:[#allocation6 + $0x1a0] sm:$0xff]  ;;  %v833_v55 = vld [vmem:[#allocation6 + $0x1a8] sm:$0xff]  ;;  %6491 = vst [vmem:[#allocation15_spill] sm:$0xff] %v4504_v57 }
  0x3b   :  { %249 = vmatprep.mubr.f32.mxu0 %v6220_v0  ;;  %273 = vmatprep.mubr.f32.mxu1 %v6220_v0  ;;  %6490 = vst [vmem:[#allocation14_spill] sm:$0xff] %v4472_v51  ;;  %v689_v56 = vld [vmem:[%s6215_s1] sm:$0xff]  ;;  %6492 = vst [vmem:[#allocation16_spill] sm:$0xff] %v4506_v58  ;;  %v4508_v59 = vcombine.high %v828_v52, %v832_v53  ;;  %v4510_v60 = vcombine.high %v829_v54, %v833_v55  ;;  %v821_v63 = vld [vmem:[#allocation6 + $0x148] sm:$0xff]  ;;  %s4334_s1 = smov [#allocation9]  }
  0x3c   :  { %3637 = vmatmul.mubr.msk.f32.gmra.mxu0 %vm148_vm0, %v4411_v22  ;;  %3641 = vmatmul.mubr.msk.f32.gmra.mxu1 %vm148_vm0, %v4416_v23  ;;  %v820_v61 = vld [vmem:[#allocation6 + $0x140] sm:$0xff]  ;;  %v825_v2 = vld [vmem:[#allocation6 + $0x168] sm:$0xff]  ;;  %v4517_v3 = vcombine.low %v828_v52, %v832_v53  ;;  %v4519_v4 = vcombine.low %v829_v54, %v833_v55  ;;  %s3625_s28 = sshll.u32 %s4334_s1, 4  ;;  %s3626_s28 = int_to_ptr.vmem [resolvable:$true] %s3625_s28 }
  0x3d   :  { %314 = vmatprep.subr.mxu1 %v82_v24  ;;  %427 = vmatprep.subr.mxu0 %v84_v25  ;;  %6493 = vst [vmem:[#allocation17_spill] sm:$0xff] %v4508_v59  ;;  %6494 = vst [vmem:[#allocation18_spill] sm:$0xff] %v4510_v60  ;;  %v824_v62 = vld [vmem:[#allocation6 + $0x160] sm:$0xff]  ;;  %v4525_v6 = vcombine.high %v821_v63, %v825_v2  ;;  %v813_v9 = vld [vmem:[#allocation6 + $0x108] sm:$0xff]  ;;  %v4535_v13 = vcombine.low %v821_v63, %v825_v2  ;;  %s4296_s29 = scalar_lea.vmem %s3626_s28, 128  ;;  %p4301_p2 = scmp.lt.s32.totalorder %s3626_s28, %s3626_s28 }
  0x3e   :  { %315 = vmatpush1.msra.mxu1 %v81_v26  ;;  %428 = vmatpush1.msra.mxu0 %v83_v27  ;;  %6495 = vst [vmem:[#allocation19_spill] sm:$0xff] %v4517_v3  ;;  %6496 = vst [vmem:[#allocation20_spill] sm:$0xff] %v4519_v4  ;;  %v4523_v5 = vcombine.high %v820_v61, %v824_v62  ;;  %v812_v7 = vld [vmem:[#allocation6 + $0x100] sm:$0xff]  ;;  %v4533_v12 = vcombine.low %v820_v61, %v824_v62  ;;  %v805_v20 = vld [vmem:[#allocation6 + $0xc8] sm:$0xff]  ;;  %p4297_p1 = scmp.ne.s32.totalorder %s3626_s28, %s4296_s29  ;;  %p4302_p3 = scmp.lt.s32.totalorder %s4296_s29, %s4296_s29 }
  0x3f   :  { %255 = vmatprep.mubr.f32.mxu0 %v6220_v0  ;;  %279 = vmatprep.mubr.f32.mxu1 %v6220_v0  ;;  %6498 = vst [vmem:[#allocation22_spill] sm:$0xff] %v4525_v6  ;;  %v816_v8 = vld [vmem:[#allocation6 + $0x120] sm:$0xff]  ;;  %6500 = vst [vmem:[#allocation24_spill] sm:$0xff] %v4535_v13  ;;  %v781_v45 = vld [vmem:[#allocation6 + $0x8] sm:$0xff] }
  0x40   :  { %3638 = vmatmul.mubr.msk.f32.gmra.mxu0 %vm148_vm0, %v4427_v28  ;;  %3642 = vmatmul.mubr.msk.f32.gmra.mxu1 %vm148_vm0, %v4432_v29  ;;  %6497 = vst [vmem:[#allocation21_spill] sm:$0xff] %v4523_v5  ;;  %6499 = vst [vmem:[#allocation23_spill] sm:$0xff] %v4533_v12  ;;  %v4539_v14 = vcombine.high %v812_v7, %v816_v8  ;;  %v804_v18 = vld [vmem:[#allocation6 + $0xc0] sm:$0xff]  ;;  %v4548_v21 = vcombine.low %v812_v7, %v816_v8  ;;  %v901_v54 = vld [vmem:[#allocation6 + $0x3c8] sm:$0xff]  ;;  %p4303_p4 = por %p4302_p3, %p4301_p2 }
  0x41   :  { %316 = vmatprep.subr.mxu1 %v74_v30  ;;  %429 = vmatprep.subr.mxu0 %v76_v31  ;;  %v808_v19 = vld [vmem:[#allocation6 + $0xe0] sm:$0xff]  ;;  %v797_v31 = vld [vmem:[#allocation6 + $0x88] sm:$0xff] }
  0x42   :  { %317 = vmatpush1.msra.mxu1 %v73_v32  ;;  %430 = vmatpush1.msra.mxu0 %v75_v33  ;;  %6501 = vst [vmem:[#allocation25_spill] sm:$0xff] %v4539_v14  ;;  %6503 = vst [vmem:[#allocation27_spill] sm:$0xff] %v4548_v21  ;;  %v4554_v25 = vcombine.high %v804_v18, %v808_v19  ;;  %v796_v27 = vld [vmem:[#allocation6 + $0x80] sm:$0xff]  ;;  %v4563_v32 = vcombine.low %v804_v18, %v808_v19  ;;  %v893_v7 = vld [vmem:[#allocation6 + $0x388] sm:$0xff]  ;;  %p4304_p5 = pnand %p4303_p4, %p4297_p1 }
  0x43   :  { %350 = vmatprep.mubr.f32.mxu1 %v6220_v0  ;;  %463 = vmatprep.mubr.f32.mxu0 %v6220_v0  ;;  %v800_v30 = vld [vmem:[#allocation6 + $0xa0] sm:$0xff] }
  0x44   :  { %3643 = vmatmul.mubr.msk.f32.vlgmr.msra.gmra.mxu1 %vm148_vm0, %v4381_v10  ;;  %3651 = vmatmul.mubr.msk.f32.vlgmr.msra.gmra.mxu0 %vm148_vm0, %v4381_v10  ;;  %6505 = vst [vmem:[#allocation29_spill] sm:$0xff] %v4554_v25  ;;  %6507 = vst [vmem:[#allocation31_spill] sm:$0xff] %v4563_v32  ;;  %v784_v44 = vld [vmem:[#allocation6 + $0x20] sm:$0xff] }
  0x45   :  { %536 = vmatprep.subr.mxu1 %v102_v34  ;;  %3907 = vmatprep.subr.mxu0 %v6220_v0  ;;  %v4569_v34 = vcombine.high %v796_v27, %v800_v30  ;;  %v900_v52 = vld [vmem:[#allocation6 + $0x3c0] sm:$0xff] }
  0x46   :  { %537 = vmatpush1.msra.mxu1 %v101_v35  ;;  %3908 = vmatpush3.msra.mxu0 %v693_v36  ;;  %v788_v36 = vld [vmem:[#allocation6 + $0x40] sm:$0xff] }
  0x47   :  { %356 = vmatprep.mubr.f32.mxu1 %v6220_v0  ;;  %469 = vmatprep.mubr.f32.mxu0 %v6220_v0  ;;  %6509 = vst [vmem:[#allocation33_spill] sm:$0xff] %v4569_v34  ;;  %v904_v53 = vld [vmem:[#allocation6 + $0x3e0] sm:$0xff] }
  0x48   :  { %3644 = vmatmul.mubr.msk.f32.gmra.mxu1 %vm148_vm0, %v4395_v16  ;;  %3652 = vmatmul.mubr.msk.f32.gmra.mxu0 %vm148_vm0, %v4395_v16  ;;  %v4614_v61 = vcombine.high %v900_v52, %v904_v53  ;;  %v892_v63 = vld [vmem:[#allocation6 + $0x380] sm:$0xff]  ;;  %v4623_v8 = vcombine.low %v900_v52, %v904_v53 }
  0x49   :  { %362 = vmatprep.mubr.f32.mxu1 %v6220_v0  ;;  %475 = vmatprep.mubr.f32.mxu0 %v6220_v0  ;;  %v896_v2 = vld [vmem:[#allocation6 + $0x3a0] sm:$0xff] }
  0x4a   :  { %538 = vmatprep.subr.mxu1 %v94_v37  ;;  %3909 = vmatprep.subr.mxu0 %v6220_v0  ;;  %v792_v37 = vld [vmem:[#allocation6 + $0x60] sm:$0xff]  ;;  %6521 = vst [vmem:[#allocation45_spill] sm:$0xff] %v4614_v61  ;;  %6523 = vst [vmem:[#allocation47_spill] sm:$0xff] %v4623_v8 }
  0x4b   :  { %539 = vmatpush1.msra.mxu1 %v93_v38  ;;  %3910 = vmatpush3.msra.mxu0 %v692_v39  ;;  %v789_v38 = vld [vmem:[#allocation6 + $0x48] sm:$0xff]  ;;  %v4578_v39 = vcombine.low %v796_v27, %v800_v30  ;;  %v4593_v46 = vcombine.low %v788_v36, %v792_v37  ;;  %v884_v19 = vld [vmem:[#allocation6 + $0x340] sm:$0xff]  ;;  %v4636_v27 = vcombine.low %v892_v63, %v896_v2 }
  0x4c   :  { %3645 = vmatmul.mubr.msk.f32.gmra.mxu1 %vm148_vm0, %v4411_v22  ;;  %3653 = vmatmul.mubr.msk.f32.gmra.mxu0 %vm148_vm0, %v4411_v22  ;;  %v868_v52 = vld [vmem:[#allocation6 + $0x2c0] sm:$0xff] }
  0x4d   :  { %368 = vmatprep.mubr.f32.mxu1 %v6220_v0  ;;  %481 = vmatprep.mubr.f32.mxu0 %v6220_v0  ;;  %6511 = vst [vmem:[#allocation35_spill] sm:$0xff] %v4578_v39  ;;  %6515 = vst [vmem:[#allocation39_spill] sm:$0xff] %v4593_v46  ;;  %v872_v53 = vld [vmem:[#allocation6 + $0x2e0] sm:$0xff] }
  0x4e   :  { %540 = vmatprep.subr.mxu1 %v86_v40  ;;  %3911 = vmatprep.subr.mxu0 %v6220_v0  ;;  %6527 = vst [vmem:[#allocation51_spill] sm:$0xff] %v4636_v27 }
  0x4f   :  { %541 = vmatpush1.msra.mxu1 %v85_v41  ;;  %3912 = vmatpush3.msra.mxu0 %v691_v42  ;;  %v4584_v41 = vcombine.high %v788_v36, %v792_v37  ;;  %v876_v36 = vld [vmem:[#allocation6 + $0x300] sm:$0xff] }
  0x50   :  { %3646 = vmatmul.mubr.msk.f32.gmra.mxu1 %vm148_vm0, %v4427_v28  ;;  %3654 = vmatmul.mubr.msk.f32.gmra.mxu0 %vm148_vm0, %v4427_v28  ;;  %v880_v37 = vld [vmem:[#allocation6 + $0x320] sm:$0xff] }
  0x51   :  { %374 = vmatprep.mubr.f32.mxu1 %v6220_v0  ;;  %487 = vmatprep.mubr.f32.mxu0 %v6220_v0  ;;  %6513 = vst [vmem:[#allocation37_spill] sm:$0xff] %v4584_v41 }
  0x52   :  { %542 = vmatprep.subr.mxu1 %v78_v43  ;;  %3913 = vmatprep.subr.mxu0 %v6220_v0  ;;  %v780_v43 = vld [vmem:[#allocation6] sm:$0xff] }
  0x53   :  { %543 = vmatpush1.msra.mxu1 %v77_v48  ;;  %3914 = vmatpush3.msra.mxu0 %v690_v49  ;;  %v4599_v48 = vcombine.high %v780_v43, %v784_v44  ;;  %v4608_v55 = vcombine.low %v780_v43, %v784_v44 }
  0x54   :  { %3647 = vmatmul.mubr.msk.f32.gmra.mxu1 %vm148_vm0, %v4386_v11  ;;  %3655 = vmatmul.mubr.msk.f32.gmra.mxu0 %vm148_vm0, %v4386_v11 }
  0x55   :  { %380 = vmatprep.mubr.f32.mxu1 %v6220_v0  ;;  %493 = vmatprep.mubr.f32.mxu0 %v6220_v0  ;;  %6517 = vst [vmem:[#allocation41_spill] sm:$0xff] %v4599_v48  ;;  %6519 = vst [vmem:[#allocation43_spill] sm:$0xff] %v4608_v55 }
  0x56   :  { %1548 = vmatprep.subr.bf16.mxu1 %v4470_v50  ;;  %1589 = vmatprep.subr.bf16.mxu0 %v4472_v51 }
  0x58   :  { %3648 = vmatmul.mubr.msk.f32.gmra.mxu1 %vm148_vm0, %v4400_v17  ;;  %3656 = vmatmul.mubr.msk.f32.gmra.mxu0 %vm148_vm0, %v4400_v17 }
  0x59   :  { %386 = vmatprep.mubr.f32.mxu1 %v6220_v0  ;;  %499 = vmatprep.mubr.f32.mxu0 %v6220_v0 }
  0x5c   :  { %3649 = vmatmul.mubr.msk.f32.gmra.mxu1 %vm148_vm0, %v4416_v23  ;;  %3657 = vmatmul.mubr.msk.f32.gmra.mxu0 %vm148_vm0, %v4416_v23 }
  0x5d   :  { %392 = vmatprep.mubr.f32.mxu1 %v6220_v0  ;;  %505 = vmatprep.mubr.f32.mxu0 %v6220_v0 }
  0x60   :  { %3650 = vmatmul.mubr.msk.f32.gmra.mxu1 %vm148_vm0, %v4432_v29  ;;  %3658 = vmatmul.mubr.msk.f32.gmra.mxu0 %vm148_vm0, %v4432_v29 }
  0x61   :  { %576 = vmatprep.mubr.f32.mxu1 %v6220_v0  ;;  %3915 = vmatprep.mubr.msk.f32.mxu0 %vm4333_vm1, %v6220_v0 }
  0x64   :  { %3659 = vmatmul.mubr.msk.f32.vlgmr.msra.gmra.mxu1 %vm148_vm0, %v4381_v10  ;;  %3916 = vmatmul.mubr.msk.f32.vlgmr.msra.gmra.mxu0 %vm148_vm0, %v689_v56  ;;  %v817_v10 = vld [vmem:[#allocation6 + $0x128] sm:$0xff] }
  0x65   :  { %1549 = vmatpush1.bf16.msra.mxu1 %v4504_v57  ;;  %1590 = vmatpush1.bf16.msra.mxu0 %v4506_v58  ;;  %v4541_v15 = vcombine.high %v813_v9, %v817_v10  ;;  %v4550_v24 = vcombine.low %v813_v9, %v817_v10  ;;  %v4629_v10 = vcombine.high %v892_v63, %v896_v2 }
  0x66   :  { %1550 = vmatprep.subr.bf16.mxu1 %v4508_v59  ;;  %1591 = vmatprep.subr.bf16.mxu0 %v4510_v60  ;;  %v4660_v63 = vcombine.low %v876_v36, %v880_v37 }
  0x67   :  { %582 = vmatprep.mubr.f32.mxu1 %v6220_v0  ;;  %1621 = vmatprep.mubr.bf16.mxu0 %v6222_v1  ;;  %6502 = vst [vmem:[#allocation26_spill] sm:$0xff] %v4541_v15  ;;  %6504 = vst [vmem:[#allocation28_spill] sm:$0xff] %v4550_v24 }
  0x68   :  { %3660 = vmatmul.mubr.msk.f32.gmra.mxu1 %vm148_vm0, %v4395_v16  ;;  %v809_v16 = vld [vmem:[#allocation6 + $0xe8] sm:$0xff]  ;;  %6525 = vst [vmem:[#allocation49_spill] sm:$0xff] %v4629_v10  ;;  %6535 = vst [vmem:[#allocation59_spill] sm:$0xff] %v4660_v63 }
  0x69   :  { %1551 = vmatpush1.bf16.msra.mxu1 %v4517_v3  ;;  %1592 = vmatpush1.bf16.msra.mxu0 %v4519_v4  ;;  %v4556_v26 = vcombine.high %v805_v20, %v809_v16  ;;  %v4565_v33 = vcombine.low %v805_v20, %v809_v16  ;;  %v888_v20 = vld [vmem:[#allocation6 + $0x360] sm:$0xff]  ;;  %v885_v16 = vld [vmem:[#allocation6 + $0x348] sm:$0xff] }
  0x6a   :  { %1552 = vmatprep.subr.bf16.mxu1 %v4523_v5  ;;  %1593 = vmatprep.subr.bf16.mxu0 %v4525_v6  ;;  %v4648_v43 = vcombine.low %v884_v19, %v888_v20 }
  0x6b   :  { %588 = vmatprep.mubr.f32.mxu1 %v6220_v0  ;;  %6506 = vst [vmem:[#allocation30_spill] sm:$0xff] %v4556_v26  ;;  %6508 = vst [vmem:[#allocation32_spill] sm:$0xff] %v4565_v33 }
  0x6c   :  { %3661 = vmatmul.mubr.msk.f32.gmra.mxu1 %vm148_vm0, %v4411_v22  ;;  %v801_v22 = vld [vmem:[#allocation6 + $0xa8] sm:$0xff]  ;;  %6531 = vst [vmem:[#allocation55_spill] sm:$0xff] %v4648_v43 }
  0x6d   :  { %1553 = vmatpush1.bf16.msra.mxu1 %v4533_v12  ;;  %1594 = vmatpush1.bf16.msra.mxu0 %v4535_v13  ;;  %v4571_v35 = vcombine.high %v797_v31, %v801_v22  ;;  %v4580_v40 = vcombine.low %v797_v31, %v801_v22  ;;  %v4642_v31 = vcombine.high %v884_v19, %v888_v20  ;;  %v860_v19 = vld [vmem:[#allocation6 + $0x280] sm:$0xff] }
  0x6e   :  { %1554 = vmatprep.subr.bf16.mxu1 %v4539_v14  ;;  %1595 = vmatprep.subr.bf16.mxu0 %v4541_v15  ;;  %v864_v20 = vld [vmem:[#allocation6 + $0x2a0] sm:$0xff] }
  0x6f   :  { %594 = vmatprep.mubr.f32.mxu1 %v6220_v0  ;;  %6510 = vst [vmem:[#allocation34_spill] sm:$0xff] %v4571_v35  ;;  %6512 = vst [vmem:[#allocation36_spill] sm:$0xff] %v4580_v40 }
  0x70   :  { %3662 = vmatmul.mubr.msk.f32.gmra.mxu1 %vm148_vm0, %v4427_v28  ;;  %v793_v28 = vld [vmem:[#allocation6 + $0x68] sm:$0xff]  ;;  %6529 = vst [vmem:[#allocation53_spill] sm:$0xff] %v4642_v31 }
  0x71   :  { %1555 = vmatpush1.bf16.msra.mxu1 %v4548_v21  ;;  %1596 = vmatpush1.bf16.msra.mxu0 %v4550_v24  ;;  %v4586_v42 = vcombine.high %v789_v38, %v793_v28  ;;  %v4595_v47 = vcombine.low %v789_v38, %v793_v28  ;;  %v877_v38 = vld [vmem:[#allocation6 + $0x308] sm:$0xff] }
  0x72   :  { %1556 = vmatprep.subr.bf16.mxu1 %v4554_v25  ;;  %1597 = vmatprep.subr.bf16.mxu0 %v4556_v26  ;;  %v881_v28 = vld [vmem:[#allocation6 + $0x328] sm:$0xff] }
  0x73   :  { %600 = vmatprep.mubr.f32.mxu1 %v6220_v0  ;;  %6514 = vst [vmem:[#allocation38_spill] sm:$0xff] %v4586_v42  ;;  %6516 = vst [vmem:[#allocation40_spill] sm:$0xff] %v4595_v47  ;;  %v4662_v2 = vcombine.low %v877_v38, %v881_v28 }
  0x74   :  { %3663 = vmatmul.mubr.msk.f32.gmra.mxu1 %vm148_vm0, %v4386_v11  ;;  %v785_v11 = vld [vmem:[#allocation6 + $0x28] sm:$0xff] }
  0x75   :  { %1557 = vmatpush1.bf16.msra.mxu1 %v4563_v32  ;;  %1598 = vmatpush1.bf16.msra.mxu0 %v4565_v33  ;;  %v4601_v49 = vcombine.high %v781_v45, %v785_v11  ;;  %v4610_v56 = vcombine.low %v781_v45, %v785_v11  ;;  %v4654_v45 = vcombine.high %v876_v36, %v880_v37 }
  0x76   :  { %1558 = vmatprep.subr.bf16.mxu1 %v4569_v34  ;;  %1599 = vmatprep.subr.bf16.mxu0 %v4571_v35  ;;  %v4656_v11 = vcombine.high %v877_v38, %v881_v28  ;;  %6536 = vst [vmem:[#allocation60_spill] sm:$0xff] %v4662_v2  ;;  %v4672_v36 = vcombine.low %v868_v52, %v872_v53 }
  0x77   :  { %606 = vmatprep.mubr.f32.mxu1 %v6220_v0  ;;  %6518 = vst [vmem:[#allocation42_spill] sm:$0xff] %v4601_v49  ;;  %6520 = vst [vmem:[#allocation44_spill] sm:$0xff] %v4610_v56  ;;  %v4678_v38 = vcombine.high %v860_v19, %v864_v20 }
  0x78   :  { %3664 = vmatmul.mubr.msk.f32.gmra.mxu1 %vm148_vm0, %v4400_v17  ;;  %v905_v17 = vld [vmem:[#allocation6 + $0x3e8] sm:$0xff]  ;;  %6533 = vst [vmem:[#allocation57_spill] sm:$0xff] %v4654_v45  ;;  %6534 = vst [vmem:[#allocation58_spill] sm:$0xff] %v4656_v11 }
  0x79   :  { %1559 = vmatpush1.bf16.msra.mxu1 %v4578_v39  ;;  %1600 = vmatpush1.bf16.msra.mxu0 %v4580_v40  ;;  %v4616_v62 = vcombine.high %v901_v54, %v905_v17  ;;  %v4625_v9 = vcombine.low %v901_v54, %v905_v17  ;;  %v869_v54 = vld [vmem:[#allocation6 + $0x2c8] sm:$0xff]  ;;  %6539 = vst [vmem:[#allocation63_spill] sm:$0xff] %v4672_v36  ;;  %6541 = vst [vmem:[#allocation65_spill] sm:$0xff] %v4678_v38 }
  0x7a   :  { %1560 = vmatprep.subr.bf16.mxu1 %v4584_v41  ;;  %1601 = vmatprep.subr.bf16.mxu0 %v4586_v42  ;;  %v873_v17 = vld [vmem:[#allocation6 + $0x2e8] sm:$0xff] }
  0x7b   :  { %612 = vmatprep.mubr.f32.mxu1 %v6220_v0  ;;  %6522 = vst [vmem:[#allocation46_spill] sm:$0xff] %v4616_v62  ;;  %6524 = vst [vmem:[#allocation48_spill] sm:$0xff] %v4625_v9  ;;  %v4674_v37 = vcombine.low %v869_v54, %v873_v17 }
  0x7c   :  { %3665 = vmatmul.mubr.msk.f32.gmra.mxu1 %vm148_vm0, %v4416_v23  ;;  %v897_v23 = vld [vmem:[#allocation6 + $0x3a8] sm:$0xff] }
  0x7d   :  { %1561 = vmatpush1.bf16.msra.mxu1 %v4593_v46  ;;  %1602 = vmatpush1.bf16.msra.mxu0 %v4595_v47  ;;  %v4631_v18 = vcombine.high %v893_v7, %v897_v23  ;;  %v4638_v30 = vcombine.low %v893_v7, %v897_v23  ;;  %v4666_v7 = vcombine.high %v868_v52, %v872_v53 }
  0x7e   :  { %1562 = vmatprep.subr.bf16.mxu1 %v4599_v48  ;;  %1603 = vmatprep.subr.bf16.mxu0 %v4601_v49  ;;  %v4668_v23 = vcombine.high %v869_v54, %v873_v17  ;;  %6540 = vst [vmem:[#allocation64_spill] sm:$0xff] %v4674_v37  ;;  %v4684_v52 = vcombine.low %v860_v19, %v864_v20 }
  0x7f   :  { %618 = vmatprep.mubr.f32.mxu1 %v6220_v0  ;;  %6526 = vst [vmem:[#allocation50_spill] sm:$0xff] %v4631_v18  ;;  %6528 = vst [vmem:[#allocation52_spill] sm:$0xff] %v4638_v30  ;;  %v852_v0 = vld [vmem:[#allocation6 + $0x240] sm:$0xff] }
  0x80   :  { %3666 = vmatmul.mubr.msk.f32.gmra.mxu1 %vm148_vm0, %v4432_v29  ;;  %v889_v29 = vld [vmem:[#allocation6 + $0x368] sm:$0xff]  ;;  %6537 = vst [vmem:[#allocation61_spill] sm:$0xff] %v4666_v7  ;;  %6538 = vst [vmem:[#allocation62_spill] sm:$0xff] %v4668_v23 }
  0x81   :  { %1563 = vmatpush1.bf16.msra.mxu1 %v4608_v55  ;;  %1604 = vmatpush1.bf16.msra.mxu0 %v4610_v56  ;;  %v4644_v22 = vcombine.high %v885_v16, %v889_v29  ;;  %v4650_v44 = vcombine.low %v885_v16, %v889_v29  ;;  %v861_v16 = vld [vmem:[#allocation6 + $0x288] sm:$0xff]  ;;  %6543 = vst [vmem:[#allocation67_spill] sm:$0xff] %v4684_v52 }
  0x82   :  { %1564 = vmatprep.subr.bf16.mxu1 %v4614_v61  ;;  %1605 = vmatprep.subr.bf16.mxu0 %v4616_v62  ;;  %v865_v29 = vld [vmem:[#allocation6 + $0x2a8] sm:$0xff] }
  0x83   :  { %1580 = vmatprep.mubr.bf16.mxu1 %v6222_v1  ;;  %6530 = vst [vmem:[#allocation54_spill] sm:$0xff] %v4644_v22  ;;  %6532 = vst [vmem:[#allocation56_spill] sm:$0xff] %v4650_v44  ;;  %v4680_v28 = vcombine.high %v861_v16, %v865_v29  ;;  %v856_v1 = vld [vmem:[#allocation6 + $0x260] sm:$0xff]  ;;  %v4686_v53 = vcombine.low %v861_v16, %v865_v29 }
  0x84   :  { %v4690_v54 = vcombine.high %v852_v0, %v856_v1  ;;  %v4696_v19 = vcombine.low %v852_v0, %v856_v1 }
  0x85   :  { %1565 = vmatpush2.bf16.msra.mxu1 %v4623_v8  ;;  %1606 = vmatpush2.bf16.msra.mxu0 %v4625_v9  ;;  %6542 = vst [vmem:[#allocation66_spill] sm:$0xff] %v4680_v28  ;;  %6544 = vst [vmem:[#allocation68_spill] sm:$0xff] %v4686_v53 }
  0x86   :  { %1566 = vmatprep.subr.bf16.mxu1 %v4629_v10  ;;  %1607 = vmatprep.subr.bf16.mxu0 %v4631_v18  ;;  %6545 = vst [vmem:[#allocation69_spill] sm:$0xff] %v4690_v54  ;;  %6547 = vst [vmem:[#allocation71_spill] sm:$0xff] %v4696_v19 }
  0x89   :  { %1567 = vmatpush2.bf16.msra.mxu1 %v4636_v27  ;;  %1608 = vmatpush2.bf16.msra.mxu0 %v4638_v30 }
  0x8a   :  { %1568 = vmatprep.subr.bf16.mxu1 %v4642_v31  ;;  %1609 = vmatprep.subr.bf16.mxu0 %v4644_v22 }
  0x8d   :  { %1569 = vmatpush2.bf16.msra.mxu1 %v4648_v43  ;;  %1610 = vmatpush2.bf16.msra.mxu0 %v4650_v44  ;;  %v6559_v44 = vmov 0  }
  0x8e   :  { %1570 = vmatprep.subr.bf16.mxu1 %v4654_v45  ;;  %1611 = vmatprep.subr.bf16.mxu0 %v4656_v11  ;;  %v853_v11 = vld [vmem:[#allocation6 + $0x248] sm:$0xff] }
  0x8f   :  { %v857_v45 = vld [vmem:[#allocation6 + $0x268] sm:$0xff] }
  0x90   :  { %v4692_v17 = vcombine.high %v853_v11, %v857_v45  ;;  %v4698_v20 = vcombine.low %v853_v11, %v857_v45 }
  0x91   :  { %1571 = vmatpush2.bf16.msra.mxu1 %v4660_v63  ;;  %1612 = vmatpush2.bf16.msra.mxu0 %v4662_v2  ;;  %v845_v2 = vld [vmem:[#allocation6 + $0x208] sm:$0xff] }
  0x92   :  { %1572 = vmatprep.subr.bf16.mxu1 %v4666_v7  ;;  %1613 = vmatprep.subr.bf16.mxu0 %v4668_v23  ;;  %6546 = vst [vmem:[#allocation70_spill] sm:$0xff] %v4692_v17  ;;  %v844_v23 = vld [vmem:[#allocation6 + $0x200] sm:$0xff]  ;;  %v849_v63 = vld [vmem:[#allocation6 + $0x228] sm:$0xff]  ;;  %6548 = vst [vmem:[#allocation72_spill] sm:$0xff] %v4698_v20 }
  0x93   :  { %v848_v7 = vld [vmem:[#allocation6 + $0x220] sm:$0xff]  ;;  %v4704_v29 = vcombine.high %v845_v2, %v849_v63  ;;  %v4710_v1 = vcombine.low %v845_v2, %v849_v63 }
  0x94   :  { %v4702_v16 = vcombine.high %v844_v23, %v848_v7  ;;  %v4708_v0 = vcombine.low %v844_v23, %v848_v7 }
  0x95   :  { %1573 = vmatpush2.bf16.msra.mxu1 %v4672_v36  ;;  %1614 = vmatpush2.bf16.msra.mxu0 %v4674_v37  ;;  %6550 = vst [vmem:[#allocation74_spill] sm:$0xff] %v4704_v29  ;;  %v839_v37 = vld [vmem:[#allocation6 + $0x1d8] sm:$0xff]  ;;  %6552 = vst [vmem:[#allocation76_spill] sm:$0xff] %v4710_v1 }
  0x96   :  { %1574 = vmatprep.subr.bf16.mxu1 %v4678_v38  ;;  %1615 = vmatprep.subr.bf16.mxu0 %v4680_v28  ;;  %6549 = vst [vmem:[#allocation73_spill] sm:$0xff] %v4702_v16  ;;  %v838_v28 = vld [vmem:[#allocation6 + $0x1d0] sm:$0xff]  ;;  %v843_v36 = vld [vmem:[#allocation6 + $0x1f8] sm:$0xff]  ;;  %6551 = vst [vmem:[#allocation75_spill] sm:$0xff] %v4708_v0 }
  0x97   :  { %v842_v38 = vld [vmem:[#allocation6 + $0x1f0] sm:$0xff]  ;;  %v4716_v11 = vcombine.high %v839_v37, %v843_v36  ;;  %v4722_v63 = vcombine.low %v839_v37, %v843_v36 }
  0x98   :  { %v4714_v45 = vcombine.high %v838_v28, %v842_v38  ;;  %v4720_v7 = vcombine.low %v838_v28, %v842_v38 }
  0x99   :  { %1575 = vmatpush2.bf16.msra.mxu1 %v4684_v52  ;;  %1616 = vmatpush2.bf16.msra.mxu0 %v4686_v53  ;;  %6554 = vst [vmem:[#allocation78_spill] sm:$0xff] %v4716_v11  ;;  %v831_v53 = vld [vmem:[#allocation6 + $0x198] sm:$0xff]  ;;  %6556 = vst [vmem:[#allocation80_spill] sm:$0xff] %v4722_v63 }
  0x9a   :  { %1576 = vmatprep.subr.bf16.mxu1 %v4690_v54  ;;  %1617 = vmatprep.subr.bf16.mxu0 %v4692_v17  ;;  %6553 = vst [vmem:[#allocation77_spill] sm:$0xff] %v4714_v45  ;;  %v830_v17 = vld [vmem:[#allocation6 + $0x190] sm:$0xff]  ;;  %v835_v52 = vld [vmem:[#allocation6 + $0x1b8] sm:$0xff]  ;;  %6555 = vst [vmem:[#allocation79_spill] sm:$0xff] %v4720_v7 }
  0x9b   :  { %v834_v54 = vld [vmem:[#allocation6 + $0x1b0] sm:$0xff]  ;;  %v4728_v23 = vcombine.high %v831_v53, %v835_v52  ;;  %v4736_v37 = vcombine.low %v831_v53, %v835_v52 }
  0x9c   :  { %v4726_v2 = vcombine.high %v830_v17, %v834_v54  ;;  %v4734_v36 = vcombine.low %v830_v17, %v834_v54 }
  0x9d   :  { %1577 = vmatpush2.bf16.msra.mxu1 %v4696_v19  ;;  %1618 = vmatpush2.bf16.msra.mxu0 %v4698_v20  ;;  %6558 = vst [vmem:[#allocation82_spill] sm:$0xff] %v4728_v23  ;;  %v823_v20 = vld [vmem:[#allocation6 + $0x158] sm:$0xff]  ;;  %6561 = vst [vmem:[#allocation84_spill] sm:$0xff] %v4736_v37 }
  0x9e   :  { %1578 = vmatprep.subr.bf16.mxu1 %v4702_v16  ;;  %1619 = vmatprep.subr.bf16.mxu0 %v4704_v29  ;;  %6557 = vst [vmem:[#allocation81_spill] sm:$0xff] %v4726_v2  ;;  %v822_v29 = vld [vmem:[#allocation6 + $0x150] sm:$0xff]  ;;  %v827_v19 = vld [vmem:[#allocation6 + $0x178] sm:$0xff]  ;;  %6560 = vst [vmem:[#allocation83_spill] sm:$0xff] %v4734_v36 }
  0x9f   :  { %v826_v16 = vld [vmem:[#allocation6 + $0x170] sm:$0xff]  ;;  %v4742_v28 = vcombine.high %v823_v20, %v827_v19  ;;  %v4750_v53 = vcombine.low %v823_v20, %v827_v19 }
  0xa0   :  { %v4740_v38 = vcombine.high %v822_v29, %v826_v16  ;;  %v4748_v52 = vcombine.low %v822_v29, %v826_v16 }
  0xa1   :  { %1579 = vmatpush2.bf16.msra.mxu1 %v4708_v0  ;;  %1620 = vmatpush2.bf16.msra.mxu0 %v4710_v1  ;;  %6563 = vst [vmem:[#allocation86_spill] sm:$0xff] %v4742_v28  ;;  %v815_v1 = vld [vmem:[#allocation6 + $0x118] sm:$0xff]  ;;  %6565 = vst [vmem:[#allocation88_spill] sm:$0xff] %v4750_v53 }
  0xa2   :  { %1630 = vmatprep.subr.bf16.mxu1 %v4714_v45  ;;  %1671 = vmatprep.subr.bf16.mxu0 %v4716_v11  ;;  %6562 = vst [vmem:[#allocation85_spill] sm:$0xff] %v4740_v38  ;;  %v814_v11 = vld [vmem:[#allocation6 + $0x110] sm:$0xff]  ;;  %v819_v0 = vld [vmem:[#allocation6 + $0x138] sm:$0xff]  ;;  %6564 = vst [vmem:[#allocation87_spill] sm:$0xff] %v4748_v52 }
  0xa3   :  { %v818_v45 = vld [vmem:[#allocation6 + $0x130] sm:$0xff]  ;;  %v4756_v17 = vcombine.high %v815_v1, %v819_v0  ;;  %v4762_v19 = vcombine.low %v815_v1, %v819_v0 }
  0xa4   :  { %1581 = vmatmul.mubr.bf16.vlgmr.msra.gmra.mxu1 %v6559_v44  ;;  %1622 = vmatmul.mubr.bf16.vlgmr.msra.gmra.mxu0 %v6559_v44  ;;  %v4754_v54 = vcombine.high %v814_v11, %v818_v45  ;;  %v4760_v16 = vcombine.low %v814_v11, %v818_v45 }
  0xa5   :  { %1631 = vmatpush1.bf16.msra.mxu1 %v4720_v7  ;;  %1672 = vmatpush1.bf16.msra.mxu0 %v4722_v63  ;;  %6567 = vst [vmem:[#allocation90_spill] sm:$0xff] %v4756_v17  ;;  %v807_v63 = vld [vmem:[#allocation6 + $0xd8] sm:$0xff]  ;;  %6569 = vst [vmem:[#allocation92_spill] sm:$0xff] %v4762_v19 }
  0xa6   :  { %1632 = vmatprep.subr.bf16.mxu1 %v4726_v2  ;;  %1673 = vmatprep.subr.bf16.mxu0 %v4728_v23  ;;  %6566 = vst [vmem:[#allocation89_spill] sm:$0xff] %v4754_v54  ;;  %v806_v23 = vld [vmem:[#allocation6 + $0xd0] sm:$0xff]  ;;  %v811_v7 = vld [vmem:[#allocation6 + $0xf8] sm:$0xff]  ;;  %6568 = vst [vmem:[#allocation91_spill] sm:$0xff] %v4760_v16 }
  0xa7   :  { %1662 = vmatprep.mubr.bf16.mxu1 %v6559_v44  ;;  %1703 = vmatprep.mubr.bf16.mxu0 %v6559_v44  ;;  %v810_v2 = vld [vmem:[#allocation6 + $0xf0] sm:$0xff]  ;;  %v4768_v29 = vcombine.high %v807_v63, %v811_v7  ;;  %v4774_v0 = vcombine.low %v807_v63, %v811_v7 }
  0xa8   :  { %v4766_v20 = vcombine.high %v806_v23, %v810_v2  ;;  %v4772_v45 = vcombine.low %v806_v23, %v810_v2 }
  0xa9   :  { %1633 = vmatpush1.bf16.msra.mxu1 %v4734_v36  ;;  %1674 = vmatpush1.bf16.msra.mxu0 %v4736_v37  ;;  %6571 = vst [vmem:[#allocation94_spill] sm:$0xff] %v4768_v29  ;;  %v799_v37 = vld [vmem:[#allocation6 + $0x98] sm:$0xff]  ;;  %6573 = vst [vmem:[#allocation96_spill] sm:$0xff] %v4774_v0 }
  0xaa   :  { %1634 = vmatprep.subr.bf16.mxu1 %v4740_v38  ;;  %1675 = vmatprep.subr.bf16.mxu0 %v4742_v28  ;;  %6570 = vst [vmem:[#allocation93_spill] sm:$0xff] %v4766_v20  ;;  %v798_v28 = vld [vmem:[#allocation6 + $0x90] sm:$0xff]  ;;  %v803_v36 = vld [vmem:[#allocation6 + $0xb8] sm:$0xff]  ;;  %6572 = vst [vmem:[#allocation95_spill] sm:$0xff] %v4772_v45 }
  0xab   :  { %v802_v38 = vld [vmem:[#allocation6 + $0xb0] sm:$0xff]  ;;  %v4780_v11 = vcombine.high %v799_v37, %v803_v36  ;;  %v4786_v7 = vcombine.low %v799_v37, %v803_v36 }
  0xac   :  { %v4778_v1 = vcombine.high %v798_v28, %v802_v38  ;;  %v4784_v2 = vcombine.low %v798_v28, %v802_v38 }
  0xad   :  { %1635 = vmatpush1.bf16.msra.mxu1 %v4748_v52  ;;  %1676 = vmatpush1.bf16.msra.mxu0 %v4750_v53  ;;  %6575 = vst [vmem:[#allocation98_spill] sm:$0xff] %v4780_v11  ;;  %v791_v53 = vld [vmem:[#allocation6 + $0x58] sm:$0xff]  ;;  %6577 = vst [vmem:[#allocation100_spill] sm:$0xff] %v4786_v7 }
  0xae   :  { %1636 = vmatprep.subr.bf16.mxu1 %v4754_v54  ;;  %1677 = vmatprep.subr.bf16.mxu0 %v4756_v17  ;;  %6574 = vst [vmem:[#allocation97_spill] sm:$0xff] %v4778_v1  ;;  %v790_v17 = vld [vmem:[#allocation6 + $0x50] sm:$0xff]  ;;  %v795_v52 = vld [vmem:[#allocation6 + $0x78] sm:$0xff]  ;;  %6576 = vst [vmem:[#allocation99_spill] sm:$0xff] %v4784_v2 }
  0xaf   :  { %v794_v54 = vld [vmem:[#allocation6 + $0x70] sm:$0xff]  ;;  %v4792_v23 = vcombine.high %v791_v53, %v795_v52  ;;  %v4798_v36 = vcombine.low %v791_v53, %v795_v52 }
  0xb0   :  { %v4790_v63 = vcombine.high %v790_v17, %v794_v54  ;;  %v4796_v38 = vcombine.low %v790_v17, %v794_v54 }
  0xb1   :  { %1637 = vmatpush1.bf16.msra.mxu1 %v4760_v16  ;;  %1678 = vmatpush1.bf16.msra.mxu0 %v4762_v19  ;;  %6579 = vst [vmem:[#allocation102_spill] sm:$0xff] %v4792_v23  ;;  %v783_v19 = vld [vmem:[#allocation6 + $0x18] sm:$0xff]  ;;  %6581 = vst [vmem:[#allocation104_spill] sm:$0xff] %v4798_v36 }
  0xb2   :  { %1638 = vmatprep.subr.bf16.mxu1 %v4766_v20  ;;  %1679 = vmatprep.subr.bf16.mxu0 %v4768_v29  ;;  %6578 = vst [vmem:[#allocation101_spill] sm:$0xff] %v4790_v63  ;;  %v782_v29 = vld [vmem:[#allocation6 + $0x10] sm:$0xff]  ;;  %v787_v16 = vld [vmem:[#allocation6 + $0x38] sm:$0xff]  ;;  %6580 = vst [vmem:[#allocation103_spill] sm:$0xff] %v4796_v38 }
  0xb3   :  { %v786_v20 = vld [vmem:[#allocation6 + $0x30] sm:$0xff]  ;;  %v4804_v28 = vcombine.high %v783_v19, %v787_v16  ;;  %v4810_v52 = vcombine.low %v783_v19, %v787_v16 }
  0xb4   :  { %v4802_v37 = vcombine.high %v782_v29, %v786_v20  ;;  %v4808_v54 = vcombine.low %v782_v29, %v786_v20 }
  0xb5   :  { %1639 = vmatpush1.bf16.msra.mxu1 %v4772_v45  ;;  %1680 = vmatpush1.bf16.msra.mxu0 %v4774_v0  ;;  %6583 = vst [vmem:[#allocation106_spill] sm:$0xff] %v4804_v28  ;;  %v903_v0 = vld [vmem:[#allocation6 + $0x3d8] sm:$0xff]  ;;  %6585 = vst [vmem:[#allocation108_spill] sm:$0xff] %v4810_v52 }
  0xb6   :  { %1640 = vmatprep.subr.bf16.mxu1 %v4778_v1  ;;  %1681 = vmatprep.subr.bf16.mxu0 %v4780_v11  ;;  %6582 = vst [vmem:[#allocation105_spill] sm:$0xff] %v4802_v37  ;;  %v902_v11 = vld [vmem:[#allocation6 + $0x3d0] sm:$0xff]  ;;  %v907_v45 = vld [vmem:[#allocation6 + $0x3f8] sm:$0xff]  ;;  %6584 = vst [vmem:[#allocation107_spill] sm:$0xff] %v4808_v54 }
  0xb7   :  { %v906_v1 = vld [vmem:[#allocation6 + $0x3f0] sm:$0xff]  ;;  %v4816_v17 = vcombine.high %v903_v0, %v907_v45  ;;  %v4822_v16 = vcombine.low %v903_v0, %v907_v45 }
  0xb8   :  { %v4814_v53 = vcombine.high %v902_v11, %v906_v1  ;;  %v4820_v20 = vcombine.low %v902_v11, %v906_v1 }
  0xb9   :  { %1641 = vmatpush1.bf16.msra.mxu1 %v4784_v2  ;;  %1682 = vmatpush1.bf16.msra.mxu0 %v4786_v7  ;;  %6587 = vst [vmem:[#allocation110_spill] sm:$0xff] %v4816_v17  ;;  %v895_v7 = vld [vmem:[#allocation6 + $0x398] sm:$0xff]  ;;  %6589 = vst [vmem:[#allocation112_spill] sm:$0xff] %v4822_v16 }
  0xba   :  { %1642 = vmatprep.subr.bf16.mxu1 %v4790_v63  ;;  %1683 = vmatprep.subr.bf16.mxu0 %v4792_v23  ;;  %6586 = vst [vmem:[#allocation109_spill] sm:$0xff] %v4814_v53  ;;  %v894_v23 = vld [vmem:[#allocation6 + $0x390] sm:$0xff]  ;;  %v899_v2 = vld [vmem:[#allocation6 + $0x3b8] sm:$0xff]  ;;  %6588 = vst [vmem:[#allocation111_spill] sm:$0xff] %v4820_v20 }
  0xbb   :  { %v898_v63 = vld [vmem:[#allocation6 + $0x3b0] sm:$0xff]  ;;  %v4828_v29 = vcombine.high %v895_v7, %v899_v2  ;;  %v4834_v45 = vcombine.low %v895_v7, %v899_v2 }
  0xbc   :  { %v4826_v19 = vcombine.high %v894_v23, %v898_v63  ;;  %v4832_v1 = vcombine.low %v894_v23, %v898_v63 }
  0xbd   :  { %1643 = vmatpush1.bf16.msra.mxu1 %v4796_v38  ;;  %1684 = vmatpush1.bf16.msra.mxu0 %v4798_v36  ;;  %6591 = vst [vmem:[#allocation114_spill] sm:$0xff] %v4828_v29  ;;  %v887_v36 = vld [vmem:[#allocation6 + $0x358] sm:$0xff]  ;;  %6593 = vst [vmem:[#allocation116_spill] sm:$0xff] %v4834_v45 }
  0xbe   :  { %1644 = vmatprep.subr.bf16.mxu1 %v4802_v37  ;;  %1685 = vmatprep.subr.bf16.mxu0 %v4804_v28  ;;  %6590 = vst [vmem:[#allocation113_spill] sm:$0xff] %v4826_v19  ;;  %v886_v28 = vld [vmem:[#allocation6 + $0x350] sm:$0xff]  ;;  %v891_v38 = vld [vmem:[#allocation6 + $0x378] sm:$0xff]  ;;  %6592 = vst [vmem:[#allocation115_spill] sm:$0xff] %v4832_v1 }
  0xbf   :  { %v890_v37 = vld [vmem:[#allocation6 + $0x370] sm:$0xff]  ;;  %v4840_v11 = vcombine.high %v887_v36, %v891_v38  ;;  %v4846_v2 = vcombine.low %v887_v36, %v891_v38 }
  0xc0   :  { %v4838_v0 = vcombine.high %v886_v28, %v890_v37  ;;  %v4844_v63 = vcombine.low %v886_v28, %v890_v37 }
  0xc1   :  { %1645 = vmatpush1.bf16.msra.mxu1 %v4808_v54  ;;  %1686 = vmatpush1.bf16.msra.mxu0 %v4810_v52  ;;  %6595 = vst [vmem:[#allocation118_spill] sm:$0xff] %v4840_v11  ;;  %v879_v52 = vld [vmem:[#allocation6 + $0x318] sm:$0xff]  ;;  %6597 = vst [vmem:[#allocation120_spill] sm:$0xff] %v4846_v2 }
  0xc2   :  { %1646 = vmatprep.subr.bf16.mxu1 %v4814_v53  ;;  %1687 = vmatprep.subr.bf16.mxu0 %v4816_v17  ;;  %6594 = vst [vmem:[#allocation117_spill] sm:$0xff] %v4838_v0  ;;  %v878_v17 = vld [vmem:[#allocation6 + $0x310] sm:$0xff]  ;;  %v883_v54 = vld [vmem:[#allocation6 + $0x338] sm:$0xff]  ;;  %6596 = vst [vmem:[#allocation119_spill] sm:$0xff] %v4844_v63 }
  0xc3   :  { %v882_v53 = vld [vmem:[#allocation6 + $0x330] sm:$0xff]  ;;  %v4852_v23 = vcombine.high %v879_v52, %v883_v54  ;;  %v4858_v38 = vcombine.low %v879_v52, %v883_v54 }
  0xc4   :  { %v4850_v7 = vcombine.high %v878_v17, %v882_v53  ;;  %v4856_v37 = vcombine.low %v878_v17, %v882_v53 }
  0xc5   :  { %1647 = vmatpush2.bf16.msra.mxu1 %v4820_v20  ;;  %1688 = vmatpush2.bf16.msra.mxu0 %v4822_v16  ;;  %6599 = vst [vmem:[#allocation122_spill] sm:$0xff] %v4852_v23  ;;  %v871_v16 = vld [vmem:[#allocation6 + $0x2d8] sm:$0xff]  ;;  %6601 = vst [vmem:[#allocation124_spill] sm:$0xff] %v4858_v38 }
  0xc6   :  { %1648 = vmatprep.subr.bf16.mxu1 %v4826_v19  ;;  %1689 = vmatprep.subr.bf16.mxu0 %v4828_v29  ;;  %6598 = vst [vmem:[#allocation121_spill] sm:$0xff] %v4850_v7  ;;  %v870_v29 = vld [vmem:[#allocation6 + $0x2d0] sm:$0xff]  ;;  %v875_v20 = vld [vmem:[#allocation6 + $0x2f8] sm:$0xff]  ;;  %6600 = vst [vmem:[#allocation123_spill] sm:$0xff] %v4856_v37 }
  0xc7   :  { %v874_v19 = vld [vmem:[#allocation6 + $0x2f0] sm:$0xff]  ;;  %v4864_v28 = vcombine.high %v871_v16, %v875_v20  ;;  %v4870_v54 = vcombine.low %v871_v16, %v875_v20 }
  0xc8   :  { %v4862_v36 = vcombine.high %v870_v29, %v874_v19  ;;  %v4868_v53 = vcombine.low %v870_v29, %v874_v19 }
  0xc9   :  { %1649 = vmatpush2.bf16.msra.mxu1 %v4832_v1  ;;  %1690 = vmatpush2.bf16.msra.mxu0 %v4834_v45  ;;  %6603 = vst [vmem:[#allocation126_spill] sm:$0xff] %v4864_v28  ;;  %v863_v45 = vld [vmem:[#allocation6 + $0x298] sm:$0xff]  ;;  %6605 = vst [vmem:[#allocation128_spill] sm:$0xff] %v4870_v54 }
  0xca   :  { %1650 = vmatprep.subr.bf16.mxu1 %v4838_v0  ;;  %1691 = vmatprep.subr.bf16.mxu0 %v4840_v11  ;;  %6602 = vst [vmem:[#allocation125_spill] sm:$0xff] %v4862_v36  ;;  %v862_v11 = vld [vmem:[#allocation6 + $0x290] sm:$0xff]  ;;  %v867_v1 = vld [vmem:[#allocation6 + $0x2b8] sm:$0xff]  ;;  %6604 = vst [vmem:[#allocation127_spill] sm:$0xff] %v4868_v53 }
  0xcb   :  { %v866_v0 = vld [vmem:[#allocation6 + $0x2b0] sm:$0xff]  ;;  %v4876_v17 = vcombine.high %v863_v45, %v867_v1  ;;  %v4882_v20 = vcombine.low %v863_v45, %v867_v1 }
  0xcc   :  { %v4874_v52 = vcombine.high %v862_v11, %v866_v0  ;;  %v4880_v19 = vcombine.low %v862_v11, %v866_v0 }
  0xcd   :  { %1651 = vmatpush2.bf16.msra.mxu1 %v4844_v63  ;;  %1692 = vmatpush2.bf16.msra.mxu0 %v4846_v2  ;;  %6607 = vst [vmem:[#allocation130_spill] sm:$0xff] %v4876_v17  ;;  %v855_v2 = vld [vmem:[#allocation6 + $0x258] sm:$0xff]  ;;  %6609 = vst [vmem:[#allocation132_spill] sm:$0xff] %v4882_v20 }
  0xce   :  { %1652 = vmatprep.subr.bf16.mxu1 %v4850_v7  ;;  %1693 = vmatprep.subr.bf16.mxu0 %v4852_v23  ;;  %6606 = vst [vmem:[#allocation129_spill] sm:$0xff] %v4874_v52  ;;  %v854_v23 = vld [vmem:[#allocation6 + $0x250] sm:$0xff]  ;;  %v859_v63 = vld [vmem:[#allocation6 + $0x278] sm:$0xff]  ;;  %6608 = vst [vmem:[#allocation131_spill] sm:$0xff] %v4880_v19 }
  0xcf   :  { %v858_v7 = vld [vmem:[#allocation6 + $0x270] sm:$0xff]  ;;  %v4888_v29 = vcombine.high %v855_v2, %v859_v63  ;;  %v4894_v1 = vcombine.low %v855_v2, %v859_v63  ;;  %v108_v63 = vlaneseq }
  0xd0   :  { %v4886_v16 = vcombine.high %v854_v23, %v858_v7  ;;  %v4892_v0 = vcombine.low %v854_v23, %v858_v7  ;;  %v104_v7 = vld [vmem:[#allocation3 + $0x100] ss:$8 sm:$0xf] }
  0xd1   :  { %1653 = vmatpush2.bf16.msra.mxu1 %v4856_v37  ;;  %1694 = vmatpush2.bf16.msra.mxu0 %v4858_v38  ;;  %6611 = vst [vmem:[#allocation134_spill] sm:$0xff] %v4888_v29  ;;  %v847_v38 = vld [vmem:[#allocation6 + $0x218] sm:$0xff]  ;;  %6613 = vst [vmem:[#allocation136_spill] sm:$0xff] %v4894_v1  ;;  %v4920_v2 = vshrl.u32 %v108_v63, 7 }
  0xd2   :  { %1654 = vmatprep.subr.bf16.mxu1 %v4862_v36  ;;  %1695 = vmatprep.subr.bf16.mxu0 %v4864_v28  ;;  %6610 = vst [vmem:[#allocation133_spill] sm:$0xff] %v4886_v16  ;;  %v846_v28 = vld [vmem:[#allocation6 + $0x210] sm:$0xff]  ;;  %v851_v37 = vld [vmem:[#allocation6 + $0x238] sm:$0xff]  ;;  %6612 = vst [vmem:[#allocation135_spill] sm:$0xff] %v4892_v0 }
  0xd3   :  { %v850_v36 = vld [vmem:[#allocation6 + $0x230] sm:$0xff]  ;;  %v4900_v11 = vcombine.high %v847_v38, %v851_v37 }
  0xd4   :  { %v4898_v45 = vcombine.high %v846_v28, %v850_v36  ;;  %v105_v23 = vld [vmem:[#allocation3 + $0x100] ss:$8 sm:$0xf0] }
  0xd5   :  { %1655 = vmatpush2.bf16.msra.mxu1 %v4868_v53  ;;  %1696 = vmatpush2.bf16.msra.mxu0 %v4870_v54  ;;  %6615 = vst [vmem:[#allocation138_spill] sm:$0xff] %v4900_v11 }
  0xd6   :  { %1656 = vmatprep.subr.bf16.mxu1 %v4874_v52  ;;  %1697 = vmatprep.subr.bf16.mxu0 %v4876_v17  ;;  %6614 = vst [vmem:[#allocation137_spill] sm:$0xff] %v4898_v45  ;;  %v4904_v17 = vcombine.low %v846_v28, %v850_v36 }
  0xd8   :  { %6616 = vst [vmem:[#allocation139_spill] sm:$0xff] %v4904_v17 }
  0xd9   :  { %1657 = vmatpush2.bf16.msra.mxu1 %v4880_v19  ;;  %1698 = vmatpush2.bf16.msra.mxu0 %v4882_v20  ;;  %v4906_v19 = vcombine.low %v847_v38, %v851_v37  ;;  %v110_v37 = vsub.s32 0, %v4920_v2  ;;  %v114_v38 = vsub.s32 1, %v4920_v2 }
  0xda   :  { %1658 = vmatprep.subr.bf16.mxu1 %v4886_v16  ;;  %1699 = vmatprep.subr.bf16.mxu0 %v4888_v29 }
  0xdb   :  { %6617 = vst [vmem:[#allocation140_spill] sm:$0xff] %v4906_v19 }
  0xdd   :  { %1659 = vmatpush2.bf16.msra.mxu1 %v4892_v0  ;;  %1700 = vmatpush2.bf16.msra.mxu0 %v4894_v1 }
  0xde   :  { %1660 = vmatprep.subr.bf16.mxu1 %v4898_v45  ;;  %1701 = vmatprep.subr.bf16.mxu0 %v4900_v11 }
  0xe1   :  { %1661 = vmatpush2.bf16.msra.mxu1 %v4904_v17  ;;  %1702 = vmatpush2.bf16.msra.mxu0 %v4906_v19 }
  0xe2   :  { %1778 = vmatprep.subr.bf16.mxu1 %v4470_v50  ;;  %1819 = vmatprep.subr.bf16.mxu0 %v4472_v51 }
  0xe4   :  { %1663 = vmatmul.mubr.bf16.vlgmr.msra.gmra.mxu1 %v6559_v44  ;;  %1704 = vmatmul.mubr.bf16.vlgmr.msra.gmra.mxu0 %v6559_v44  ;;  %v4926_v44 = vor.u32 %v105_v23, %v104_v7 }
  0xe5   :  { %1779 = vmatpush1.bf16.msra.mxu1 %v4504_v57  ;;  %1820 = vmatpush1.bf16.msra.mxu0 %v4506_v58 }
  0xe6   :  { %1780 = vmatprep.subr.bf16.mxu1 %v4508_v59  ;;  %1821 = vmatprep.subr.bf16.mxu0 %v4510_v60  ;;  %v4935_v36 = vrot.slane %v4926_v44, %v110_v37  ;;  %v4942_v28 = vrot.slane %v4926_v44, %v114_v38 }
  0xe9   :  { %1781 = vmatpush1.bf16.msra.mxu1 %v4517_v3  ;;  %1822 = vmatpush1.bf16.msra.mxu0 %v4519_v4 }
  0xea   :  { %1782 = vmatprep.subr.bf16.mxu1 %v4523_v5  ;;  %1823 = vmatprep.subr.bf16.mxu0 %v4525_v6 }
  0xed   :  { %1783 = vmatpush1.bf16.msra.mxu1 %v4533_v12  ;;  %1824 = vmatpush1.bf16.msra.mxu0 %v4535_v13 }
  0xee   :  { %1784 = vmatprep.subr.bf16.mxu1 %v4539_v14  ;;  %1825 = vmatprep.subr.bf16.mxu0 %v4541_v15 }
  0xf1   :  { %1785 = vmatpush1.bf16.msra.mxu1 %v4548_v21  ;;  %1826 = vmatpush1.bf16.msra.mxu0 %v4550_v24 }
  0xf2   :  { %1786 = vmatprep.subr.bf16.mxu1 %v4554_v25  ;;  %1827 = vmatprep.subr.bf16.mxu0 %v4556_v26 }
  0xf4   :  { %v4944_v63 = vpop.f32.mrf.mxu0  ;;  %v263_v7 = vpop.f32.mrf.mxu1 }
  0xf5   :  { %v4947_v23 = vadd.f32 %v263_v7, %v4935_v36  ;;  %1787 = vmatpush1.bf16.msra.mxu1 %v4563_v32  ;;  %1828 = vmatpush1.bf16.msra.mxu0 %v4565_v33 }
  0xf6   :  { %v4951_v37 = vpop.f32.mrf.mxu0  ;;  %v265_v24 = vpop.f32.mrf.mxu1  ;;  %1788 = vmatprep.subr.bf16.mxu1 %v4569_v34  ;;  %1829 = vmatprep.subr.bf16.mxu0 %v4571_v35 }
  0xf7   :  { %6618 = vst [vmem:[#allocation141_spill] sm:$0xff] %v4947_v23  ;;  %v4956_v38 = vadd.f32 %v265_v24, %v4942_v28 }
  0xf8   :  { %v245_v26 = vpop.f32.mrf.mxu0  ;;  %v269_v25 = vpop.f32.mrf.mxu1 }
  0xf9   :  { %6619 = vst [vmem:[#allocation142_spill] sm:$0xff] %v4956_v38  ;;  %v4959_v21 = vadd.f32 %v245_v26, %v4935_v36  ;;  %v4962_v7 = vadd.f32 %v269_v25, %v4935_v36  ;;  %1789 = vmatpush1.bf16.msra.mxu1 %v4578_v39  ;;  %1830 = vmatpush1.bf16.msra.mxu0 %v4580_v40 }
  0xfa   :  { %v247_v23 = vpop.f32.mrf.mxu0  ;;  %v271_v33 = vpop.f32.mrf.mxu1  ;;  %1790 = vmatprep.subr.bf16.mxu1 %v4584_v41  ;;  %1831 = vmatprep.subr.bf16.mxu0 %v4586_v42 }
  0xfb   :  { %6620 = vst [vmem:[#allocation143_spill] sm:$0xff] %v4959_v21  ;;  %6621 = vst [vmem:[#allocation144_spill] sm:$0xff] %v4962_v7  ;;  %v4969_v24 = vadd.f32 %v247_v23, %v4942_v28  ;;  %v4972_v38 = vadd.f32 %v271_v33, %v4942_v28 }
  0xfc   :  { %v251_v26 = vpop.f32.mrf.mxu0  ;;  %v275_v21 = vpop.f32.mrf.mxu1 }
  0xfd   :  { %6622 = vst [vmem:[#allocation145_spill] sm:$0xff] %v4969_v24  ;;  %6623 = vst [vmem:[#allocation146_spill] sm:$0xff] %v4972_v38  ;;  %v4975_v25 = vadd.f32 %v251_v26, %v4935_v36  ;;  %v4978_v7 = vadd.f32 %v275_v21, %v4935_v36  ;;  %1791 = vmatpush1.bf16.msra.mxu1 %v4593_v46  ;;  %1832 = vmatpush1.bf16.msra.mxu0 %v4595_v47 }
  0xfe   :  { %v253_v41 = vpop.f32.mrf.mxu0  ;;  %v277_v42 = vpop.f32.mrf.mxu1  ;;  %1792 = vmatprep.subr.bf16.mxu1 %v4599_v48  ;;  %1833 = vmatprep.subr.bf16.mxu0 %v4601_v49 }
  0xff   :  { %6624 = vst [vmem:[#allocation147_spill] sm:$0xff] %v4975_v25  ;;  %6625 = vst [vmem:[#allocation148_spill] sm:$0xff] %v4978_v7  ;;  %v4985_v33 = vadd.f32 %v253_v41, %v4942_v28  ;;  %v4988_v23 = vadd.f32 %v277_v42, %v4942_v28 }
 0x100   :  { %v257_v26 = vpop.f32.mrf.mxu0  ;;  %v281_v38 = vpop.f32.mrf.mxu1 }
 0x101   :  { %6626 = vst [vmem:[#allocation149_spill] sm:$0xff] %v4985_v33  ;;  %6627 = vst [vmem:[#allocation150_spill] sm:$0xff] %v4988_v23  ;;  %v4991_v21 = vadd.f32 %v257_v26, %v4935_v36  ;;  %v4994_v7 = vadd.f32 %v281_v38, %v4935_v36  ;;  %1793 = vmatpush1.bf16.msra.mxu1 %v4608_v55  ;;  %1834 = vmatpush1.bf16.msra.mxu0 %v4610_v56  ;;  %v118_v26 = vsub.s32 2, %v4920_v2 }
 0x102   :  { %v259_v25 = vpop.f32.mrf.mxu0  ;;  %v283_v24 = vpop.f32.mrf.mxu1  ;;  %1794 = vmatprep.subr.bf16.mxu1 %v4614_v61  ;;  %1835 = vmatprep.subr.bf16.mxu0 %v4616_v62  ;;  %v126_v38 = vsub.s32 4, %v4920_v2  ;;  %v130_v33 = vsub.s32 5, %v4920_v2 }
 0x103   :  { %6628 = vst [vmem:[#allocation151_spill] sm:$0xff] %v4991_v21  ;;  %6629 = vst [vmem:[#allocation152_spill] sm:$0xff] %v4994_v7  ;;  %v5001_v41 = vadd.f32 %v259_v25, %v4942_v28  ;;  %v5004_v42 = vadd.f32 %v283_v24, %v4942_v28  ;;  %v122_v21 = vsub.s32 3, %v4920_v2 }
 0x104   :  { %v5008_v7 = vpop.f32.mrf.mxu1  ;;  %v5010_v23 = vpop.f32.mrf.mxu0 }
 0x105   :  { %6630 = vst [vmem:[#allocation153_spill] sm:$0xff] %v5001_v41  ;;  %6631 = vst [vmem:[#allocation154_spill] sm:$0xff] %v5004_v42  ;;  %1795 = vmatpush2.bf16.msra.mxu1 %v4623_v8  ;;  %1836 = vmatpush2.bf16.msra.mxu0 %v4625_v9  ;;  %v5023_v42 = vrot.slane %v4926_v44, %v118_v26  ;;  %v5026_v41 = vrot.slane %v4926_v44, %v126_v38 }
 0x106   :  { %v5016_v25 = vpop.f32.mrf.mxu1  ;;  %v5018_v24 = vpop.f32.mrf.mxu0  ;;  %1796 = vmatprep.subr.bf16.mxu1 %v4629_v10  ;;  %1837 = vmatprep.subr.bf16.mxu0 %v4631_v18  ;;  %v5029_v62 = vrot.slane %v4926_v44, %v122_v21  ;;  %v5032_v9 = vrot.slane %v4926_v44, %v130_v33 }
 0x108   :  { %v358_v8 = vpop.f32.mrf.mxu1  ;;  %v471_v61 = vpop.f32.mrf.mxu0 }
 0x109   :  { %v5035_v56 = vadd.f32 %v358_v8, %v5023_v42  ;;  %v5038_v10 = vadd.f32 %v471_v61, %v5026_v41  ;;  %1797 = vmatpush2.bf16.msra.mxu1 %v4636_v27  ;;  %1838 = vmatpush2.bf16.msra.mxu0 %v4638_v30  ;;  %v6638_v30 = vld [vmem:[#allocation56_spill] sm:$0xff]  ;;  %v6639_v27 = vld [vmem:[#allocation57_spill] sm:$0xff] }
 0x10a   :  { %v360_v26 = vpop.f32.mrf.mxu1  ;;  %v473_v38 = vpop.f32.mrf.mxu0  ;;  %1798 = vmatprep.subr.bf16.mxu1 %v4642_v31  ;;  %1839 = vmatprep.subr.bf16.mxu0 %v4644_v22 }
 0x10b   :  { %6632 = vst [vmem:[#allocation155_spill] sm:$0xff] %v5035_v56  ;;  %6633 = vst [vmem:[#allocation156_spill] sm:$0xff] %v5038_v10  ;;  %v5045_v21 = vadd.f32 %v360_v26, %v5029_v62  ;;  %v5048_v33 = vadd.f32 %v473_v38, %v5032_v9  ;;  %v6640_v26 = vld [vmem:[#allocation58_spill] sm:$0xff] }
 0x10c   :  { %v364_v8 = vpop.f32.mrf.mxu1  ;;  %v477_v56 = vpop.f32.mrf.mxu0 }
 0x10d   :  { %6634 = vst [vmem:[#allocation157_spill] sm:$0xff] %v5045_v21  ;;  %6635 = vst [vmem:[#allocation158_spill] sm:$0xff] %v5048_v33  ;;  %v5051_v61 = vadd.f32 %v364_v8, %v5023_v42  ;;  %v5054_v10 = vadd.f32 %v477_v56, %v5026_v41  ;;  %1799 = vmatpush2.bf16.msra.mxu1 %v4648_v43  ;;  %1840 = vmatpush2.bf16.msra.mxu0 %v6638_v30  ;;  %v6645_v21 = vld [vmem:[#allocation59_spill] sm:$0xff]  ;;  %v6646_v30 = vld [vmem:[#allocation60_spill] sm:$0xff] }
 0x10e   :  { %v366_v31 = vpop.f32.mrf.mxu1  ;;  %v479_v22 = vpop.f32.mrf.mxu0  ;;  %1800 = vmatprep.subr.bf16.mxu1 %v6639_v27  ;;  %1841 = vmatprep.subr.bf16.mxu0 %v6640_v26  ;;  %v6647_v43 = vld [vmem:[#allocation61_spill] sm:$0xff] }
 0x10f   :  { %6636 = vst [vmem:[#allocation159_spill] sm:$0xff] %v5051_v61  ;;  %6637 = vst [vmem:[#allocation160_spill] sm:$0xff] %v5054_v10  ;;  %v5061_v38 = vadd.f32 %v366_v31, %v5029_v62  ;;  %v5064_v33 = vadd.f32 %v479_v22, %v5032_v9  ;;  %v6648_v31 = vld [vmem:[#allocation62_spill] sm:$0xff] }
 0x110   :  { %v370_v8 = vpop.f32.mrf.mxu1  ;;  %v483_v61 = vpop.f32.mrf.mxu0 }
 0x111   :  { %6641 = vst [vmem:[#allocation161_spill] sm:$0xff] %v5061_v38  ;;  %6642 = vst [vmem:[#allocation162_spill] sm:$0xff] %v5064_v33  ;;  %v5067_v56 = vadd.f32 %v370_v8, %v5023_v42  ;;  %v5070_v10 = vadd.f32 %v483_v61, %v5026_v41  ;;  %1801 = vmatpush2.bf16.msra.mxu1 %v6645_v21  ;;  %1842 = vmatpush2.bf16.msra.mxu0 %v6646_v30  ;;  %v6653_v38 = vld [vmem:[#allocation63_spill] sm:$0xff]  ;;  %v6654_v30 = vld [vmem:[#allocation64_spill] sm:$0xff] }
 0x112   :  { %v372_v27 = vpop.f32.mrf.mxu1  ;;  %v485_v26 = vpop.f32.mrf.mxu0  ;;  %1802 = vmatprep.subr.bf16.mxu1 %v6647_v43  ;;  %1843 = vmatprep.subr.bf16.mxu0 %v6648_v31  ;;  %v6655_v21 = vld [vmem:[#allocation65_spill] sm:$0xff] }
 0x113   :  { %6643 = vst [vmem:[#allocation163_spill] sm:$0xff] %v5067_v56  ;;  %6644 = vst [vmem:[#allocation164_spill] sm:$0xff] %v5070_v10  ;;  %v5077_v22 = vadd.f32 %v372_v27, %v5029_v62  ;;  %v5080_v33 = vadd.f32 %v485_v26, %v5032_v9  ;;  %v6656_v27 = vld [vmem:[#allocation66_spill] sm:$0xff] }
 0x114   :  { %v376_v8 = vpop.f32.mrf.mxu1  ;;  %v489_v56 = vpop.f32.mrf.mxu0 }
 0x115   :  { %6649 = vst [vmem:[#allocation165_spill] sm:$0xff] %v5077_v22  ;;  %6650 = vst [vmem:[#allocation166_spill] sm:$0xff] %v5080_v33  ;;  %v5083_v61 = vadd.f32 %v376_v8, %v5023_v42  ;;  %v5086_v10 = vadd.f32 %v489_v56, %v5026_v41  ;;  %1803 = vmatpush2.bf16.msra.mxu1 %v6653_v38  ;;  %1844 = vmatpush2.bf16.msra.mxu0 %v6654_v30  ;;  %v6661_v22 = vld [vmem:[#allocation67_spill] sm:$0xff]  ;;  %v6662_v30 = vld [vmem:[#allocation68_spill] sm:$0xff] }
 0x116   :  { %v378_v43 = vpop.f32.mrf.mxu1  ;;  %v491_v31 = vpop.f32.mrf.mxu0  ;;  %1804 = vmatprep.subr.bf16.mxu1 %v6655_v21  ;;  %1845 = vmatprep.subr.bf16.mxu0 %v6656_v27  ;;  %v6663_v38 = vld [vmem:[#allocation69_spill] sm:$0xff] }
 0x117   :  { %6651 = vst [vmem:[#allocation167_spill] sm:$0xff] %v5083_v61  ;;  %6652 = vst [vmem:[#allocation168_spill] sm:$0xff] %v5086_v10  ;;  %v5093_v26 = vadd.f32 %v378_v43, %v5029_v62  ;;  %v5096_v33 = vadd.f32 %v491_v31, %v5032_v9  ;;  %v6664_v43 = vld [vmem:[#allocation70_spill] sm:$0xff] }
 0x118   :  { %v382_v8 = vpop.f32.mrf.mxu1  ;;  %v495_v61 = vpop.f32.mrf.mxu0 }
 0x119   :  { %6657 = vst [vmem:[#allocation169_spill] sm:$0xff] %v5093_v26  ;;  %6658 = vst [vmem:[#allocation170_spill] sm:$0xff] %v5096_v33  ;;  %v5099_v56 = vadd.f32 %v382_v8, %v5023_v42  ;;  %v5102_v10 = vadd.f32 %v495_v61, %v5026_v41  ;;  %1805 = vmatpush2.bf16.msra.mxu1 %v6661_v22  ;;  %1846 = vmatpush2.bf16.msra.mxu0 %v6662_v30  ;;  %v6669_v26 = vld [vmem:[#allocation71_spill] sm:$0xff]  ;;  %v6670_v30 = vld [vmem:[#allocation72_spill] sm:$0xff] }
 0x11a   :  { %v384_v21 = vpop.f32.mrf.mxu1  ;;  %v497_v27 = vpop.f32.mrf.mxu0  ;;  %1806 = vmatprep.subr.bf16.mxu1 %v6663_v38  ;;  %1847 = vmatprep.subr.bf16.mxu0 %v6664_v43  ;;  %v6671_v22 = vld [vmem:[#allocation73_spill] sm:$0xff] }
 0x11b   :  { %6659 = vst [vmem:[#allocation171_spill] sm:$0xff] %v5099_v56  ;;  %6660 = vst [vmem:[#allocation172_spill] sm:$0xff] %v5102_v10  ;;  %v5109_v31 = vadd.f32 %v384_v21, %v5029_v62  ;;  %v5112_v33 = vadd.f32 %v497_v27, %v5032_v9  ;;  %v6672_v21 = vld [vmem:[#allocation74_spill] sm:$0xff] }
 0x11c   :  { %v388_v8 = vpop.f32.mrf.mxu1  ;;  %v501_v56 = vpop.f32.mrf.mxu0 }
 0x11d   :  { %6665 = vst [vmem:[#allocation173_spill] sm:$0xff] %v5109_v31  ;;  %6666 = vst [vmem:[#allocation174_spill] sm:$0xff] %v5112_v33  ;;  %v5115_v61 = vadd.f32 %v388_v8, %v5023_v42  ;;  %v5118_v10 = vadd.f32 %v501_v56, %v5026_v41  ;;  %1807 = vmatpush2.bf16.msra.mxu1 %v6669_v26  ;;  %1848 = vmatpush2.bf16.msra.mxu0 %v6670_v30  ;;  %v6677_v31 = vld [vmem:[#allocation75_spill] sm:$0xff]  ;;  %v6678_v30 = vld [vmem:[#allocation76_spill] sm:$0xff] }
 0x11e   :  { %v390_v38 = vpop.f32.mrf.mxu1  ;;  %v503_v43 = vpop.f32.mrf.mxu0  ;;  %1808 = vmatprep.subr.bf16.mxu1 %v6671_v22  ;;  %1849 = vmatprep.subr.bf16.mxu0 %v6672_v21  ;;  %v6679_v26 = vld [vmem:[#allocation77_spill] sm:$0xff] }
 0x11f   :  { %6667 = vst [vmem:[#allocation175_spill] sm:$0xff] %v5115_v61  ;;  %6668 = vst [vmem:[#allocation176_spill] sm:$0xff] %v5118_v10  ;;  %v5125_v27 = vadd.f32 %v390_v38, %v5029_v62  ;;  %v5128_v33 = vadd.f32 %v503_v43, %v5032_v9  ;;  %v6680_v38 = vld [vmem:[#allocation78_spill] sm:$0xff] }
 0x120   :  { %v394_v8 = vpop.f32.mrf.mxu1  ;;  %v507_v61 = vpop.f32.mrf.mxu0 }
 0x121   :  { %6673 = vst [vmem:[#allocation177_spill] sm:$0xff] %v5125_v27  ;;  %6674 = vst [vmem:[#allocation178_spill] sm:$0xff] %v5128_v33  ;;  %v5131_v56 = vadd.f32 %v394_v8, %v5023_v42  ;;  %v5134_v10 = vadd.f32 %v507_v61, %v5026_v41  ;;  %1809 = vmatpush2.bf16.msra.mxu1 %v6677_v31  ;;  %1850 = vmatpush2.bf16.msra.mxu0 %v6678_v30  ;;  %v134_v8 = vsub.s32 6, %v4920_v2 }
 0x122   :  { %v396_v22 = vpop.f32.mrf.mxu1  ;;  %v509_v21 = vpop.f32.mrf.mxu0  ;;  %1860 = vmatprep.subr.bf16.mxu1 %v6679_v26  ;;  %1901 = vmatprep.subr.bf16.mxu0 %v6680_v38 }
 0x123   :  { %6675 = vst [vmem:[#allocation179_spill] sm:$0xff] %v5131_v56  ;;  %6676 = vst [vmem:[#allocation180_spill] sm:$0xff] %v5134_v10  ;;  %v5141_v43 = vadd.f32 %v396_v22, %v5029_v62  ;;  %v5144_v33 = vadd.f32 %v509_v21, %v5032_v9  ;;  %v138_v56 = vsub.s32 7, %v4920_v2  ;;  %v135_v26 = vrot.slane %v4926_v44, %v134_v8 }
 0x124   :  { %v5147_v61 = vpop.f32.mrf.mxu1  ;;  %v5149_v10 = vpop.f32.mrf.mxu0 }
 0x125   :  { %6681 = vst [vmem:[#allocation181_spill] sm:$0xff] %v5141_v43  ;;  %6682 = vst [vmem:[#allocation182_spill] sm:$0xff] %v5144_v33  ;;  %v5156_v22 = vrot.slane %v4926_v44, %v138_v56 }
 0x126   :  { %6683 = vst [vmem:[#allocation183_spill] sm:$0xff] %v5149_v10  ;;  %v5152_v27 = vpop.f32.mrf.mxu1  ;;  %v3917_v30 = vpop.f32.mrf.mxu0 }
 0x128   :  { %v584_v38 = vpop.f32.mrf.mxu1 }
 0x129   :  { %v5158_v43 = vadd.f32 %v584_v38, %v135_v26 }
 0x12a   :  { %v586_v21 = vpop.f32.mrf.mxu1 }
 0x12b   :  { %6684 = vst [vmem:[#allocation184_spill] sm:$0xff] %v5158_v43  ;;  %v5161_v33 = vadd.f32 %v586_v21, %v5156_v22 }
 0x12c   :  { %v590_v31 = vpop.f32.mrf.mxu1 }
 0x12d   :  { %6685 = vst [vmem:[#allocation185_spill] sm:$0xff] %v5161_v33  ;;  %v5163_v18 = vadd.f32 %v590_v31, %v135_v26 }
 0x12e   :  { %v592_v10 = vpop.f32.mrf.mxu1 }
 0x12f   :  { %6686 = vst [vmem:[#allocation186_spill] sm:$0xff] %v5163_v18  ;;  %v5166_v2 = vadd.f32 %v592_v10, %v5156_v22 }
 0x130   :  { %v596_v30 = vpop.f32.mrf.mxu1 }
 0x131   :  { %6687 = vst [vmem:[#allocation187_spill] sm:$0xff] %v5166_v2  ;;  %v5168_v55 = vadd.f32 %v596_v30, %v135_v26 }
 0x132   :  { %v598_v8 = vpop.f32.mrf.mxu1 }
 0x133   :  { %6688 = vst [vmem:[#allocation188_spill] sm:$0xff] %v5168_v55  ;;  %v5171_v44 = vadd.f32 %v598_v8, %v5156_v22 }
 0x134   :  { %v602_v56 = vpop.f32.mrf.mxu1 }
 0x135   :  { %6689 = vst [vmem:[#allocation189_spill] sm:$0xff] %v5171_v44  ;;  %v5173_v38 = vadd.f32 %v602_v56, %v135_v26 }
 0x136   :  { %v604_v43 = vpop.f32.mrf.mxu1 }
 0x137   :  { %6690 = vst [vmem:[#allocation190_spill] sm:$0xff] %v5173_v38  ;;  %v5176_v21 = vadd.f32 %v604_v43, %v5156_v22 }
 0x138   :  { %v608_v31 = vpop.f32.mrf.mxu1 }
 0x139   :  { %6691 = vst [vmem:[#allocation191_spill] sm:$0xff] %v5176_v21  ;;  %v5178_v18 = vadd.f32 %v608_v31, %v135_v26 }
 0x13a   :  { %v610_v33 = vpop.f32.mrf.mxu1 }
 0x13b   :  { %6692 = vst [vmem:[#allocation192_spill] sm:$0xff] %v5178_v18  ;;  %v5181_v10 = vadd.f32 %v610_v33, %v5156_v22 }
 0x13c   :  { %v614_v30 = vpop.f32.mrf.mxu1 }
 0x13d   :  { %6693 = vst [vmem:[#allocation193_spill] sm:$0xff] %v5181_v10  ;;  %v5183_v55 = vadd.f32 %v614_v30, %v135_v26 }
 0x13e   :  { %v616_v2 = vpop.f32.mrf.mxu1 }
 0x13f   :  { %6694 = vst [vmem:[#allocation194_spill] sm:$0xff] %v5183_v55  ;;  %v5186_v8 = vadd.f32 %v616_v2, %v5156_v22  ;;  %v240_v55 = vadd.f32 %v4944_v63, %v4935_v36  ;;  %v353_v2 = vadd.f32 %v5008_v7, %v5023_v42 }
 0x140   :  { %v620_v56 = vpop.f32.mrf.mxu1 }
 0x141   :  { %6695 = vst [vmem:[#allocation195_spill] sm:$0xff] %v5186_v8  ;;  %v5188_v38 = vadd.f32 %v620_v56, %v135_v26  ;;  %v242_v56 = vadd.f32 %v4951_v37, %v4942_v28  ;;  %v579_v37 = vadd.f32 %v5147_v61, %v135_v26 }
 0x142   :  { %v622_v44 = vpop.f32.mrf.mxu1 }
 0x143   :  { %6696 = vst [vmem:[#allocation196_spill] sm:$0xff] %v5188_v38  ;;  %v5191_v43 = vadd.f32 %v622_v44, %v5156_v22 }
 0x145   :  { %6697 = vst [vmem:[#allocation197_spill] sm:$0xff] %v5191_v43  ;;  %v355_v43 = vadd.f32 %v5016_v25, %v5029_v62  ;;  %v466_v62 = vadd.f32 %v5010_v23, %v5026_v41 }
 0x164   :  { %v1582_v31 = vpop.f32.mrf.mxu1  ;;  %v1623_v18 = vpop.f32.mrf.mxu0 }
 0x165   :  { %v1712_v38 = vadd.f32 %v1582_v31, %v240_v55  ;;  %v1714_v44 = vadd.f32 %v1623_v18, %v353_v2 }
 0x166   :  { %v1584_v21 = vpop.f32.mrf.mxu1  ;;  %v1625_v49 = vpop.f32.mrf.mxu0 }
 0x167   :  { %v1713_v8 = vadd.f32 %v1584_v21, %v242_v56  ;;  %v3797_v47 = vmul.f32 -1.442695, %v1712_v38  ;;  %v581_v21 = vadd.f32 %v5152_v27, %v5156_v22 }
 0x168   :  { %v1586_v33 = vpop.f32.mrf.mxu1  ;;  %v1627_v10 = vpop.f32.mrf.mxu0 }
 0x169   :  { %v1715_v33 = vadd.f32 %v1625_v49, %v355_v43  ;;  %v3799_v10 = vmul.f32 -1.442695, %v1714_v44  ;;  %3976 = vpow2.f32 %v3797_v47  ;;  %v468_v49 = vadd.f32 %v5018_v24, %v5032_v9 }
 0x16a   :  { %v1587_v48 = vpop.f32.mrf.mxu1  ;;  %v1628_v30 = vpop.f32.mrf.mxu0 }
 0x16b   :  { %v3798_v48 = vmul.f32 -1.442695, %v1713_v8  ;;  %v3800_v30 = vmul.f32 -1.442695, %v1715_v33  ;;  %3978 = vpow2.f32 %v3799_v10 }
 0x16d   :  { %3980 = vpow2.f32 %v3798_v48 }
 0x16e   :  { %3982 = vpow2.f32 %v3800_v30 }
 0x176   :  { %v3977_v36 = vpop.eup %3976 }
 0x177   :  { %v1726_v42 = vadd.f32 1.0, %v3977_v36 }
 0x178   :  { %v3979_v63 = vpop.eup %3978 }
 0x179   :  { %v1738_v55 = vadd.f32 1.0, %v3979_v63  ;;  %3984 = vrcp.f32 %v1726_v42 }
 0x17a   :  { %v3981_v7 = vpop.eup %3980 }
 0x17b   :  { %v3983_v28 = vpop.eup %3982  ;;  %v1727_v18 = vadd.f32 1.0, %v3981_v7  ;;  %3986 = vrcp.f32 %v1738_v55 }
 0x17c   :  { %v1739_v47 = vadd.f32 1.0, %v3983_v28 }
 0x17d   :  { %3988 = vrcp.f32 %v1727_v18 }
 0x186   :  { %v3985_v27 = vpop.eup %3984 }
 0x188   :  { %v3987_v22 = vpop.eup %3986 }
 0x189   :  { %v1758_v30 = vmul.f32 0.0, %v3987_v22  ;;  %v6707_v22 = vld [vmem:[#allocation88_spill] sm:$0xff] }
 0x18a   :  { %v3989_v33 = vpop.eup %3988 }
 0x1a4   :  { %v1664_v25 = vpop.f32.mrf.mxu1  ;;  %v1705_v38 = vpop.f32.mrf.mxu0 }
 0x1a5   :  { %v1716_v8 = vadd.f32 %v1664_v25, %v466_v62  ;;  %v1718_v43 = vadd.f32 %v1705_v38, %v579_v37 }
 0x1a6   :  { %v1666_v31 = vpop.f32.mrf.mxu1  ;;  %v1707_v2 = vpop.f32.mrf.mxu0 }
 0x1a7   :  { %3990 = vtanh.f32 %v1716_v8  ;;  %v3801_v23 = vmul.f32 -1.442695, %v1718_v43  ;;  %v1717_v41 = vadd.f32 %v1666_v31, %v468_v49  ;;  %v1719_v26 = vadd.f32 %v1707_v2, %v581_v21 }
 0x1a8   :  { %3992 = vrcp.f32 %v1739_v47  ;;  %v1668_v61 = vpop.f32.mrf.mxu1  ;;  %v1709_v9 = vpop.f32.mrf.mxu0 }
 0x1a9   :  { %3994 = vpow2.f32 %v3801_v23  ;;  %v3802_v24 = vmul.f32 -1.442695, %v1719_v26  ;;  %v6698_v23 = vld [vmem:[#allocation79_spill] sm:$0xff]  ;;  %v6700_v26 = vld [vmem:[#allocation81_spill] sm:$0xff]  ;;  %v6701_v61 = vld [vmem:[#allocation82_spill] sm:$0xff] }
 0x1aa   :  { %3996 = vtanh.f32 %v1717_v41  ;;  %v1669_v56 = vpop.f32.mrf.mxu1  ;;  %v1710_v44 = vpop.f32.mrf.mxu0  ;;  %v6699_v41 = vld [vmem:[#allocation80_spill] sm:$0xff]  ;;  %v6702_v9 = vld [vmem:[#allocation83_spill] sm:$0xff] }
 0x1ab   :  { %3998 = vpow2.f32 %v3802_v24  ;;  %v6703_v24 = vld [vmem:[#allocation84_spill] sm:$0xff]  ;;  %v6704_v56 = vld [vmem:[#allocation85_spill] sm:$0xff]  ;;  %v6705_v44 = vld [vmem:[#allocation86_spill] sm:$0xff] }
 0x1b4   :  { %v3991_v10 = vpop.eup %3990 }
 0x1b5   :  { %v3993_v48 = vpop.eup %3992  ;;  %v1760_v36 = vmul.f32 %v3991_v10, %v3985_v27  ;;  %v6706_v27 = vld [vmem:[#allocation87_spill] sm:$0xff]  ;;  %v6709_v10 = vld [vmem:[#allocation90_spill] sm:$0xff] }
 0x1b6   :  { %v3995_v63 = vpop.eup %3994  ;;  %v1759_v18 = vmul.f32 0.0, %v3993_v48  ;;  %v6710_v48 = vld [vmem:[#allocation91_spill] sm:$0xff] }
 0x1b7   :  { %v3997_v7 = vpop.eup %3996  ;;  %v5208_v42 = vadd.f32 %v1760_v36, %v1758_v30  ;;  %v1752_v28 = vadd.f32 1.0, %v3995_v63  ;;  %v6711_v30 = vld [vmem:[#allocation92_spill] sm:$0xff]  ;;  %v6712_v36 = vld [vmem:[#allocation93_spill] sm:$0xff]  ;;  %v6713_v63 = vld [vmem:[#allocation94_spill] sm:$0xff] }
 0x1b8   :  { %v3999_v55 = vpop.eup %3998  ;;  %v1761_v62 = vmul.f32 %v3997_v7, %v3989_v33  ;;  %v6708_v33 = vld [vmem:[#allocation89_spill] sm:$0xff]  ;;  %v6714_v7 = vld [vmem:[#allocation95_spill] sm:$0xff] }
 0x1b9   :  { %4000 = vtanh.f32 %v5208_v42  ;;  %v1753_v37 = vadd.f32 1.0, %v3999_v55  ;;  %v6716_v55 = vld [vmem:[#allocation97_spill] sm:$0xff] }
 0x1ba   :  { %4002 = vrcp.f32 %v1752_v28  ;;  %v5211_v49 = vadd.f32 %v1761_v62, %v1759_v18  ;;  %v6715_v28 = vld [vmem:[#allocation96_spill] sm:$0xff]  ;;  %v6717_v18 = vld [vmem:[#allocation98_spill] sm:$0xff]  ;;  %v6718_v62 = vld [vmem:[#allocation99_spill] sm:$0xff] }
 0x1bb   :  { %4004 = vrcp.f32 %v1753_v37  ;;  %v6719_v37 = vld [vmem:[#allocation100_spill] sm:$0xff] }
 0x1bc   :  { %4006 = vtanh.f32 %v5211_v49 }
 0x1c6   :  { %v4001_v47 = vpop.eup %4000 }
 0x1c7   :  { %v4003_v25 = vpop.eup %4002 }
 0x1c8   :  { %v4005_v38 = vpop.eup %4004  ;;  %v1766_v8 = vmul.f32 %v4003_v25, %v4001_v47  ;;  %v6720_v47 = vld [vmem:[#allocation101_spill] sm:$0xff]  ;;  %v6721_v25 = vld [vmem:[#allocation102_spill] sm:$0xff] }
 0x1c9   :  { %v4007_v21 = vpop.eup %4006 }
 0x1ca   :  { %v1767_v43 = vmul.f32 %v4007_v21, %v4005_v38  ;;  %v5214_v2 = vpack.c.bf16 %v1766_v8, %v1766_v8  ;;  %v6722_v38 = vld [vmem:[#allocation103_spill] sm:$0xff]  ;;  %v6723_v21 = vld [vmem:[#allocation104_spill] sm:$0xff]  ;;  %v6724_v8 = vld [vmem:[#allocation105_spill] sm:$0xff] }
 0x1cc   :  { %v1777_v31 = vpack.c.bf16 %v1767_v43, %v1767_v43  ;;  %v6725_v43 = vld [vmem:[#allocation106_spill] sm:$0xff] }
 0x1ce   :  { %1810 = vmatprep.mubr.bf16.mxu1 %v1777_v31  ;;  %1851 = vmatprep.mubr.bf16.mxu0 %v1777_v31 }
 0x1cf   :  { %1811 = vmatmul.mubr.bf16.vlgmr.msra.gmra.mxu1 %v5214_v2  ;;  %1852 = vmatmul.mubr.bf16.vlgmr.msra.gmra.mxu0 %v5214_v2 }
 0x1d0   :  { %1861 = vmatpush1.bf16.msra.mxu1 %v6698_v23  ;;  %1902 = vmatpush1.bf16.msra.mxu0 %v6699_v41 }
 0x1d1   :  { %1892 = vmatprep.mubr.bf16.mxu1 %v1777_v31  ;;  %1933 = vmatprep.mubr.bf16.mxu0 %v1777_v31  ;;  %v6726_v31 = vld [vmem:[#allocation107_spill] sm:$0xff] }
 0x1d2   :  { %1862 = vmatprep.subr.bf16.mxu1 %v6700_v26  ;;  %1903 = vmatprep.subr.bf16.mxu0 %v6701_v61 }
 0x1d4   :  { %1863 = vmatpush1.bf16.msra.mxu1 %v6702_v9  ;;  %1904 = vmatpush1.bf16.msra.mxu0 %v6703_v24 }
 0x1d5   :  { %1864 = vmatprep.subr.bf16.mxu1 %v6704_v56  ;;  %1905 = vmatprep.subr.bf16.mxu0 %v6705_v44 }
 0x1d8   :  { %1865 = vmatpush1.bf16.msra.mxu1 %v6706_v27  ;;  %1906 = vmatpush1.bf16.msra.mxu0 %v6707_v22 }
 0x1d9   :  { %1866 = vmatprep.subr.bf16.mxu1 %v6708_v33  ;;  %1907 = vmatprep.subr.bf16.mxu0 %v6709_v10 }
 0x1dc   :  { %1867 = vmatpush1.bf16.msra.mxu1 %v6710_v48  ;;  %1908 = vmatpush1.bf16.msra.mxu0 %v6711_v30 }
 0x1dd   :  { %1868 = vmatprep.subr.bf16.mxu1 %v6712_v36  ;;  %1909 = vmatprep.subr.bf16.mxu0 %v6713_v63 }
 0x1e0   :  { %1869 = vmatpush1.bf16.msra.mxu1 %v6714_v7  ;;  %1910 = vmatpush1.bf16.msra.mxu0 %v6715_v28 }
 0x1e1   :  { %1870 = vmatprep.subr.bf16.mxu1 %v6716_v55  ;;  %1911 = vmatprep.subr.bf16.mxu0 %v6717_v18  ;;  %v6727_v55 = vld [vmem:[#allocation108_spill] sm:$0xff]  ;;  %v6728_v18 = vld [vmem:[#allocation109_spill] sm:$0xff] }
 0x1e4   :  { %1871 = vmatpush1.bf16.msra.mxu1 %v6718_v62  ;;  %1912 = vmatpush1.bf16.msra.mxu0 %v6719_v37  ;;  %v6729_v62 = vld [vmem:[#allocation110_spill] sm:$0xff]  ;;  %v6730_v37 = vld [vmem:[#allocation111_spill] sm:$0xff] }
 0x1e5   :  { %1872 = vmatprep.subr.bf16.mxu1 %v6720_v47  ;;  %1913 = vmatprep.subr.bf16.mxu0 %v6721_v25  ;;  %v6731_v47 = vld [vmem:[#allocation112_spill] sm:$0xff]  ;;  %v6732_v25 = vld [vmem:[#allocation113_spill] sm:$0xff] }
 0x1e8   :  { %1873 = vmatpush1.bf16.msra.mxu1 %v6722_v38  ;;  %1914 = vmatpush1.bf16.msra.mxu0 %v6723_v21  ;;  %v6733_v38 = vld [vmem:[#allocation114_spill] sm:$0xff]  ;;  %v6734_v21 = vld [vmem:[#allocation115_spill] sm:$0xff] }
 0x1e9   :  { %1874 = vmatprep.subr.bf16.mxu1 %v6724_v8  ;;  %1915 = vmatprep.subr.bf16.mxu0 %v6725_v43  ;;  %v6735_v8 = vld [vmem:[#allocation116_spill] sm:$0xff]  ;;  %v6736_v43 = vld [vmem:[#allocation117_spill] sm:$0xff] }
 0x1ec   :  { %1875 = vmatpush1.bf16.msra.mxu1 %v6726_v31  ;;  %1916 = vmatpush1.bf16.msra.mxu0 %v6727_v55  ;;  %v6737_v31 = vld [vmem:[#allocation118_spill] sm:$0xff]  ;;  %v6738_v55 = vld [vmem:[#allocation119_spill] sm:$0xff] }
 0x1ed   :  { %1876 = vmatprep.subr.bf16.mxu1 %v6728_v18  ;;  %1917 = vmatprep.subr.bf16.mxu0 %v6729_v62  ;;  %v6739_v18 = vld [vmem:[#allocation120_spill] sm:$0xff]  ;;  %v6740_v62 = vld [vmem:[#allocation121_spill] sm:$0xff] }
 0x1f0   :  { %1877 = vmatpush2.bf16.msra.mxu1 %v6730_v37  ;;  %1918 = vmatpush2.bf16.msra.mxu0 %v6731_v47  ;;  %v6741_v37 = vld [vmem:[#allocation122_spill] sm:$0xff]  ;;  %v6742_v47 = vld [vmem:[#allocation123_spill] sm:$0xff] }
 0x1f1   :  { %1878 = vmatprep.subr.bf16.mxu1 %v6732_v25  ;;  %1919 = vmatprep.subr.bf16.mxu0 %v6733_v38  ;;  %v6743_v25 = vld [vmem:[#allocation124_spill] sm:$0xff]  ;;  %v6744_v38 = vld [vmem:[#allocation125_spill] sm:$0xff] }
 0x1f4   :  { %1879 = vmatpush2.bf16.msra.mxu1 %v6734_v21  ;;  %1920 = vmatpush2.bf16.msra.mxu0 %v6735_v8  ;;  %v6745_v21 = vld [vmem:[#allocation126_spill] sm:$0xff] }
 0x1f5   :  { %1880 = vmatprep.subr.bf16.mxu1 %v6736_v43  ;;  %1921 = vmatprep.subr.bf16.mxu0 %v6737_v31 }
 0x1f8   :  { %1881 = vmatpush2.bf16.msra.mxu1 %v6738_v55  ;;  %1922 = vmatpush2.bf16.msra.mxu0 %v6739_v18  ;;  %v6746_v55 = vld [vmem:[#allocation130_spill] sm:$0xff]  ;;  %v6747_v18 = vld [vmem:[#allocation131_spill] sm:$0xff] }
 0x1f9   :  { %1882 = vmatprep.subr.bf16.mxu1 %v6740_v62  ;;  %1923 = vmatprep.subr.bf16.mxu0 %v6741_v37 }
 0x1fc   :  { %1883 = vmatpush2.bf16.msra.mxu1 %v6742_v47  ;;  %1924 = vmatpush2.bf16.msra.mxu0 %v6743_v25 }
 0x1fd   :  { %1884 = vmatprep.subr.bf16.mxu1 %v6744_v38  ;;  %1925 = vmatprep.subr.bf16.mxu0 %v6745_v21 }
 0x200   :  { %1885 = vmatpush2.bf16.msra.mxu1 %v4868_v53  ;;  %1926 = vmatpush2.bf16.msra.mxu0 %v4870_v54 }
 0x201   :  { %1886 = vmatprep.subr.bf16.mxu1 %v4874_v52  ;;  %1927 = vmatprep.subr.bf16.mxu0 %v6746_v55 }
 0x204   :  { %1887 = vmatpush2.bf16.msra.mxu1 %v6747_v18  ;;  %1928 = vmatpush2.bf16.msra.mxu0 %v4882_v20 }
 0x205   :  { %1888 = vmatprep.subr.bf16.mxu1 %v4886_v16  ;;  %1929 = vmatprep.subr.bf16.mxu0 %v4888_v29 }
 0x208   :  { %1889 = vmatpush2.bf16.msra.mxu1 %v4892_v0  ;;  %1930 = vmatpush2.bf16.msra.mxu0 %v4894_v1 }
 0x209   :  { %1890 = vmatprep.subr.bf16.mxu1 %v4898_v45  ;;  %1931 = vmatprep.subr.bf16.mxu0 %v4900_v11 }
 0x20c   :  { %1891 = vmatpush2.bf16.msra.mxu1 %v4904_v17  ;;  %1932 = vmatpush2.bf16.msra.mxu0 %v4906_v19 }
 0x20d   :  { %2008 = vmatprep.subr.bf16.mxu1 %v4470_v50  ;;  %2049 = vmatprep.subr.bf16.mxu0 %v4472_v51 }
 0x20f   :  { %1893 = vmatmul.mubr.bf16.vlgmr.msra.gmra.mxu1 %v5214_v2  ;;  %1934 = vmatmul.mubr.bf16.vlgmr.msra.gmra.mxu0 %v5214_v2  ;;  %v6748_v2 = vld [vmem:[#allocation27_spill] sm:$0xff] }
 0x210   :  { %2009 = vmatpush1.bf16.msra.mxu1 %v4504_v57  ;;  %2050 = vmatpush1.bf16.msra.mxu0 %v4506_v58 }
 0x211   :  { %2010 = vmatprep.subr.bf16.mxu1 %v4508_v59  ;;  %2051 = vmatprep.subr.bf16.mxu0 %v4510_v60  ;;  %v6749_v59 = vld [vmem:[#allocation28_spill] sm:$0xff]  ;;  %v6750_v60 = vld [vmem:[#allocation29_spill] sm:$0xff] }
 0x214   :  { %2011 = vmatpush1.bf16.msra.mxu1 %v4517_v3  ;;  %2052 = vmatpush1.bf16.msra.mxu0 %v4519_v4  ;;  %v6751_v3 = vld [vmem:[#allocation30_spill] sm:$0xff]  ;;  %v6796_v4 = vld [vmem:[#allocation145_spill] sm:$0xff] }
 0x215   :  { %2012 = vmatprep.subr.bf16.mxu1 %v4523_v5  ;;  %2053 = vmatprep.subr.bf16.mxu0 %v4525_v6  ;;  %v6752_v5 = vld [vmem:[#allocation32_spill] sm:$0xff]  ;;  %v6795_v6 = vld [vmem:[#allocation155_spill] sm:$0xff] }
 0x218   :  { %2013 = vmatpush1.bf16.msra.mxu1 %v4533_v12  ;;  %2054 = vmatpush1.bf16.msra.mxu0 %v4535_v13  ;;  %v6794_v12 = vld [vmem:[#allocation143_spill] sm:$0xff] }
 0x219   :  { %2014 = vmatprep.subr.bf16.mxu1 %v4539_v14  ;;  %2055 = vmatprep.subr.bf16.mxu0 %v4541_v15  ;;  %v6753_v15 = vld [vmem:[#allocation37_spill] sm:$0xff] }
 0x21c   :  { %2015 = vmatpush1.bf16.msra.mxu1 %v6748_v2  ;;  %2056 = vmatpush1.bf16.msra.mxu0 %v6749_v59  ;;  %v6754_v2 = vld [vmem:[#allocation38_spill] sm:$0xff] }
 0x21d   :  { %2016 = vmatprep.subr.bf16.mxu1 %v6750_v60  ;;  %2057 = vmatprep.subr.bf16.mxu0 %v6751_v3  ;;  %v6755_v60 = vld [vmem:[#allocation40_spill] sm:$0xff]  ;;  %v6756_v3 = vld [vmem:[#allocation41_spill] sm:$0xff] }
 0x220   :  { %2017 = vmatpush1.bf16.msra.mxu1 %v4563_v32  ;;  %2058 = vmatpush1.bf16.msra.mxu0 %v6752_v5  ;;  %v6757_v32 = vld [vmem:[#allocation42_spill] sm:$0xff]  ;;  %v6758_v5 = vld [vmem:[#allocation43_spill] sm:$0xff] }
 0x221   :  { %2018 = vmatprep.subr.bf16.mxu1 %v4569_v34  ;;  %2059 = vmatprep.subr.bf16.mxu0 %v4571_v35  ;;  %v6759_v34 = vld [vmem:[#allocation44_spill] sm:$0xff]  ;;  %v6760_v35 = vld [vmem:[#allocation45_spill] sm:$0xff] }
 0x224   :  { %2019 = vmatpush1.bf16.msra.mxu1 %v4578_v39  ;;  %2060 = vmatpush1.bf16.msra.mxu0 %v4580_v40  ;;  %v6761_v39 = vld [vmem:[#allocation46_spill] sm:$0xff]  ;;  %v6762_v40 = vld [vmem:[#allocation47_spill] sm:$0xff] }
 0x225   :  { %2020 = vmatprep.subr.bf16.mxu1 %v6753_v15  ;;  %2061 = vmatprep.subr.bf16.mxu0 %v6754_v2  ;;  %v6763_v15 = vld [vmem:[#allocation48_spill] sm:$0xff]  ;;  %v6764_v2 = vld [vmem:[#allocation49_spill] sm:$0xff] }
 0x228   :  { %2021 = vmatpush1.bf16.msra.mxu1 %v4593_v46  ;;  %2062 = vmatpush1.bf16.msra.mxu0 %v6755_v60  ;;  %v6765_v46 = vld [vmem:[#allocation50_spill] sm:$0xff]  ;;  %v6766_v60 = vld [vmem:[#allocation51_spill] sm:$0xff] }
 0x229   :  { %2022 = vmatprep.subr.bf16.mxu1 %v6756_v3  ;;  %2063 = vmatprep.subr.bf16.mxu0 %v6757_v32  ;;  %v6767_v3 = vld [vmem:[#allocation52_spill] sm:$0xff]  ;;  %v6768_v32 = vld [vmem:[#allocation53_spill] sm:$0xff] }
 0x22c   :  { %2023 = vmatpush1.bf16.msra.mxu1 %v6758_v5  ;;  %2064 = vmatpush1.bf16.msra.mxu0 %v6759_v34  ;;  %v6769_v5 = vld [vmem:[#allocation54_spill] sm:$0xff]  ;;  %v6770_v34 = vld [vmem:[#allocation55_spill] sm:$0xff] }
 0x22d   :  { %2024 = vmatprep.subr.bf16.mxu1 %v6760_v35  ;;  %2065 = vmatprep.subr.bf16.mxu0 %v6761_v39  ;;  %v6771_v35 = vld [vmem:[#allocation56_spill] sm:$0xff]  ;;  %v6772_v39 = vld [vmem:[#allocation57_spill] sm:$0xff] }
 0x230   :  { %2025 = vmatpush2.bf16.msra.mxu1 %v6762_v40  ;;  %2066 = vmatpush2.bf16.msra.mxu0 %v6763_v15  ;;  %v6773_v40 = vld [vmem:[#allocation58_spill] sm:$0xff]  ;;  %v6774_v15 = vld [vmem:[#allocation59_spill] sm:$0xff] }
 0x231   :  { %2026 = vmatprep.subr.bf16.mxu1 %v6764_v2  ;;  %2067 = vmatprep.subr.bf16.mxu0 %v6765_v46  ;;  %v6775_v2 = vld [vmem:[#allocation60_spill] sm:$0xff]  ;;  %v6776_v46 = vld [vmem:[#allocation61_spill] sm:$0xff] }
 0x234   :  { %2027 = vmatpush2.bf16.msra.mxu1 %v6766_v60  ;;  %2068 = vmatpush2.bf16.msra.mxu0 %v6767_v3  ;;  %v6777_v60 = vld [vmem:[#allocation62_spill] sm:$0xff]  ;;  %v6778_v3 = vld [vmem:[#allocation63_spill] sm:$0xff] }
 0x235   :  { %2028 = vmatprep.subr.bf16.mxu1 %v6768_v32  ;;  %2069 = vmatprep.subr.bf16.mxu0 %v6769_v5  ;;  %v6779_v32 = vld [vmem:[#allocation64_spill] sm:$0xff]  ;;  %v6780_v5 = vld [vmem:[#allocation65_spill] sm:$0xff] }
 0x238   :  { %2029 = vmatpush2.bf16.msra.mxu1 %v6770_v34  ;;  %2070 = vmatpush2.bf16.msra.mxu0 %v6771_v35  ;;  %v6781_v34 = vld [vmem:[#allocation66_spill] sm:$0xff]  ;;  %v6782_v35 = vld [vmem:[#allocation67_spill] sm:$0xff] }
 0x239   :  { %2030 = vmatprep.subr.bf16.mxu1 %v6772_v39  ;;  %2071 = vmatprep.subr.bf16.mxu0 %v6773_v40  ;;  %v6783_v39 = vld [vmem:[#allocation68_spill] sm:$0xff]  ;;  %v6784_v40 = vld [vmem:[#allocation69_spill] sm:$0xff] }
 0x23c   :  { %2031 = vmatpush2.bf16.msra.mxu1 %v6774_v15  ;;  %2072 = vmatpush2.bf16.msra.mxu0 %v6775_v2  ;;  %v6785_v15 = vld [vmem:[#allocation70_spill] sm:$0xff]  ;;  %v6786_v2 = vld [vmem:[#allocation71_spill] sm:$0xff] }
 0x23d   :  { %2032 = vmatprep.subr.bf16.mxu1 %v6776_v46  ;;  %2073 = vmatprep.subr.bf16.mxu0 %v6777_v60  ;;  %v6787_v46 = vld [vmem:[#allocation72_spill] sm:$0xff]  ;;  %v6788_v60 = vld [vmem:[#allocation73_spill] sm:$0xff] }
 0x240   :  { %2033 = vmatpush2.bf16.msra.mxu1 %v6778_v3  ;;  %2074 = vmatpush2.bf16.msra.mxu0 %v6779_v32  ;;  %v6789_v3 = vld [vmem:[#allocation74_spill] sm:$0xff]  ;;  %v6790_v32 = vld [vmem:[#allocation75_spill] sm:$0xff] }
 0x241   :  { %2034 = vmatprep.subr.bf16.mxu1 %v6780_v5  ;;  %2075 = vmatprep.subr.bf16.mxu0 %v6781_v34  ;;  %v6791_v5 = vld [vmem:[#allocation76_spill] sm:$0xff]  ;;  %v6792_v34 = vld [vmem:[#allocation77_spill] sm:$0xff] }
 0x244   :  { %2035 = vmatpush2.bf16.msra.mxu1 %v6782_v35  ;;  %2076 = vmatpush2.bf16.msra.mxu0 %v6783_v39  ;;  %v6793_v35 = vld [vmem:[#allocation78_spill] sm:$0xff] }
 0x245   :  { %2036 = vmatprep.subr.bf16.mxu1 %v6784_v40  ;;  %2077 = vmatprep.subr.bf16.mxu0 %v6785_v15 }
 0x248   :  { %2037 = vmatpush2.bf16.msra.mxu1 %v6786_v2  ;;  %2078 = vmatpush2.bf16.msra.mxu0 %v6787_v46 }
 0x249   :  { %2038 = vmatprep.subr.bf16.mxu1 %v6788_v60  ;;  %2079 = vmatprep.subr.bf16.mxu0 %v6789_v3 }
 0x24c   :  { %2039 = vmatpush2.bf16.msra.mxu1 %v6790_v32  ;;  %2080 = vmatpush2.bf16.msra.mxu0 %v6791_v5  ;;  %v6797_v5 = vld [vmem:[#allocation157_spill] sm:$0xff] }
 0x24d   :  { %2090 = vmatprep.subr.bf16.mxu1 %v6792_v34  ;;  %2131 = vmatprep.subr.bf16.mxu0 %v6793_v35 }
 0x28f   :  { %v1812_v39 = vpop.f32.mrf.mxu1  ;;  %v1853_v40 = vpop.f32.mrf.mxu0 }
 0x290   :  { %v1942_v60 = vadd.f32 %v1812_v39, %v6794_v12  ;;  %v1944_v3 = vadd.f32 %v1853_v40, %v6795_v6 }
 0x291   :  { %v1814_v59 = vpop.f32.mrf.mxu1  ;;  %v1855_v15 = vpop.f32.mrf.mxu0 }
 0x292   :  { %v1943_v32 = vadd.f32 %v1814_v59, %v6796_v4  ;;  %v3803_v58 = vmul.f32 -1.442695, %v1942_v60  ;;  %v1945_v57 = vadd.f32 %v1855_v15, %v6797_v5  ;;  %v3805_v34 = vmul.f32 -1.442695, %v1944_v3  ;;  %v6798_v4 = vld [vmem:[#allocation156_spill] sm:$0xff] }
 0x293   :  { %v1816_v14 = vpop.f32.mrf.mxu1  ;;  %v1857_v2 = vpop.f32.mrf.mxu0  ;;  %v6799_v5 = vld [vmem:[#allocation184_spill] sm:$0xff] }
 0x294   :  { %v3804_v51 = vmul.f32 -1.442695, %v1943_v32  ;;  %4008 = vpow2.f32 %v3803_v58  ;;  %v3806_v35 = vmul.f32 -1.442695, %v1945_v57  ;;  %v6800_v32 = vld [vmem:[#allocation158_spill] sm:$0xff] }
 0x295   :  { %v1817_v13 = vpop.f32.mrf.mxu1  ;;  %v1858_v46 = vpop.f32.mrf.mxu0  ;;  %4010 = vpow2.f32 %v3805_v34 }
 0x296   :  { %4012 = vpow2.f32 %v3804_v51 }
 0x297   :  { %4014 = vpow2.f32 %v3806_v35  ;;  %v6801_v35 = vld [vmem:[#allocation185_spill] sm:$0xff] }
 0x2a1   :  { %v4009_v14 = vpop.eup %4008 }
 0x2a2   :  { %v4011_v2 = vpop.eup %4010  ;;  %v1956_v46 = vadd.f32 1.0, %v4009_v14 }
 0x2a3   :  { %v4013_v13 = vpop.eup %4012  ;;  %v1968_v12 = vadd.f32 1.0, %v4011_v2 }
 0x2a4   :  { %v4015_v50 = vpop.eup %4014  ;;  %v1957_v39 = vadd.f32 1.0, %v4013_v13  ;;  %4016 = vrcp.f32 %v1956_v46 }
 0x2a5   :  { %v1969_v6 = vadd.f32 1.0, %v4015_v50  ;;  %4018 = vrcp.f32 %v1968_v12 }
 0x2a6   :  { %4020 = vrcp.f32 %v1957_v39 }
 0x2b1   :  { %v4017_v12 = vpop.eup %4016 }
 0x2cf   :  { %v1894_v59 = vpop.f32.mrf.mxu1  ;;  %v1935_v60 = vpop.f32.mrf.mxu0 }
 0x2d0   :  { %v1946_v3 = vadd.f32 %v1894_v59, %v6798_v4  ;;  %v1948_v58 = vadd.f32 %v1935_v60, %v6799_v5  ;;  %v4019_v59 = vpop.eup %4018 }
 0x2d1   :  { %v1896_v57 = vpop.f32.mrf.mxu1  ;;  %v1937_v51 = vpop.f32.mrf.mxu0 }
 0x2d2   :  { %4022 = vtanh.f32 %v1946_v3  ;;  %v3807_v15 = vmul.f32 -1.442695, %v1948_v58  ;;  %v1947_v34 = vadd.f32 %v1896_v57, %v6800_v32  ;;  %v1949_v40 = vadd.f32 %v1937_v51, %v6801_v35  ;;  %v4021_v39 = vpop.eup %4020 }
 0x2d3   :  { %4024 = vrcp.f32 %v1969_v6  ;;  %v1898_v14 = vpop.f32.mrf.mxu1  ;;  %v1939_v2 = vpop.f32.mrf.mxu0  ;;  %v1988_v3 = vmul.f32 %v4019_v59, %v5208_v42 }
 0x2d4   :  { %4026 = vpow2.f32 %v3807_v15  ;;  %v3808_v50 = vmul.f32 -1.442695, %v1949_v40 }
 0x2d5   :  { %4028 = vtanh.f32 %v1947_v34  ;;  %v1899_v13 = vpop.f32.mrf.mxu1  ;;  %v1940_v46 = vpop.f32.mrf.mxu0 }
 0x2d6   :  { %4030 = vpow2.f32 %v3808_v50 }
 0x2df   :  { %v4023_v60 = vpop.eup %4022 }
 0x2e0   :  { %v4025_v4 = vpop.eup %4024  ;;  %v1990_v5 = vmul.f32 %v4023_v60, %v4017_v12  ;;  %v6804_v60 = vld [vmem:[#allocation99_spill] sm:$0xff] }
 0x2e1   :  { %v4027_v58 = vpop.eup %4026  ;;  %v1989_v15 = vmul.f32 %v4025_v4, %v5211_v49  ;;  %v6802_v49 = vld [vmem:[#allocation97_spill] sm:$0xff]  ;;  %v6805_v4 = vld [vmem:[#allocation100_spill] sm:$0xff] }
 0x2e2   :  { %v4029_v57 = vpop.eup %4028  ;;  %v5357_v51 = vadd.f32 %v1990_v5, %v1988_v3  ;;  %v1982_v6 = vadd.f32 1.0, %v4027_v58  ;;  %v6806_v3 = vld [vmem:[#allocation101_spill] sm:$0xff]  ;;  %v6807_v5 = vld [vmem:[#allocation102_spill] sm:$0xff]  ;;  %v6808_v58 = vld [vmem:[#allocation103_spill] sm:$0xff] }
 0x2e3   :  { %v4031_v32 = vpop.eup %4030  ;;  %v1991_v34 = vmul.f32 %v4029_v57, %v4021_v39  ;;  %v6803_v39 = vld [vmem:[#allocation98_spill] sm:$0xff]  ;;  %v6809_v57 = vld [vmem:[#allocation104_spill] sm:$0xff] }
 0x2e4   :  { %4032 = vtanh.f32 %v5357_v51  ;;  %v1983_v35 = vadd.f32 1.0, %v4031_v32  ;;  %v6811_v32 = vld [vmem:[#allocation106_spill] sm:$0xff] }
 0x2e5   :  { %4034 = vrcp.f32 %v1982_v6  ;;  %v5361_v40 = vadd.f32 %v1991_v34, %v1989_v15  ;;  %v6810_v6 = vld [vmem:[#allocation105_spill] sm:$0xff]  ;;  %v6812_v15 = vld [vmem:[#allocation107_spill] sm:$0xff]  ;;  %v6813_v34 = vld [vmem:[#allocation108_spill] sm:$0xff] }
 0x2e6   :  { %4036 = vrcp.f32 %v1983_v35  ;;  %v6814_v35 = vld [vmem:[#allocation109_spill] sm:$0xff] }
 0x2e7   :  { %4038 = vtanh.f32 %v5361_v40 }
 0x2f1   :  { %v4033_v42 = vpop.eup %4032 }
 0x2f2   :  { %v4035_v14 = vpop.eup %4034 }
 0x2f3   :  { %v4037_v2 = vpop.eup %4036  ;;  %v1996_v13 = vmul.f32 %v4035_v14, %v4033_v42  ;;  %v6815_v42 = vld [vmem:[#allocation110_spill] sm:$0xff]  ;;  %v6816_v14 = vld [vmem:[#allocation111_spill] sm:$0xff] }
 0x2f4   :  { %v4039_v50 = vpop.eup %4038 }
 0x2f5   :  { %v1997_v46 = vmul.f32 %v4039_v50, %v4037_v2  ;;  %v5364_v59 = vpack.c.bf16 %v1996_v13, %v1996_v13  ;;  %v6817_v2 = vld [vmem:[#allocation112_spill] sm:$0xff]  ;;  %v6818_v50 = vld [vmem:[#allocation113_spill] sm:$0xff]  ;;  %v6819_v13 = vld [vmem:[#allocation114_spill] sm:$0xff] }
 0x2f7   :  { %v2007_v12 = vpack.c.bf16 %v1997_v46, %v1997_v46  ;;  %v6820_v46 = vld [vmem:[#allocation115_spill] sm:$0xff] }
 0x2f9   :  { %2040 = vmatprep.mubr.bf16.mxu1 %v2007_v12  ;;  %2081 = vmatprep.mubr.bf16.mxu0 %v2007_v12 }
 0x2fa   :  { %2041 = vmatmul.mubr.bf16.vlgmr.msra.gmra.mxu1 %v5364_v59  ;;  %2082 = vmatmul.mubr.bf16.vlgmr.msra.gmra.mxu0 %v5364_v59 }
 0x2fb   :  { %2091 = vmatpush1.bf16.msra.mxu1 %v6698_v23  ;;  %2132 = vmatpush1.bf16.msra.mxu0 %v6699_v41 }
 0x2fc   :  { %2122 = vmatprep.mubr.bf16.mxu1 %v2007_v12  ;;  %2163 = vmatprep.mubr.bf16.mxu0 %v2007_v12  ;;  %v6821_v12 = vld [vmem:[#allocation119_spill] sm:$0xff] }
 0x2fd   :  { %2092 = vmatprep.subr.bf16.mxu1 %v6700_v26  ;;  %2133 = vmatprep.subr.bf16.mxu0 %v6701_v61 }
 0x2ff   :  { %2093 = vmatpush1.bf16.msra.mxu1 %v6702_v9  ;;  %2134 = vmatpush1.bf16.msra.mxu0 %v6703_v24 }
 0x300   :  { %2094 = vmatprep.subr.bf16.mxu1 %v6704_v56  ;;  %2135 = vmatprep.subr.bf16.mxu0 %v6705_v44 }
 0x303   :  { %2095 = vmatpush1.bf16.msra.mxu1 %v6706_v27  ;;  %2136 = vmatpush1.bf16.msra.mxu0 %v6707_v22 }
 0x304   :  { %2096 = vmatprep.subr.bf16.mxu1 %v6708_v33  ;;  %2137 = vmatprep.subr.bf16.mxu0 %v6709_v10 }
 0x307   :  { %2097 = vmatpush1.bf16.msra.mxu1 %v6710_v48  ;;  %2138 = vmatpush1.bf16.msra.mxu0 %v6711_v30 }
 0x308   :  { %2098 = vmatprep.subr.bf16.mxu1 %v6712_v36  ;;  %2139 = vmatprep.subr.bf16.mxu0 %v6713_v63 }
 0x30b   :  { %2099 = vmatpush1.bf16.msra.mxu1 %v6714_v7  ;;  %2140 = vmatpush1.bf16.msra.mxu0 %v6715_v28 }
 0x30c   :  { %2100 = vmatprep.subr.bf16.mxu1 %v6802_v49  ;;  %2141 = vmatprep.subr.bf16.mxu0 %v6803_v39 }
 0x30f   :  { %2101 = vmatpush1.bf16.msra.mxu1 %v6804_v60  ;;  %2142 = vmatpush1.bf16.msra.mxu0 %v6805_v4 }
 0x310   :  { %2102 = vmatprep.subr.bf16.mxu1 %v6806_v3  ;;  %2143 = vmatprep.subr.bf16.mxu0 %v6807_v5 }
 0x313   :  { %2103 = vmatpush1.bf16.msra.mxu1 %v6808_v58  ;;  %2144 = vmatpush1.bf16.msra.mxu0 %v6809_v57 }
 0x314   :  { %2104 = vmatprep.subr.bf16.mxu1 %v6810_v6  ;;  %2145 = vmatprep.subr.bf16.mxu0 %v6811_v32 }
 0x317   :  { %2105 = vmatpush1.bf16.msra.mxu1 %v6812_v15  ;;  %2146 = vmatpush1.bf16.msra.mxu0 %v6813_v34 }
 0x318   :  { %2106 = vmatprep.subr.bf16.mxu1 %v6814_v35  ;;  %2147 = vmatprep.subr.bf16.mxu0 %v6815_v42  ;;  %v6822_v35 = vld [vmem:[#allocation120_spill] sm:$0xff] }
 0x31b   :  { %2107 = vmatpush2.bf16.msra.mxu1 %v6816_v14  ;;  %2148 = vmatpush2.bf16.msra.mxu0 %v6817_v2 }
 0x31c   :  { %2108 = vmatprep.subr.bf16.mxu1 %v6818_v50  ;;  %2149 = vmatprep.subr.bf16.mxu0 %v6819_v13 }
 0x31f   :  { %2109 = vmatpush2.bf16.msra.mxu1 %v6820_v46  ;;  %2150 = vmatpush2.bf16.msra.mxu0 %v6735_v8 }
 0x320   :  { %2110 = vmatprep.subr.bf16.mxu1 %v6736_v43  ;;  %2151 = vmatprep.subr.bf16.mxu0 %v6737_v31 }
 0x323   :  { %2111 = vmatpush2.bf16.msra.mxu1 %v6821_v12  ;;  %2152 = vmatpush2.bf16.msra.mxu0 %v6822_v35 }
 0x324   :  { %2112 = vmatprep.subr.bf16.mxu1 %v6740_v62  ;;  %2153 = vmatprep.subr.bf16.mxu0 %v6741_v37 }
 0x327   :  { %2113 = vmatpush2.bf16.msra.mxu1 %v6742_v47  ;;  %2154 = vmatpush2.bf16.msra.mxu0 %v6743_v25 }
 0x328   :  { %2114 = vmatprep.subr.bf16.mxu1 %v6744_v38  ;;  %2155 = vmatprep.subr.bf16.mxu0 %v6745_v21  ;;  %v6890_v21 = vld [vmem:[#allocation159_spill] sm:$0xff]  ;;  %v6891_v38 = vld [vmem:[#allocation149_spill] sm:$0xff] }
 0x32b   :  { %2115 = vmatpush2.bf16.msra.mxu1 %v4868_v53  ;;  %2156 = vmatpush2.bf16.msra.mxu0 %v4870_v54  ;;  %v6889_v53 = vld [vmem:[#allocation147_spill] sm:$0xff] }
 0x32c   :  { %2116 = vmatprep.subr.bf16.mxu1 %v4874_v52  ;;  %2157 = vmatprep.subr.bf16.mxu0 %v6746_v55  ;;  %v6823_v55 = vld [vmem:[#allocation13_spill] sm:$0xff] }
 0x32f   :  { %2117 = vmatpush2.bf16.msra.mxu1 %v6747_v18  ;;  %2158 = vmatpush2.bf16.msra.mxu0 %v4882_v20  ;;  %v6824_v18 = vld [vmem:[#allocation14_spill] sm:$0xff] }
 0x330   :  { %2118 = vmatprep.subr.bf16.mxu1 %v4886_v16  ;;  %2159 = vmatprep.subr.bf16.mxu0 %v4888_v29  ;;  %v6825_v29 = vld [vmem:[#allocation15_spill] sm:$0xff]  ;;  %v6834_v16 = vld [vmem:[#allocation24_spill] sm:$0xff] }
 0x333   :  { %2119 = vmatpush2.bf16.msra.mxu1 %v4892_v0  ;;  %2160 = vmatpush2.bf16.msra.mxu0 %v4894_v1  ;;  %v6826_v0 = vld [vmem:[#allocation16_spill] sm:$0xff]  ;;  %v6827_v1 = vld [vmem:[#allocation17_spill] sm:$0xff] }
 0x334   :  { %2120 = vmatprep.subr.bf16.mxu1 %v4898_v45  ;;  %2161 = vmatprep.subr.bf16.mxu0 %v4900_v11  ;;  %v6828_v45 = vld [vmem:[#allocation18_spill] sm:$0xff]  ;;  %v6829_v11 = vld [vmem:[#allocation19_spill] sm:$0xff] }
 0x337   :  { %2121 = vmatpush2.bf16.msra.mxu1 %v4904_v17  ;;  %2162 = vmatpush2.bf16.msra.mxu0 %v4906_v19  ;;  %v6830_v17 = vld [vmem:[#allocation20_spill] sm:$0xff]  ;;  %v6831_v19 = vld [vmem:[#allocation21_spill] sm:$0xff] }
 0x338   :  { %2238 = vmatprep.subr.bf16.mxu1 %v6823_v55  ;;  %2279 = vmatprep.subr.bf16.mxu0 %v6824_v18  ;;  %v6832_v55 = vld [vmem:[#allocation22_spill] sm:$0xff]  ;;  %v6833_v18 = vld [vmem:[#allocation23_spill] sm:$0xff] }
 0x33a   :  { %2123 = vmatmul.mubr.bf16.vlgmr.msra.gmra.mxu1 %v5364_v59  ;;  %2164 = vmatmul.mubr.bf16.vlgmr.msra.gmra.mxu0 %v5364_v59  ;;  %v6835_v59 = vld [vmem:[#allocation25_spill] sm:$0xff] }
 0x33b   :  { %2239 = vmatpush1.bf16.msra.mxu1 %v6825_v29  ;;  %2280 = vmatpush1.bf16.msra.mxu0 %v6826_v0  ;;  %v6836_v29 = vld [vmem:[#allocation26_spill] sm:$0xff]  ;;  %v6837_v0 = vld [vmem:[#allocation27_spill] sm:$0xff] }
 0x33c   :  { %2240 = vmatprep.subr.bf16.mxu1 %v6827_v1  ;;  %2281 = vmatprep.subr.bf16.mxu0 %v6828_v45  ;;  %v6838_v1 = vld [vmem:[#allocation28_spill] sm:$0xff]  ;;  %v6839_v45 = vld [vmem:[#allocation29_spill] sm:$0xff] }
 0x33f   :  { %2241 = vmatpush1.bf16.msra.mxu1 %v6829_v11  ;;  %2282 = vmatpush1.bf16.msra.mxu0 %v6830_v17  ;;  %v6840_v11 = vld [vmem:[#allocation30_spill] sm:$0xff]  ;;  %v6841_v17 = vld [vmem:[#allocation31_spill] sm:$0xff] }
 0x340   :  { %2242 = vmatprep.subr.bf16.mxu1 %v6831_v19  ;;  %2283 = vmatprep.subr.bf16.mxu0 %v6832_v55  ;;  %v6842_v19 = vld [vmem:[#allocation32_spill] sm:$0xff]  ;;  %v6843_v55 = vld [vmem:[#allocation33_spill] sm:$0xff] }
 0x343   :  { %2243 = vmatpush1.bf16.msra.mxu1 %v6833_v18  ;;  %2284 = vmatpush1.bf16.msra.mxu0 %v6834_v16  ;;  %v6844_v18 = vld [vmem:[#allocation34_spill] sm:$0xff]  ;;  %v6845_v16 = vld [vmem:[#allocation35_spill] sm:$0xff] }
 0x344   :  { %2244 = vmatprep.subr.bf16.mxu1 %v6835_v59  ;;  %2285 = vmatprep.subr.bf16.mxu0 %v6836_v29  ;;  %v6846_v59 = vld [vmem:[#allocation36_spill] sm:$0xff]  ;;  %v6847_v29 = vld [vmem:[#allocation37_spill] sm:$0xff] }
 0x347   :  { %2245 = vmatpush1.bf16.msra.mxu1 %v6837_v0  ;;  %2286 = vmatpush1.bf16.msra.mxu0 %v6838_v1  ;;  %v6848_v0 = vld [vmem:[#allocation38_spill] sm:$0xff]  ;;  %v6849_v1 = vld [vmem:[#allocation39_spill] sm:$0xff] }
 0x348   :  { %2246 = vmatprep.subr.bf16.mxu1 %v6839_v45  ;;  %2287 = vmatprep.subr.bf16.mxu0 %v6840_v11  ;;  %v6850_v45 = vld [vmem:[#allocation40_spill] sm:$0xff]  ;;  %v6851_v11 = vld [vmem:[#allocation41_spill] sm:$0xff] }
 0x34b   :  { %2247 = vmatpush1.bf16.msra.mxu1 %v6841_v17  ;;  %2288 = vmatpush1.bf16.msra.mxu0 %v6842_v19  ;;  %v6852_v17 = vld [vmem:[#allocation42_spill] sm:$0xff]  ;;  %v6853_v19 = vld [vmem:[#allocation43_spill] sm:$0xff] }
 0x34c   :  { %2248 = vmatprep.subr.bf16.mxu1 %v6843_v55  ;;  %2289 = vmatprep.subr.bf16.mxu0 %v6844_v18  ;;  %v6854_v55 = vld [vmem:[#allocation44_spill] sm:$0xff]  ;;  %v6855_v18 = vld [vmem:[#allocation45_spill] sm:$0xff] }
 0x34f   :  { %2249 = vmatpush1.bf16.msra.mxu1 %v6845_v16  ;;  %2290 = vmatpush1.bf16.msra.mxu0 %v6846_v59  ;;  %v6856_v16 = vld [vmem:[#allocation46_spill] sm:$0xff]  ;;  %v6857_v59 = vld [vmem:[#allocation47_spill] sm:$0xff] }
 0x350   :  { %2250 = vmatprep.subr.bf16.mxu1 %v6847_v29  ;;  %2291 = vmatprep.subr.bf16.mxu0 %v6848_v0  ;;  %v6858_v29 = vld [vmem:[#allocation48_spill] sm:$0xff]  ;;  %v6859_v0 = vld [vmem:[#allocation49_spill] sm:$0xff] }
 0x353   :  { %2251 = vmatpush1.bf16.msra.mxu1 %v6849_v1  ;;  %2292 = vmatpush1.bf16.msra.mxu0 %v6850_v45  ;;  %v6860_v1 = vld [vmem:[#allocation50_spill] sm:$0xff]  ;;  %v6861_v45 = vld [vmem:[#allocation51_spill] sm:$0xff] }
 0x354   :  { %2252 = vmatprep.subr.bf16.mxu1 %v6851_v11  ;;  %2293 = vmatprep.subr.bf16.mxu0 %v6852_v17  ;;  %v6862_v11 = vld [vmem:[#allocation52_spill] sm:$0xff]  ;;  %v6863_v17 = vld [vmem:[#allocation53_spill] sm:$0xff] }
 0x357   :  { %2253 = vmatpush1.bf16.msra.mxu1 %v6853_v19  ;;  %2294 = vmatpush1.bf16.msra.mxu0 %v6854_v55  ;;  %v6864_v19 = vld [vmem:[#allocation54_spill] sm:$0xff]  ;;  %v6865_v55 = vld [vmem:[#allocation55_spill] sm:$0xff] }
 0x358   :  { %2254 = vmatprep.subr.bf16.mxu1 %v6855_v18  ;;  %2295 = vmatprep.subr.bf16.mxu0 %v6856_v16  ;;  %v6866_v18 = vld [vmem:[#allocation56_spill] sm:$0xff]  ;;  %v6867_v16 = vld [vmem:[#allocation57_spill] sm:$0xff] }
 0x35b   :  { %2255 = vmatpush2.bf16.msra.mxu1 %v6857_v59  ;;  %2296 = vmatpush2.bf16.msra.mxu0 %v6858_v29  ;;  %v6868_v59 = vld [vmem:[#allocation58_spill] sm:$0xff]  ;;  %v6869_v29 = vld [vmem:[#allocation59_spill] sm:$0xff] }
 0x35c   :  { %2256 = vmatprep.subr.bf16.mxu1 %v6859_v0  ;;  %2297 = vmatprep.subr.bf16.mxu0 %v6860_v1  ;;  %v6870_v0 = vld [vmem:[#allocation60_spill] sm:$0xff]  ;;  %v6871_v1 = vld [vmem:[#allocation61_spill] sm:$0xff] }
 0x35f   :  { %2257 = vmatpush2.bf16.msra.mxu1 %v6861_v45  ;;  %2298 = vmatpush2.bf16.msra.mxu0 %v6862_v11  ;;  %v6872_v45 = vld [vmem:[#allocation62_spill] sm:$0xff]  ;;  %v6873_v11 = vld [vmem:[#allocation63_spill] sm:$0xff] }
 0x360   :  { %2258 = vmatprep.subr.bf16.mxu1 %v6863_v17  ;;  %2299 = vmatprep.subr.bf16.mxu0 %v6864_v19  ;;  %v6874_v17 = vld [vmem:[#allocation64_spill] sm:$0xff]  ;;  %v6875_v19 = vld [vmem:[#allocation65_spill] sm:$0xff] }
 0x363   :  { %2259 = vmatpush2.bf16.msra.mxu1 %v6865_v55  ;;  %2300 = vmatpush2.bf16.msra.mxu0 %v6866_v18  ;;  %v6876_v55 = vld [vmem:[#allocation66_spill] sm:$0xff]  ;;  %v6877_v18 = vld [vmem:[#allocation67_spill] sm:$0xff] }
 0x364   :  { %2260 = vmatprep.subr.bf16.mxu1 %v6867_v16  ;;  %2301 = vmatprep.subr.bf16.mxu0 %v6868_v59  ;;  %v6878_v16 = vld [vmem:[#allocation68_spill] sm:$0xff]  ;;  %v6879_v59 = vld [vmem:[#allocation69_spill] sm:$0xff] }
 0x367   :  { %2261 = vmatpush2.bf16.msra.mxu1 %v6869_v29  ;;  %2302 = vmatpush2.bf16.msra.mxu0 %v6870_v0  ;;  %v6880_v29 = vld [vmem:[#allocation70_spill] sm:$0xff]  ;;  %v6881_v0 = vld [vmem:[#allocation71_spill] sm:$0xff] }
 0x368   :  { %2262 = vmatprep.subr.bf16.mxu1 %v6871_v1  ;;  %2303 = vmatprep.subr.bf16.mxu0 %v6872_v45  ;;  %v6882_v1 = vld [vmem:[#allocation72_spill] sm:$0xff]  ;;  %v6883_v45 = vld [vmem:[#allocation73_spill] sm:$0xff] }
 0x36b   :  { %2263 = vmatpush2.bf16.msra.mxu1 %v6873_v11  ;;  %2304 = vmatpush2.bf16.msra.mxu0 %v6874_v17  ;;  %v6884_v11 = vld [vmem:[#allocation74_spill] sm:$0xff]  ;;  %v6885_v17 = vld [vmem:[#allocation75_spill] sm:$0xff] }
 0x36c   :  { %2264 = vmatprep.subr.bf16.mxu1 %v6875_v19  ;;  %2305 = vmatprep.subr.bf16.mxu0 %v6876_v55  ;;  %v6886_v19 = vld [vmem:[#allocation76_spill] sm:$0xff]  ;;  %v6887_v55 = vld [vmem:[#allocation77_spill] sm:$0xff] }
 0x36f   :  { %2265 = vmatpush2.bf16.msra.mxu1 %v6877_v18  ;;  %2306 = vmatpush2.bf16.msra.mxu0 %v6878_v16  ;;  %v6888_v18 = vld [vmem:[#allocation78_spill] sm:$0xff] }
 0x370   :  { %2266 = vmatprep.subr.bf16.mxu1 %v6879_v59  ;;  %2307 = vmatprep.subr.bf16.mxu0 %v6880_v29 }
 0x373   :  { %2267 = vmatpush2.bf16.msra.mxu1 %v6881_v0  ;;  %2308 = vmatpush2.bf16.msra.mxu0 %v6882_v1 }
 0x374   :  { %2268 = vmatprep.subr.bf16.mxu1 %v6883_v45  ;;  %2309 = vmatprep.subr.bf16.mxu0 %v6884_v11 }
 0x377   :  { %2269 = vmatpush2.bf16.msra.mxu1 %v6885_v17  ;;  %2310 = vmatpush2.bf16.msra.mxu0 %v6886_v19  ;;  %v6892_v19 = vld [vmem:[#allocation161_spill] sm:$0xff] }
 0x378   :  { %2320 = vmatprep.subr.bf16.mxu1 %v6887_v55  ;;  %2361 = vmatprep.subr.bf16.mxu0 %v6888_v18 }
 0x3ba   :  { %v2042_v16 = vpop.f32.mrf.mxu1  ;;  %v2083_v59 = vpop.f32.mrf.mxu0 }
 0x3bb   :  { %v2172_v45 = vadd.f32 %v2042_v16, %v6889_v53  ;;  %v2174_v11 = vadd.f32 %v2083_v59, %v6890_v21 }
 0x3bc   :  { %v2044_v20 = vpop.f32.mrf.mxu1  ;;  %v2085_v29 = vpop.f32.mrf.mxu0 }
 0x3bd   :  { %v2173_v17 = vadd.f32 %v2044_v20, %v6891_v38  ;;  %v3809_v25 = vmul.f32 -1.442695, %v2172_v45  ;;  %v2175_v47 = vadd.f32 %v2085_v29, %v6892_v19  ;;  %v3811_v55 = vmul.f32 -1.442695, %v2174_v11  ;;  %v6893_v19 = vld [vmem:[#allocation160_spill] sm:$0xff]  ;;  %v6896_v38 = vld [vmem:[#allocation187_spill] sm:$0xff] }
 0x3be   :  { %v2046_v52 = vpop.f32.mrf.mxu1  ;;  %v2087_v0 = vpop.f32.mrf.mxu0 }
 0x3bf   :  { %v3810_v37 = vmul.f32 -1.442695, %v2173_v17  ;;  %4040 = vpow2.f32 %v3809_v25  ;;  %v3812_v18 = vmul.f32 -1.442695, %v2175_v47  ;;  %v6894_v17 = vld [vmem:[#allocation186_spill] sm:$0xff] }
 0x3c0   :  { %v2047_v54 = vpop.f32.mrf.mxu1  ;;  %v2088_v1 = vpop.f32.mrf.mxu0  ;;  %4042 = vpow2.f32 %v3811_v55  ;;  %v6895_v47 = vld [vmem:[#allocation162_spill] sm:$0xff] }
 0x3c1   :  { %4044 = vpow2.f32 %v3810_v37 }
 0x3c2   :  { %4046 = vpow2.f32 %v3812_v18 }
 0x3cc   :  { %v4041_v52 = vpop.eup %4040 }
 0x3cd   :  { %v4043_v0 = vpop.eup %4042  ;;  %v2186_v1 = vadd.f32 1.0, %v4041_v52 }
 0x3ce   :  { %v4045_v54 = vpop.eup %4044  ;;  %v2198_v53 = vadd.f32 1.0, %v4043_v0 }
 0x3cf   :  { %v4047_v62 = vpop.eup %4046  ;;  %v2187_v16 = vadd.f32 1.0, %v4045_v54  ;;  %4048 = vrcp.f32 %v2186_v1 }
 0x3d0   :  { %v2199_v21 = vadd.f32 1.0, %v4047_v62  ;;  %4050 = vrcp.f32 %v2198_v53 }
 0x3d1   :  { %4052 = vrcp.f32 %v2187_v16 }
 0x3dc   :  { %v4049_v53 = vpop.eup %4048 }
 0x3fa   :  { %v2124_v20 = vpop.f32.mrf.mxu1  ;;  %v2165_v45 = vpop.f32.mrf.mxu0 }
 0x3fb   :  { %v2176_v29 = vadd.f32 %v2124_v20, %v6893_v19  ;;  %v2178_v11 = vadd.f32 %v2165_v45, %v6894_v17  ;;  %v4051_v20 = vpop.eup %4050 }
 0x3fc   :  { %v2126_v55 = vpop.f32.mrf.mxu1  ;;  %v2167_v37 = vpop.f32.mrf.mxu0 }
 0x3fd   :  { %4054 = vtanh.f32 %v2176_v29  ;;  %v3813_v18 = vmul.f32 -1.442695, %v2178_v11  ;;  %v2177_v25 = vadd.f32 %v2126_v55, %v6895_v47  ;;  %v2179_v59 = vadd.f32 %v2167_v37, %v6896_v38  ;;  %v4053_v16 = vpop.eup %4052 }
 0x3fe   :  { %4056 = vrcp.f32 %v2199_v21  ;;  %v2128_v52 = vpop.f32.mrf.mxu1  ;;  %v2169_v0 = vpop.f32.mrf.mxu0  ;;  %v2218_v29 = vmul.f32 %v4051_v20, %v5357_v51 }
 0x3ff   :  { %4058 = vpow2.f32 %v3813_v18  ;;  %v3814_v62 = vmul.f32 -1.442695, %v2179_v59 }
 0x400   :  { %4060 = vtanh.f32 %v2177_v25  ;;  %v2129_v54 = vpop.f32.mrf.mxu1  ;;  %v2170_v1 = vpop.f32.mrf.mxu0 }
 0x401   :  { %4062 = vpow2.f32 %v3814_v62 }
 0x40a   :  { %v4055_v45 = vpop.eup %4054 }
 0x40b   :  { %v4057_v19 = vpop.eup %4056  ;;  %v2220_v17 = vmul.f32 %v4055_v45, %v4049_v53  ;;  %v6899_v45 = vld [vmem:[#allocation122_spill] sm:$0xff] }
 0x40c   :  { %v4059_v11 = vpop.eup %4058  ;;  %v2219_v18 = vmul.f32 %v4057_v19, %v5361_v40  ;;  %v6897_v40 = vld [vmem:[#allocation109_spill] sm:$0xff]  ;;  %v6900_v19 = vld [vmem:[#allocation123_spill] sm:$0xff] }
 0x40d   :  { %v4061_v55 = vpop.eup %4060  ;;  %v5507_v37 = vadd.f32 %v2220_v17, %v2218_v29  ;;  %v2212_v21 = vadd.f32 1.0, %v4059_v11  ;;  %v6901_v29 = vld [vmem:[#allocation124_spill] sm:$0xff]  ;;  %v6902_v17 = vld [vmem:[#allocation125_spill] sm:$0xff]  ;;  %v6903_v11 = vld [vmem:[#allocation126_spill] sm:$0xff] }
 0x40e   :  { %v4063_v47 = vpop.eup %4062  ;;  %v2221_v25 = vmul.f32 %v4061_v55, %v4053_v16  ;;  %v6898_v16 = vld [vmem:[#allocation121_spill] sm:$0xff]  ;;  %v6904_v55 = vld [vmem:[#allocation127_spill] sm:$0xff] }
 0x40f   :  { %4064 = vtanh.f32 %v5507_v37  ;;  %v2213_v38 = vadd.f32 1.0, %v4063_v47  ;;  %v6906_v47 = vld [vmem:[#allocation129_spill] sm:$0xff] }
 0x410   :  { %4066 = vrcp.f32 %v2212_v21  ;;  %v5511_v59 = vadd.f32 %v2221_v25, %v2219_v18  ;;  %v6905_v21 = vld [vmem:[#allocation128_spill] sm:$0xff]  ;;  %v6907_v18 = vld [vmem:[#allocation130_spill] sm:$0xff]  ;;  %v6908_v25 = vld [vmem:[#allocation131_spill] sm:$0xff] }
 0x411   :  { %4068 = vrcp.f32 %v2213_v38  ;;  %v6909_v38 = vld [vmem:[#allocation132_spill] sm:$0xff] }
 0x412   :  { %4070 = vtanh.f32 %v5511_v59 }
 0x41c   :  { %v4065_v51 = vpop.eup %4064 }
 0x41d   :  { %v4067_v52 = vpop.eup %4066 }
 0x41e   :  { %v4069_v0 = vpop.eup %4068  ;;  %v2226_v54 = vmul.f32 %v4067_v52, %v4065_v51  ;;  %v6910_v51 = vld [vmem:[#allocation133_spill] sm:$0xff]  ;;  %v6911_v52 = vld [vmem:[#allocation134_spill] sm:$0xff] }
 0x41f   :  { %v4071_v62 = vpop.eup %4070 }
 0x420   :  { %v2227_v1 = vmul.f32 %v4071_v62, %v4069_v0  ;;  %v5514_v20 = vpack.c.bf16 %v2226_v54, %v2226_v54  ;;  %v6912_v0 = vld [vmem:[#allocation135_spill] sm:$0xff]  ;;  %v6913_v62 = vld [vmem:[#allocation136_spill] sm:$0xff]  ;;  %v6914_v54 = vld [vmem:[#allocation137_spill] sm:$0xff] }
 0x422   :  { %v2237_v53 = vpack.c.bf16 %v2227_v1, %v2227_v1  ;;  %v6915_v1 = vld [vmem:[#allocation138_spill] sm:$0xff] }
 0x424   :  { %2270 = vmatprep.mubr.bf16.mxu1 %v2237_v53  ;;  %2311 = vmatprep.mubr.bf16.mxu0 %v2237_v53 }
 0x425   :  { %2271 = vmatmul.mubr.bf16.vlgmr.msra.gmra.mxu1 %v5514_v20  ;;  %2312 = vmatmul.mubr.bf16.vlgmr.msra.gmra.mxu0 %v5514_v20 }
 0x426   :  { %2321 = vmatpush1.bf16.msra.mxu1 %v6698_v23  ;;  %2362 = vmatpush1.bf16.msra.mxu0 %v6699_v41 }
 0x427   :  { %2352 = vmatprep.mubr.bf16.mxu1 %v2237_v53  ;;  %2393 = vmatprep.mubr.bf16.mxu0 %v2237_v53  ;;  %v6916_v53 = vld [vmem:[#allocation139_spill] sm:$0xff] }
 0x428   :  { %2322 = vmatprep.subr.bf16.mxu1 %v6700_v26  ;;  %2363 = vmatprep.subr.bf16.mxu0 %v6701_v61 }
 0x42a   :  { %2323 = vmatpush1.bf16.msra.mxu1 %v6702_v9  ;;  %2364 = vmatpush1.bf16.msra.mxu0 %v6703_v24 }
 0x42b   :  { %2324 = vmatprep.subr.bf16.mxu1 %v6704_v56  ;;  %2365 = vmatprep.subr.bf16.mxu0 %v6705_v44 }
 0x42e   :  { %2325 = vmatpush1.bf16.msra.mxu1 %v6706_v27  ;;  %2366 = vmatpush1.bf16.msra.mxu0 %v6707_v22 }
 0x42f   :  { %2326 = vmatprep.subr.bf16.mxu1 %v6708_v33  ;;  %2367 = vmatprep.subr.bf16.mxu0 %v6709_v10 }
 0x432   :  { %2327 = vmatpush1.bf16.msra.mxu1 %v6710_v48  ;;  %2368 = vmatpush1.bf16.msra.mxu0 %v6711_v30 }
 0x433   :  { %2328 = vmatprep.subr.bf16.mxu1 %v6712_v36  ;;  %2369 = vmatprep.subr.bf16.mxu0 %v6713_v63 }
 0x436   :  { %2329 = vmatpush1.bf16.msra.mxu1 %v6714_v7  ;;  %2370 = vmatpush1.bf16.msra.mxu0 %v6715_v28 }
 0x437   :  { %2330 = vmatprep.subr.bf16.mxu1 %v6802_v49  ;;  %2371 = vmatprep.subr.bf16.mxu0 %v6803_v39 }
 0x43a   :  { %2331 = vmatpush1.bf16.msra.mxu1 %v6804_v60  ;;  %2372 = vmatpush1.bf16.msra.mxu0 %v6805_v4 }
 0x43b   :  { %2332 = vmatprep.subr.bf16.mxu1 %v6806_v3  ;;  %2373 = vmatprep.subr.bf16.mxu0 %v6807_v5 }
 0x43e   :  { %2333 = vmatpush1.bf16.msra.mxu1 %v6808_v58  ;;  %2374 = vmatpush1.bf16.msra.mxu0 %v6809_v57 }
 0x43f   :  { %2334 = vmatprep.subr.bf16.mxu1 %v6810_v6  ;;  %2375 = vmatprep.subr.bf16.mxu0 %v6811_v32 }
 0x442   :  { %2335 = vmatpush1.bf16.msra.mxu1 %v6812_v15  ;;  %2376 = vmatpush1.bf16.msra.mxu0 %v6813_v34 }
 0x443   :  { %2336 = vmatprep.subr.bf16.mxu1 %v6897_v40  ;;  %2377 = vmatprep.subr.bf16.mxu0 %v6815_v42 }
 0x446   :  { %2337 = vmatpush2.bf16.msra.mxu1 %v6816_v14  ;;  %2378 = vmatpush2.bf16.msra.mxu0 %v6817_v2 }
 0x447   :  { %2338 = vmatprep.subr.bf16.mxu1 %v6818_v50  ;;  %2379 = vmatprep.subr.bf16.mxu0 %v6819_v13 }
 0x44a   :  { %2339 = vmatpush2.bf16.msra.mxu1 %v6820_v46  ;;  %2380 = vmatpush2.bf16.msra.mxu0 %v6735_v8 }
 0x44b   :  { %2340 = vmatprep.subr.bf16.mxu1 %v6736_v43  ;;  %2381 = vmatprep.subr.bf16.mxu0 %v6737_v31 }
 0x44e   :  { %2341 = vmatpush2.bf16.msra.mxu1 %v6821_v12  ;;  %2382 = vmatpush2.bf16.msra.mxu0 %v6822_v35 }
 0x44f   :  { %2342 = vmatprep.subr.bf16.mxu1 %v6898_v16  ;;  %2383 = vmatprep.subr.bf16.mxu0 %v6899_v45 }
 0x452   :  { %2343 = vmatpush2.bf16.msra.mxu1 %v6900_v19  ;;  %2384 = vmatpush2.bf16.msra.mxu0 %v6901_v29  ;;  %v6986_v29 = vld [vmem:[#allocation153_spill] sm:$0xff] }
 0x453   :  { %2344 = vmatprep.subr.bf16.mxu1 %v6902_v17  ;;  %2385 = vmatprep.subr.bf16.mxu0 %v6903_v11  ;;  %v6984_v11 = vld [vmem:[#allocation151_spill] sm:$0xff] }
 0x454   :  { %v6985_v17 = vld [vmem:[#allocation163_spill] sm:$0xff] }
 0x456   :  { %2345 = vmatpush2.bf16.msra.mxu1 %v6904_v55  ;;  %2386 = vmatpush2.bf16.msra.mxu0 %v6905_v21 }
 0x457   :  { %2346 = vmatprep.subr.bf16.mxu1 %v6906_v47  ;;  %2387 = vmatprep.subr.bf16.mxu0 %v6907_v18  ;;  %v6917_v47 = vld [vmem:[#allocation140_spill] sm:$0xff]  ;;  %v6918_v18 = vld [vmem:[#allocation13_spill] sm:$0xff] }
 0x45a   :  { %2347 = vmatpush2.bf16.msra.mxu1 %v6908_v25  ;;  %2388 = vmatpush2.bf16.msra.mxu0 %v6909_v38  ;;  %v6919_v25 = vld [vmem:[#allocation14_spill] sm:$0xff] }
 0x45b   :  { %2348 = vmatprep.subr.bf16.mxu1 %v6910_v51  ;;  %2389 = vmatprep.subr.bf16.mxu0 %v6911_v52  ;;  %v6920_v52 = vld [vmem:[#allocation15_spill] sm:$0xff]  ;;  %v6929_v51 = vld [vmem:[#allocation24_spill] sm:$0xff] }
 0x45e   :  { %2349 = vmatpush2.bf16.msra.mxu1 %v6912_v0  ;;  %2390 = vmatpush2.bf16.msra.mxu0 %v6913_v62  ;;  %v6921_v0 = vld [vmem:[#allocation16_spill] sm:$0xff]  ;;  %v6922_v62 = vld [vmem:[#allocation17_spill] sm:$0xff] }
 0x45f   :  { %2350 = vmatprep.subr.bf16.mxu1 %v6914_v54  ;;  %2391 = vmatprep.subr.bf16.mxu0 %v6915_v1  ;;  %v6923_v54 = vld [vmem:[#allocation18_spill] sm:$0xff]  ;;  %v6924_v1 = vld [vmem:[#allocation19_spill] sm:$0xff] }
 0x462   :  { %2351 = vmatpush2.bf16.msra.mxu1 %v6916_v53  ;;  %2392 = vmatpush2.bf16.msra.mxu0 %v6917_v47  ;;  %v6925_v53 = vld [vmem:[#allocation20_spill] sm:$0xff]  ;;  %v6926_v47 = vld [vmem:[#allocation21_spill] sm:$0xff] }
 0x463   :  { %2468 = vmatprep.subr.bf16.mxu1 %v6918_v18  ;;  %2509 = vmatprep.subr.bf16.mxu0 %v6919_v25  ;;  %v6927_v18 = vld [vmem:[#allocation22_spill] sm:$0xff]  ;;  %v6928_v25 = vld [vmem:[#allocation23_spill] sm:$0xff] }
 0x465   :  { %2353 = vmatmul.mubr.bf16.vlgmr.msra.gmra.mxu1 %v5514_v20  ;;  %2394 = vmatmul.mubr.bf16.vlgmr.msra.gmra.mxu0 %v5514_v20  ;;  %v6930_v20 = vld [vmem:[#allocation25_spill] sm:$0xff] }
 0x466   :  { %2469 = vmatpush1.bf16.msra.mxu1 %v6920_v52  ;;  %2510 = vmatpush1.bf16.msra.mxu0 %v6921_v0  ;;  %v6931_v52 = vld [vmem:[#allocation26_spill] sm:$0xff]  ;;  %v6932_v0 = vld [vmem:[#allocation27_spill] sm:$0xff] }
 0x467   :  { %2470 = vmatprep.subr.bf16.mxu1 %v6922_v62  ;;  %2511 = vmatprep.subr.bf16.mxu0 %v6923_v54  ;;  %v6933_v62 = vld [vmem:[#allocation28_spill] sm:$0xff]  ;;  %v6934_v54 = vld [vmem:[#allocation29_spill] sm:$0xff] }
 0x46a   :  { %2471 = vmatpush1.bf16.msra.mxu1 %v6924_v1  ;;  %2512 = vmatpush1.bf16.msra.mxu0 %v6925_v53  ;;  %v6935_v1 = vld [vmem:[#allocation30_spill] sm:$0xff]  ;;  %v6936_v53 = vld [vmem:[#allocation31_spill] sm:$0xff] }
 0x46b   :  { %2472 = vmatprep.subr.bf16.mxu1 %v6926_v47  ;;  %2513 = vmatprep.subr.bf16.mxu0 %v6927_v18  ;;  %v6937_v47 = vld [vmem:[#allocation32_spill] sm:$0xff]  ;;  %v6938_v18 = vld [vmem:[#allocation33_spill] sm:$0xff] }
 0x46e   :  { %2473 = vmatpush1.bf16.msra.mxu1 %v6928_v25  ;;  %2514 = vmatpush1.bf16.msra.mxu0 %v6929_v51  ;;  %v6939_v25 = vld [vmem:[#allocation34_spill] sm:$0xff]  ;;  %v6940_v51 = vld [vmem:[#allocation35_spill] sm:$0xff] }
 0x46f   :  { %2474 = vmatprep.subr.bf16.mxu1 %v6930_v20  ;;  %2515 = vmatprep.subr.bf16.mxu0 %v6931_v52  ;;  %v6941_v20 = vld [vmem:[#allocation36_spill] sm:$0xff]  ;;  %v6942_v52 = vld [vmem:[#allocation37_spill] sm:$0xff] }
 0x472   :  { %2475 = vmatpush1.bf16.msra.mxu1 %v6932_v0  ;;  %2516 = vmatpush1.bf16.msra.mxu0 %v6933_v62  ;;  %v6943_v0 = vld [vmem:[#allocation38_spill] sm:$0xff]  ;;  %v6944_v62 = vld [vmem:[#allocation39_spill] sm:$0xff] }
 0x473   :  { %2476 = vmatprep.subr.bf16.mxu1 %v6934_v54  ;;  %2517 = vmatprep.subr.bf16.mxu0 %v6935_v1  ;;  %v6945_v54 = vld [vmem:[#allocation40_spill] sm:$0xff]  ;;  %v6946_v1 = vld [vmem:[#allocation41_spill] sm:$0xff] }
 0x476   :  { %2477 = vmatpush1.bf16.msra.mxu1 %v6936_v53  ;;  %2518 = vmatpush1.bf16.msra.mxu0 %v6937_v47  ;;  %v6947_v53 = vld [vmem:[#allocation42_spill] sm:$0xff]  ;;  %v6948_v47 = vld [vmem:[#allocation43_spill] sm:$0xff] }
 0x477   :  { %2478 = vmatprep.subr.bf16.mxu1 %v6938_v18  ;;  %2519 = vmatprep.subr.bf16.mxu0 %v6939_v25  ;;  %v6949_v18 = vld [vmem:[#allocation44_spill] sm:$0xff]  ;;  %v6950_v25 = vld [vmem:[#allocation45_spill] sm:$0xff] }
 0x47a   :  { %2479 = vmatpush1.bf16.msra.mxu1 %v6940_v51  ;;  %2520 = vmatpush1.bf16.msra.mxu0 %v6941_v20  ;;  %v6951_v51 = vld [vmem:[#allocation46_spill] sm:$0xff]  ;;  %v6952_v20 = vld [vmem:[#allocation47_spill] sm:$0xff] }
 0x47b   :  { %2480 = vmatprep.subr.bf16.mxu1 %v6942_v52  ;;  %2521 = vmatprep.subr.bf16.mxu0 %v6943_v0  ;;  %v6953_v52 = vld [vmem:[#allocation48_spill] sm:$0xff]  ;;  %v6954_v0 = vld [vmem:[#allocation49_spill] sm:$0xff] }
 0x47e   :  { %2481 = vmatpush1.bf16.msra.mxu1 %v6944_v62  ;;  %2522 = vmatpush1.bf16.msra.mxu0 %v6945_v54  ;;  %v6955_v62 = vld [vmem:[#allocation50_spill] sm:$0xff]  ;;  %v6956_v54 = vld [vmem:[#allocation51_spill] sm:$0xff] }
 0x47f   :  { %2482 = vmatprep.subr.bf16.mxu1 %v6946_v1  ;;  %2523 = vmatprep.subr.bf16.mxu0 %v6947_v53  ;;  %v6957_v1 = vld [vmem:[#allocation52_spill] sm:$0xff]  ;;  %v6958_v53 = vld [vmem:[#allocation53_spill] sm:$0xff] }
 0x482   :  { %2483 = vmatpush1.bf16.msra.mxu1 %v6948_v47  ;;  %2524 = vmatpush1.bf16.msra.mxu0 %v6949_v18  ;;  %v6959_v47 = vld [vmem:[#allocation54_spill] sm:$0xff]  ;;  %v6960_v18 = vld [vmem:[#allocation55_spill] sm:$0xff] }
 0x483   :  { %2484 = vmatprep.subr.bf16.mxu1 %v6950_v25  ;;  %2525 = vmatprep.subr.bf16.mxu0 %v6951_v51  ;;  %v6961_v25 = vld [vmem:[#allocation56_spill] sm:$0xff]  ;;  %v6962_v51 = vld [vmem:[#allocation57_spill] sm:$0xff] }
 0x486   :  { %2485 = vmatpush2.bf16.msra.mxu1 %v6952_v20  ;;  %2526 = vmatpush2.bf16.msra.mxu0 %v6953_v52  ;;  %v6963_v20 = vld [vmem:[#allocation58_spill] sm:$0xff]  ;;  %v6964_v52 = vld [vmem:[#allocation59_spill] sm:$0xff] }
 0x487   :  { %2486 = vmatprep.subr.bf16.mxu1 %v6954_v0  ;;  %2527 = vmatprep.subr.bf16.mxu0 %v6955_v62  ;;  %v6965_v0 = vld [vmem:[#allocation60_spill] sm:$0xff]  ;;  %v6966_v62 = vld [vmem:[#allocation61_spill] sm:$0xff] }
 0x48a   :  { %2487 = vmatpush2.bf16.msra.mxu1 %v6956_v54  ;;  %2528 = vmatpush2.bf16.msra.mxu0 %v6957_v1  ;;  %v6967_v54 = vld [vmem:[#allocation62_spill] sm:$0xff]  ;;  %v6968_v1 = vld [vmem:[#allocation63_spill] sm:$0xff] }
 0x48b   :  { %2488 = vmatprep.subr.bf16.mxu1 %v6958_v53  ;;  %2529 = vmatprep.subr.bf16.mxu0 %v6959_v47  ;;  %v6969_v53 = vld [vmem:[#allocation64_spill] sm:$0xff]  ;;  %v6970_v47 = vld [vmem:[#allocation65_spill] sm:$0xff] }
 0x48e   :  { %2489 = vmatpush2.bf16.msra.mxu1 %v6960_v18  ;;  %2530 = vmatpush2.bf16.msra.mxu0 %v6961_v25  ;;  %v6971_v18 = vld [vmem:[#allocation66_spill] sm:$0xff]  ;;  %v6972_v25 = vld [vmem:[#allocation67_spill] sm:$0xff] }
 0x48f   :  { %2490 = vmatprep.subr.bf16.mxu1 %v6962_v51  ;;  %2531 = vmatprep.subr.bf16.mxu0 %v6963_v20  ;;  %v6973_v51 = vld [vmem:[#allocation68_spill] sm:$0xff]  ;;  %v6974_v20 = vld [vmem:[#allocation69_spill] sm:$0xff] }
 0x492   :  { %2491 = vmatpush2.bf16.msra.mxu1 %v6964_v52  ;;  %2532 = vmatpush2.bf16.msra.mxu0 %v6965_v0  ;;  %v6975_v52 = vld [vmem:[#allocation70_spill] sm:$0xff]  ;;  %v6976_v0 = vld [vmem:[#allocation71_spill] sm:$0xff] }
 0x493   :  { %2492 = vmatprep.subr.bf16.mxu1 %v6966_v62  ;;  %2533 = vmatprep.subr.bf16.mxu0 %v6967_v54  ;;  %v6977_v62 = vld [vmem:[#allocation72_spill] sm:$0xff]  ;;  %v6978_v54 = vld [vmem:[#allocation73_spill] sm:$0xff] }
 0x496   :  { %2493 = vmatpush2.bf16.msra.mxu1 %v6968_v1  ;;  %2534 = vmatpush2.bf16.msra.mxu0 %v6969_v53  ;;  %v6979_v1 = vld [vmem:[#allocation74_spill] sm:$0xff]  ;;  %v6980_v53 = vld [vmem:[#allocation75_spill] sm:$0xff] }
 0x497   :  { %2494 = vmatprep.subr.bf16.mxu1 %v6970_v47  ;;  %2535 = vmatprep.subr.bf16.mxu0 %v6971_v18  ;;  %v6981_v47 = vld [vmem:[#allocation76_spill] sm:$0xff]  ;;  %v6982_v18 = vld [vmem:[#allocation77_spill] sm:$0xff] }
 0x49a   :  { %2495 = vmatpush2.bf16.msra.mxu1 %v6972_v25  ;;  %2536 = vmatpush2.bf16.msra.mxu0 %v6973_v51  ;;  %v6983_v25 = vld [vmem:[#allocation78_spill] sm:$0xff] }
 0x49b   :  { %2496 = vmatprep.subr.bf16.mxu1 %v6974_v20  ;;  %2537 = vmatprep.subr.bf16.mxu0 %v6975_v52 }
 0x49e   :  { %2497 = vmatpush2.bf16.msra.mxu1 %v6976_v0  ;;  %2538 = vmatpush2.bf16.msra.mxu0 %v6977_v62 }
 0x49f   :  { %2498 = vmatprep.subr.bf16.mxu1 %v6978_v54  ;;  %2539 = vmatprep.subr.bf16.mxu0 %v6979_v1 }
 0x4a2   :  { %2499 = vmatpush2.bf16.msra.mxu1 %v6980_v53  ;;  %2540 = vmatpush2.bf16.msra.mxu0 %v6981_v47  ;;  %v6987_v47 = vld [vmem:[#allocation165_spill] sm:$0xff] }
 0x4a3   :  { %2550 = vmatprep.subr.bf16.mxu1 %v6982_v18  ;;  %2591 = vmatprep.subr.bf16.mxu0 %v6983_v25 }
 0x4e5   :  { %v2272_v51 = vpop.f32.mrf.mxu1  ;;  %v2313_v20 = vpop.f32.mrf.mxu0 }
 0x4e6   :  { %v2402_v54 = vadd.f32 %v2272_v51, %v6984_v11  ;;  %v2404_v1 = vadd.f32 %v2313_v20, %v6985_v17 }
 0x4e7   :  { %v2274_v38 = vpop.f32.mrf.mxu1  ;;  %v2315_v52 = vpop.f32.mrf.mxu0 }
 0x4e8   :  { %v2403_v53 = vadd.f32 %v2274_v38, %v6986_v29  ;;  %v3815_v19 = vmul.f32 -1.442695, %v2402_v54  ;;  %v2405_v45 = vadd.f32 %v2315_v52, %v6987_v47  ;;  %v3817_v18 = vmul.f32 -1.442695, %v2404_v1  ;;  %v6988_v47 = vld [vmem:[#allocation164_spill] sm:$0xff] }
 0x4e9   :  { %v2276_v21 = vpop.f32.mrf.mxu1  ;;  %v2317_v0 = vpop.f32.mrf.mxu0  ;;  %v6989_v54 = vld [vmem:[#allocation188_spill] sm:$0xff] }
 0x4ea   :  { %v3816_v16 = vmul.f32 -1.442695, %v2403_v53  ;;  %4072 = vpow2.f32 %v3815_v19  ;;  %v3818_v25 = vmul.f32 -1.442695, %v2405_v45  ;;  %v6991_v53 = vld [vmem:[#allocation189_spill] sm:$0xff] }
 0x4eb   :  { %v2277_v55 = vpop.f32.mrf.mxu1  ;;  %v2318_v62 = vpop.f32.mrf.mxu0  ;;  %4074 = vpow2.f32 %v3817_v18 }
 0x4ec   :  { %4076 = vpow2.f32 %v3816_v16 }
 0x4ed   :  { %4078 = vpow2.f32 %v3818_v25  ;;  %v6990_v25 = vld [vmem:[#allocation166_spill] sm:$0xff] }
 0x4f7   :  { %v4073_v21 = vpop.eup %4072 }
 0x4f8   :  { %v4075_v0 = vpop.eup %4074  ;;  %v2416_v62 = vadd.f32 1.0, %v4073_v21 }
 0x4f9   :  { %v4077_v55 = vpop.eup %4076  ;;  %v2428_v11 = vadd.f32 1.0, %v4075_v0 }
 0x4fa   :  { %v4079_v35 = vpop.eup %4078  ;;  %v2417_v51 = vadd.f32 1.0, %v4077_v55  ;;  %4080 = vrcp.f32 %v2416_v62 }
 0x4fb   :  { %v2429_v17 = vadd.f32 1.0, %v4079_v35  ;;  %4082 = vrcp.f32 %v2428_v11 }
 0x4fc   :  { %4084 = vrcp.f32 %v2417_v51 }
 0x507   :  { %v4081_v11 = vpop.eup %4080 }
 0x525   :  { %v2354_v29 = vpop.f32.mrf.mxu1  ;;  %v2395_v38 = vpop.f32.mrf.mxu0 }
 0x526   :  { %v2406_v52 = vadd.f32 %v2354_v29, %v6988_v47  ;;  %v2408_v19 = vadd.f32 %v2395_v38, %v6989_v54  ;;  %v4083_v29 = vpop.eup %4082 }
 0x527   :  { %v2356_v45 = vpop.f32.mrf.mxu1  ;;  %v2397_v16 = vpop.f32.mrf.mxu0 }
 0x528   :  { %4086 = vtanh.f32 %v2406_v52  ;;  %v3819_v18 = vmul.f32 -1.442695, %v2408_v19  ;;  %v2407_v1 = vadd.f32 %v2356_v45, %v6990_v25  ;;  %v2409_v20 = vadd.f32 %v2397_v16, %v6991_v53  ;;  %v4085_v51 = vpop.eup %4084 }
 0x529   :  { %4088 = vrcp.f32 %v2429_v17  ;;  %v2358_v21 = vpop.f32.mrf.mxu1  ;;  %v2399_v0 = vpop.f32.mrf.mxu0  ;;  %v2448_v52 = vmul.f32 %v4083_v29, %v5507_v37 }
 0x52a   :  { %4090 = vpow2.f32 %v3819_v18  ;;  %v3820_v35 = vmul.f32 -1.442695, %v2409_v20 }
 0x52b   :  { %4092 = vtanh.f32 %v2407_v1  ;;  %v2359_v55 = vpop.f32.mrf.mxu1  ;;  %v2400_v62 = vpop.f32.mrf.mxu0 }
 0x52c   :  { %4094 = vpow2.f32 %v3820_v35 }
 0x535   :  { %v4087_v38 = vpop.eup %4086 }
 0x536   :  { %v4089_v47 = vpop.eup %4088  ;;  %v2450_v54 = vmul.f32 %v4087_v38, %v4081_v11  ;;  %v6994_v38 = vld [vmem:[#allocation122_spill] sm:$0xff] }
 0x537   :  { %v4091_v19 = vpop.eup %4090  ;;  %v2449_v18 = vmul.f32 %v4089_v47, %v5511_v59  ;;  %v6992_v59 = vld [vmem:[#allocation120_spill] sm:$0xff]  ;;  %v6995_v47 = vld [vmem:[#allocation123_spill] sm:$0xff] }
 0x538   :  { %v4093_v45 = vpop.eup %4092  ;;  %v5657_v16 = vadd.f32 %v2450_v54, %v2448_v52  ;;  %v2442_v17 = vadd.f32 1.0, %v4091_v19  ;;  %v6996_v52 = vld [vmem:[#allocation124_spill] sm:$0xff]  ;;  %v6997_v54 = vld [vmem:[#allocation125_spill] sm:$0xff]  ;;  %v6998_v19 = vld [vmem:[#allocation126_spill] sm:$0xff] }
 0x539   :  { %v4095_v25 = vpop.eup %4094  ;;  %v2451_v1 = vmul.f32 %v4093_v45, %v4085_v51  ;;  %v6993_v51 = vld [vmem:[#allocation121_spill] sm:$0xff]  ;;  %v6999_v45 = vld [vmem:[#allocation127_spill] sm:$0xff] }
 0x53a   :  { %4096 = vtanh.f32 %v5657_v16  ;;  %v2443_v53 = vadd.f32 1.0, %v4095_v25  ;;  %v7001_v25 = vld [vmem:[#allocation129_spill] sm:$0xff] }
 0x53b   :  { %4098 = vrcp.f32 %v2442_v17  ;;  %v5661_v20 = vadd.f32 %v2451_v1, %v2449_v18  ;;  %v7000_v17 = vld [vmem:[#allocation128_spill] sm:$0xff]  ;;  %v7002_v18 = vld [vmem:[#allocation130_spill] sm:$0xff]  ;;  %v7003_v1 = vld [vmem:[#allocation131_spill] sm:$0xff] }
 0x53c   :  { %4100 = vrcp.f32 %v2443_v53  ;;  %v7004_v53 = vld [vmem:[#allocation132_spill] sm:$0xff] }
 0x53d   :  { %4102 = vtanh.f32 %v5661_v20 }
 0x547   :  { %v4097_v37 = vpop.eup %4096 }
 0x548   :  { %v4099_v21 = vpop.eup %4098 }
 0x549   :  { %v4101_v0 = vpop.eup %4100  ;;  %v2456_v55 = vmul.f32 %v4099_v21, %v4097_v37  ;;  %v7005_v37 = vld [vmem:[#allocation133_spill] sm:$0xff]  ;;  %v7006_v21 = vld [vmem:[#allocation134_spill] sm:$0xff] }
 0x54a   :  { %v4103_v35 = vpop.eup %4102 }
 0x54b   :  { %v2457_v62 = vmul.f32 %v4103_v35, %v4101_v0  ;;  %v5664_v29 = vpack.c.bf16 %v2456_v55, %v2456_v55  ;;  %v7007_v0 = vld [vmem:[#allocation135_spill] sm:$0xff]  ;;  %v7008_v35 = vld [vmem:[#allocation136_spill] sm:$0xff]  ;;  %v7009_v55 = vld [vmem:[#allocation137_spill] sm:$0xff] }
 0x54d   :  { %v2467_v11 = vpack.c.bf16 %v2457_v62, %v2457_v62  ;;  %v7010_v62 = vld [vmem:[#allocation138_spill] sm:$0xff] }
 0x54f   :  { %2500 = vmatprep.mubr.bf16.mxu1 %v2467_v11  ;;  %2541 = vmatprep.mubr.bf16.mxu0 %v2467_v11 }
 0x550   :  { %2501 = vmatmul.mubr.bf16.vlgmr.msra.gmra.mxu1 %v5664_v29  ;;  %2542 = vmatmul.mubr.bf16.vlgmr.msra.gmra.mxu0 %v5664_v29 }
 0x551   :  { %2551 = vmatpush1.bf16.msra.mxu1 %v6698_v23  ;;  %2592 = vmatpush1.bf16.msra.mxu0 %v6699_v41 }
 0x552   :  { %2582 = vmatprep.mubr.bf16.mxu1 %v2467_v11  ;;  %2623 = vmatprep.mubr.bf16.mxu0 %v2467_v11  ;;  %v7011_v11 = vld [vmem:[#allocation139_spill] sm:$0xff] }
 0x553   :  { %2552 = vmatprep.subr.bf16.mxu1 %v6700_v26  ;;  %2593 = vmatprep.subr.bf16.mxu0 %v6701_v61 }
 0x555   :  { %2553 = vmatpush1.bf16.msra.mxu1 %v6702_v9  ;;  %2594 = vmatpush1.bf16.msra.mxu0 %v6703_v24 }
 0x556   :  { %2554 = vmatprep.subr.bf16.mxu1 %v6704_v56  ;;  %2595 = vmatprep.subr.bf16.mxu0 %v6705_v44 }
 0x559   :  { %2555 = vmatpush1.bf16.msra.mxu1 %v6706_v27  ;;  %2596 = vmatpush1.bf16.msra.mxu0 %v6707_v22 }
 0x55a   :  { %2556 = vmatprep.subr.bf16.mxu1 %v6708_v33  ;;  %2597 = vmatprep.subr.bf16.mxu0 %v6709_v10 }
 0x55d   :  { %2557 = vmatpush1.bf16.msra.mxu1 %v6710_v48  ;;  %2598 = vmatpush1.bf16.msra.mxu0 %v6711_v30 }
 0x55e   :  { %2558 = vmatprep.subr.bf16.mxu1 %v6712_v36  ;;  %2599 = vmatprep.subr.bf16.mxu0 %v6713_v63 }
 0x561   :  { %2559 = vmatpush1.bf16.msra.mxu1 %v6714_v7  ;;  %2600 = vmatpush1.bf16.msra.mxu0 %v6715_v28 }
 0x562   :  { %2560 = vmatprep.subr.bf16.mxu1 %v6802_v49  ;;  %2601 = vmatprep.subr.bf16.mxu0 %v6803_v39 }
 0x565   :  { %2561 = vmatpush1.bf16.msra.mxu1 %v6804_v60  ;;  %2602 = vmatpush1.bf16.msra.mxu0 %v6805_v4 }
 0x566   :  { %2562 = vmatprep.subr.bf16.mxu1 %v6806_v3  ;;  %2603 = vmatprep.subr.bf16.mxu0 %v6807_v5 }
 0x569   :  { %2563 = vmatpush1.bf16.msra.mxu1 %v6808_v58  ;;  %2604 = vmatpush1.bf16.msra.mxu0 %v6809_v57 }
 0x56a   :  { %2564 = vmatprep.subr.bf16.mxu1 %v6810_v6  ;;  %2605 = vmatprep.subr.bf16.mxu0 %v6811_v32 }
 0x56d   :  { %2565 = vmatpush1.bf16.msra.mxu1 %v6812_v15  ;;  %2606 = vmatpush1.bf16.msra.mxu0 %v6813_v34 }
 0x56e   :  { %2566 = vmatprep.subr.bf16.mxu1 %v6897_v40  ;;  %2607 = vmatprep.subr.bf16.mxu0 %v6815_v42 }
 0x571   :  { %2567 = vmatpush2.bf16.msra.mxu1 %v6816_v14  ;;  %2608 = vmatpush2.bf16.msra.mxu0 %v6817_v2 }
 0x572   :  { %2568 = vmatprep.subr.bf16.mxu1 %v6818_v50  ;;  %2609 = vmatprep.subr.bf16.mxu0 %v6819_v13 }
 0x575   :  { %2569 = vmatpush2.bf16.msra.mxu1 %v6820_v46  ;;  %2610 = vmatpush2.bf16.msra.mxu0 %v6735_v8 }
 0x576   :  { %2570 = vmatprep.subr.bf16.mxu1 %v6736_v43  ;;  %2611 = vmatprep.subr.bf16.mxu0 %v6737_v31 }
 0x579   :  { %2571 = vmatpush2.bf16.msra.mxu1 %v6821_v12  ;;  %2612 = vmatpush2.bf16.msra.mxu0 %v6992_v59 }
 0x57a   :  { %2572 = vmatprep.subr.bf16.mxu1 %v6993_v51  ;;  %2613 = vmatprep.subr.bf16.mxu0 %v6994_v38 }
 0x57d   :  { %2573 = vmatpush2.bf16.msra.mxu1 %v6995_v47  ;;  %2614 = vmatpush2.bf16.msra.mxu0 %v6996_v52  ;;  %v7081_v52 = vld [vmem:[#allocation142_spill] sm:$0xff] }
 0x57e   :  { %2574 = vmatprep.subr.bf16.mxu1 %v6997_v54  ;;  %2615 = vmatprep.subr.bf16.mxu0 %v6998_v19  ;;  %v7079_v19 = vld [vmem:[#allocation141_spill] sm:$0xff]  ;;  %v7080_v54 = vld [vmem:[#allocation167_spill] sm:$0xff] }
 0x581   :  { %2575 = vmatpush2.bf16.msra.mxu1 %v6999_v45  ;;  %2616 = vmatpush2.bf16.msra.mxu0 %v7000_v17 }
 0x582   :  { %2576 = vmatprep.subr.bf16.mxu1 %v7001_v25  ;;  %2617 = vmatprep.subr.bf16.mxu0 %v7002_v18  ;;  %v7012_v25 = vld [vmem:[#allocation140_spill] sm:$0xff]  ;;  %v7013_v18 = vld [vmem:[#allocation13_spill] sm:$0xff] }
 0x585   :  { %2577 = vmatpush2.bf16.msra.mxu1 %v7003_v1  ;;  %2618 = vmatpush2.bf16.msra.mxu0 %v7004_v53  ;;  %v7014_v1 = vld [vmem:[#allocation14_spill] sm:$0xff] }
 0x586   :  { %2578 = vmatprep.subr.bf16.mxu1 %v7005_v37  ;;  %2619 = vmatprep.subr.bf16.mxu0 %v7006_v21  ;;  %v7015_v21 = vld [vmem:[#allocation15_spill] sm:$0xff]  ;;  %v7024_v37 = vld [vmem:[#allocation24_spill] sm:$0xff] }
 0x589   :  { %2579 = vmatpush2.bf16.msra.mxu1 %v7007_v0  ;;  %2620 = vmatpush2.bf16.msra.mxu0 %v7008_v35  ;;  %v7016_v0 = vld [vmem:[#allocation16_spill] sm:$0xff]  ;;  %v7017_v35 = vld [vmem:[#allocation17_spill] sm:$0xff] }
 0x58a   :  { %2580 = vmatprep.subr.bf16.mxu1 %v7009_v55  ;;  %2621 = vmatprep.subr.bf16.mxu0 %v7010_v62  ;;  %v7018_v55 = vld [vmem:[#allocation18_spill] sm:$0xff]  ;;  %v7019_v62 = vld [vmem:[#allocation19_spill] sm:$0xff] }
 0x58d   :  { %2581 = vmatpush2.bf16.msra.mxu1 %v7011_v11  ;;  %2622 = vmatpush2.bf16.msra.mxu0 %v7012_v25  ;;  %v7020_v11 = vld [vmem:[#allocation20_spill] sm:$0xff]  ;;  %v7021_v25 = vld [vmem:[#allocation21_spill] sm:$0xff] }
 0x58e   :  { %2698 = vmatprep.subr.bf16.mxu1 %v7013_v18  ;;  %2739 = vmatprep.subr.bf16.mxu0 %v7014_v1  ;;  %v7022_v18 = vld [vmem:[#allocation22_spill] sm:$0xff]  ;;  %v7023_v1 = vld [vmem:[#allocation23_spill] sm:$0xff] }
 0x590   :  { %2583 = vmatmul.mubr.bf16.vlgmr.msra.gmra.mxu1 %v5664_v29  ;;  %2624 = vmatmul.mubr.bf16.vlgmr.msra.gmra.mxu0 %v5664_v29  ;;  %v7025_v29 = vld [vmem:[#allocation25_spill] sm:$0xff] }
 0x591   :  { %2699 = vmatpush1.bf16.msra.mxu1 %v7015_v21  ;;  %2740 = vmatpush1.bf16.msra.mxu0 %v7016_v0  ;;  %v7026_v21 = vld [vmem:[#allocation26_spill] sm:$0xff]  ;;  %v7027_v0 = vld [vmem:[#allocation27_spill] sm:$0xff] }
 0x592   :  { %2700 = vmatprep.subr.bf16.mxu1 %v7017_v35  ;;  %2741 = vmatprep.subr.bf16.mxu0 %v7018_v55  ;;  %v7028_v35 = vld [vmem:[#allocation28_spill] sm:$0xff]  ;;  %v7029_v55 = vld [vmem:[#allocation29_spill] sm:$0xff] }
 0x595   :  { %2701 = vmatpush1.bf16.msra.mxu1 %v7019_v62  ;;  %2742 = vmatpush1.bf16.msra.mxu0 %v7020_v11  ;;  %v7030_v62 = vld [vmem:[#allocation30_spill] sm:$0xff]  ;;  %v7031_v11 = vld [vmem:[#allocation31_spill] sm:$0xff] }
 0x596   :  { %2702 = vmatprep.subr.bf16.mxu1 %v7021_v25  ;;  %2743 = vmatprep.subr.bf16.mxu0 %v7022_v18  ;;  %v7032_v25 = vld [vmem:[#allocation32_spill] sm:$0xff]  ;;  %v7033_v18 = vld [vmem:[#allocation33_spill] sm:$0xff] }
 0x599   :  { %2703 = vmatpush1.bf16.msra.mxu1 %v7023_v1  ;;  %2744 = vmatpush1.bf16.msra.mxu0 %v7024_v37  ;;  %v7034_v1 = vld [vmem:[#allocation34_spill] sm:$0xff]  ;;  %v7035_v37 = vld [vmem:[#allocation35_spill] sm:$0xff] }
 0x59a   :  { %2704 = vmatprep.subr.bf16.mxu1 %v7025_v29  ;;  %2745 = vmatprep.subr.bf16.mxu0 %v7026_v21  ;;  %v7036_v29 = vld [vmem:[#allocation36_spill] sm:$0xff]  ;;  %v7037_v21 = vld [vmem:[#allocation37_spill] sm:$0xff] }
 0x59d   :  { %2705 = vmatpush1.bf16.msra.mxu1 %v7027_v0  ;;  %2746 = vmatpush1.bf16.msra.mxu0 %v7028_v35  ;;  %v7038_v0 = vld [vmem:[#allocation38_spill] sm:$0xff]  ;;  %v7039_v35 = vld [vmem:[#allocation39_spill] sm:$0xff] }
 0x59e   :  { %2706 = vmatprep.subr.bf16.mxu1 %v7029_v55  ;;  %2747 = vmatprep.subr.bf16.mxu0 %v7030_v62  ;;  %v7040_v55 = vld [vmem:[#allocation40_spill] sm:$0xff]  ;;  %v7041_v62 = vld [vmem:[#allocation41_spill] sm:$0xff] }
 0x5a1   :  { %2707 = vmatpush1.bf16.msra.mxu1 %v7031_v11  ;;  %2748 = vmatpush1.bf16.msra.mxu0 %v7032_v25  ;;  %v7042_v11 = vld [vmem:[#allocation42_spill] sm:$0xff]  ;;  %v7043_v25 = vld [vmem:[#allocation43_spill] sm:$0xff] }
 0x5a2   :  { %2708 = vmatprep.subr.bf16.mxu1 %v7033_v18  ;;  %2749 = vmatprep.subr.bf16.mxu0 %v7034_v1  ;;  %v7044_v18 = vld [vmem:[#allocation44_spill] sm:$0xff]  ;;  %v7045_v1 = vld [vmem:[#allocation45_spill] sm:$0xff] }
 0x5a5   :  { %2709 = vmatpush1.bf16.msra.mxu1 %v7035_v37  ;;  %2750 = vmatpush1.bf16.msra.mxu0 %v7036_v29  ;;  %v7046_v37 = vld [vmem:[#allocation46_spill] sm:$0xff]  ;;  %v7047_v29 = vld [vmem:[#allocation47_spill] sm:$0xff] }
 0x5a6   :  { %2710 = vmatprep.subr.bf16.mxu1 %v7037_v21  ;;  %2751 = vmatprep.subr.bf16.mxu0 %v7038_v0  ;;  %v7048_v21 = vld [vmem:[#allocation48_spill] sm:$0xff]  ;;  %v7049_v0 = vld [vmem:[#allocation49_spill] sm:$0xff] }
 0x5a9   :  { %2711 = vmatpush1.bf16.msra.mxu1 %v7039_v35  ;;  %2752 = vmatpush1.bf16.msra.mxu0 %v7040_v55  ;;  %v7050_v35 = vld [vmem:[#allocation50_spill] sm:$0xff]  ;;  %v7051_v55 = vld [vmem:[#allocation51_spill] sm:$0xff] }
 0x5aa   :  { %2712 = vmatprep.subr.bf16.mxu1 %v7041_v62  ;;  %2753 = vmatprep.subr.bf16.mxu0 %v7042_v11  ;;  %v7052_v62 = vld [vmem:[#allocation52_spill] sm:$0xff]  ;;  %v7053_v11 = vld [vmem:[#allocation53_spill] sm:$0xff] }
 0x5ad   :  { %2713 = vmatpush1.bf16.msra.mxu1 %v7043_v25  ;;  %2754 = vmatpush1.bf16.msra.mxu0 %v7044_v18  ;;  %v7054_v25 = vld [vmem:[#allocation54_spill] sm:$0xff]  ;;  %v7055_v18 = vld [vmem:[#allocation55_spill] sm:$0xff] }
 0x5ae   :  { %2714 = vmatprep.subr.bf16.mxu1 %v7045_v1  ;;  %2755 = vmatprep.subr.bf16.mxu0 %v7046_v37  ;;  %v7056_v1 = vld [vmem:[#allocation56_spill] sm:$0xff]  ;;  %v7057_v37 = vld [vmem:[#allocation57_spill] sm:$0xff] }
 0x5b1   :  { %2715 = vmatpush2.bf16.msra.mxu1 %v7047_v29  ;;  %2756 = vmatpush2.bf16.msra.mxu0 %v7048_v21  ;;  %v7058_v29 = vld [vmem:[#allocation58_spill] sm:$0xff]  ;;  %v7059_v21 = vld [vmem:[#allocation59_spill] sm:$0xff] }
 0x5b2   :  { %2716 = vmatprep.subr.bf16.mxu1 %v7049_v0  ;;  %2757 = vmatprep.subr.bf16.mxu0 %v7050_v35  ;;  %v7060_v0 = vld [vmem:[#allocation60_spill] sm:$0xff]  ;;  %v7061_v35 = vld [vmem:[#allocation61_spill] sm:$0xff] }
 0x5b5   :  { %2717 = vmatpush2.bf16.msra.mxu1 %v7051_v55  ;;  %2758 = vmatpush2.bf16.msra.mxu0 %v7052_v62  ;;  %v7062_v55 = vld [vmem:[#allocation62_spill] sm:$0xff]  ;;  %v7063_v62 = vld [vmem:[#allocation63_spill] sm:$0xff] }
 0x5b6   :  { %2718 = vmatprep.subr.bf16.mxu1 %v7053_v11  ;;  %2759 = vmatprep.subr.bf16.mxu0 %v7054_v25  ;;  %v7064_v11 = vld [vmem:[#allocation64_spill] sm:$0xff]  ;;  %v7065_v25 = vld [vmem:[#allocation65_spill] sm:$0xff] }
 0x5b9   :  { %2719 = vmatpush2.bf16.msra.mxu1 %v7055_v18  ;;  %2760 = vmatpush2.bf16.msra.mxu0 %v7056_v1  ;;  %v7066_v18 = vld [vmem:[#allocation66_spill] sm:$0xff]  ;;  %v7067_v1 = vld [vmem:[#allocation67_spill] sm:$0xff] }
 0x5ba   :  { %2720 = vmatprep.subr.bf16.mxu1 %v7057_v37  ;;  %2761 = vmatprep.subr.bf16.mxu0 %v7058_v29  ;;  %v7068_v37 = vld [vmem:[#allocation68_spill] sm:$0xff]  ;;  %v7069_v29 = vld [vmem:[#allocation69_spill] sm:$0xff] }
 0x5bd   :  { %2721 = vmatpush2.bf16.msra.mxu1 %v7059_v21  ;;  %2762 = vmatpush2.bf16.msra.mxu0 %v7060_v0  ;;  %v7070_v21 = vld [vmem:[#allocation70_spill] sm:$0xff]  ;;  %v7071_v0 = vld [vmem:[#allocation71_spill] sm:$0xff] }
 0x5be   :  { %2722 = vmatprep.subr.bf16.mxu1 %v7061_v35  ;;  %2763 = vmatprep.subr.bf16.mxu0 %v7062_v55  ;;  %v7072_v35 = vld [vmem:[#allocation72_spill] sm:$0xff]  ;;  %v7073_v55 = vld [vmem:[#allocation73_spill] sm:$0xff] }
 0x5c1   :  { %2723 = vmatpush2.bf16.msra.mxu1 %v7063_v62  ;;  %2764 = vmatpush2.bf16.msra.mxu0 %v7064_v11  ;;  %v7074_v62 = vld [vmem:[#allocation74_spill] sm:$0xff]  ;;  %v7075_v11 = vld [vmem:[#allocation75_spill] sm:$0xff] }
 0x5c2   :  { %2724 = vmatprep.subr.bf16.mxu1 %v7065_v25  ;;  %2765 = vmatprep.subr.bf16.mxu0 %v7066_v18  ;;  %v7076_v25 = vld [vmem:[#allocation76_spill] sm:$0xff]  ;;  %v7077_v18 = vld [vmem:[#allocation77_spill] sm:$0xff] }
 0x5c5   :  { %2725 = vmatpush2.bf16.msra.mxu1 %v7067_v1  ;;  %2766 = vmatpush2.bf16.msra.mxu0 %v7068_v37  ;;  %v7078_v1 = vld [vmem:[#allocation78_spill] sm:$0xff] }
 0x5c6   :  { %2726 = vmatprep.subr.bf16.mxu1 %v7069_v29  ;;  %2767 = vmatprep.subr.bf16.mxu0 %v7070_v21 }
 0x5c9   :  { %2727 = vmatpush2.bf16.msra.mxu1 %v7071_v0  ;;  %2768 = vmatpush2.bf16.msra.mxu0 %v7072_v35 }
 0x5ca   :  { %2728 = vmatprep.subr.bf16.mxu1 %v7073_v55  ;;  %2769 = vmatprep.subr.bf16.mxu0 %v7074_v62 }
 0x5cd   :  { %2729 = vmatpush2.bf16.msra.mxu1 %v7075_v11  ;;  %2770 = vmatpush2.bf16.msra.mxu0 %v7076_v25  ;;  %v7082_v25 = vld [vmem:[#allocation169_spill] sm:$0xff] }
 0x5ce   :  { %2780 = vmatprep.subr.bf16.mxu1 %v7077_v18  ;;  %2821 = vmatprep.subr.bf16.mxu0 %v7078_v1 }
 0x610   :  { %v2502_v37 = vpop.f32.mrf.mxu1  ;;  %v2543_v29 = vpop.f32.mrf.mxu0 }
 0x611   :  { %v2632_v55 = vadd.f32 %v2502_v37, %v7079_v19  ;;  %v2634_v62 = vadd.f32 %v2543_v29, %v7080_v54 }
 0x612   :  { %v2504_v53 = vpop.f32.mrf.mxu1  ;;  %v2545_v21 = vpop.f32.mrf.mxu0 }
 0x613   :  { %v2633_v11 = vadd.f32 %v2504_v53, %v7081_v52  ;;  %v3821_v47 = vmul.f32 -1.442695, %v2632_v55  ;;  %v2635_v38 = vadd.f32 %v2545_v21, %v7082_v25  ;;  %v3823_v18 = vmul.f32 -1.442695, %v2634_v62  ;;  %v7083_v25 = vld [vmem:[#allocation168_spill] sm:$0xff]  ;;  %v7084_v55 = vld [vmem:[#allocation190_spill] sm:$0xff] }
 0x614   :  { %v2506_v17 = vpop.f32.mrf.mxu1  ;;  %v2547_v0 = vpop.f32.mrf.mxu0 }
 0x615   :  { %v3822_v51 = vmul.f32 -1.442695, %v2633_v11  ;;  %4104 = vpow2.f32 %v3821_v47  ;;  %v3824_v1 = vmul.f32 -1.442695, %v2635_v38  ;;  %v7086_v11 = vld [vmem:[#allocation191_spill] sm:$0xff] }
 0x616   :  { %v2507_v45 = vpop.f32.mrf.mxu1  ;;  %v2548_v35 = vpop.f32.mrf.mxu0  ;;  %4106 = vpow2.f32 %v3823_v18 }
 0x617   :  { %4108 = vpow2.f32 %v3822_v51 }
 0x618   :  { %4110 = vpow2.f32 %v3824_v1  ;;  %v7085_v1 = vld [vmem:[#allocation170_spill] sm:$0xff] }
 0x622   :  { %v4105_v17 = vpop.eup %4104 }
 0x623   :  { %v4107_v0 = vpop.eup %4106  ;;  %v2646_v35 = vadd.f32 1.0, %v4105_v17 }
 0x624   :  { %v4109_v45 = vpop.eup %4108  ;;  %v2658_v19 = vadd.f32 1.0, %v4107_v0 }
 0x625   :  { %v4111_v59 = vpop.eup %4110  ;;  %v2647_v37 = vadd.f32 1.0, %v4109_v45  ;;  %4112 = vrcp.f32 %v2646_v35 }
 0x626   :  { %v2659_v54 = vadd.f32 1.0, %v4111_v59  ;;  %4114 = vrcp.f32 %v2658_v19 }
 0x627   :  { %4116 = vrcp.f32 %v2647_v37 }
 0x632   :  { %v4113_v19 = vpop.eup %4112 }
 0x650   :  { %v2584_v52 = vpop.f32.mrf.mxu1  ;;  %v2625_v53 = vpop.f32.mrf.mxu0 }
 0x651   :  { %v2636_v21 = vadd.f32 %v2584_v52, %v7083_v25  ;;  %v2638_v47 = vadd.f32 %v2625_v53, %v7084_v55  ;;  %v4115_v52 = vpop.eup %4114 }
 0x652   :  { %v2586_v38 = vpop.f32.mrf.mxu1  ;;  %v2627_v51 = vpop.f32.mrf.mxu0 }
 0x653   :  { %4118 = vtanh.f32 %v2636_v21  ;;  %v3825_v18 = vmul.f32 -1.442695, %v2638_v47  ;;  %v2637_v62 = vadd.f32 %v2586_v38, %v7085_v1  ;;  %v2639_v29 = vadd.f32 %v2627_v51, %v7086_v11  ;;  %v4117_v37 = vpop.eup %4116 }
 0x654   :  { %4120 = vrcp.f32 %v2659_v54  ;;  %v2588_v17 = vpop.f32.mrf.mxu1  ;;  %v2629_v0 = vpop.f32.mrf.mxu0  ;;  %v2678_v21 = vmul.f32 %v4115_v52, %v5657_v16 }
 0x655   :  { %4122 = vpow2.f32 %v3825_v18  ;;  %v3826_v59 = vmul.f32 -1.442695, %v2639_v29 }
 0x656   :  { %4124 = vtanh.f32 %v2637_v62  ;;  %v2589_v45 = vpop.f32.mrf.mxu1  ;;  %v2630_v35 = vpop.f32.mrf.mxu0 }
 0x657   :  { %4126 = vpow2.f32 %v3826_v59 }
 0x660   :  { %v4119_v53 = vpop.eup %4118 }
 0x661   :  { %v4121_v25 = vpop.eup %4120  ;;  %v2680_v55 = vmul.f32 %v4119_v53, %v4113_v19  ;;  %v7089_v53 = vld [vmem:[#allocation122_spill] sm:$0xff] }
 0x662   :  { %v4123_v47 = vpop.eup %4122  ;;  %v2679_v18 = vmul.f32 %v4121_v25, %v5661_v20  ;;  %v7087_v20 = vld [vmem:[#allocation120_spill] sm:$0xff]  ;;  %v7090_v25 = vld [vmem:[#allocation123_spill] sm:$0xff] }
 0x663   :  { %v4125_v38 = vpop.eup %4124  ;;  %v5807_v51 = vadd.f32 %v2680_v55, %v2678_v21  ;;  %v2672_v54 = vadd.f32 1.0, %v4123_v47  ;;  %v7091_v21 = vld [vmem:[#allocation124_spill] sm:$0xff]  ;;  %v7092_v55 = vld [vmem:[#allocation125_spill] sm:$0xff]  ;;  %v7093_v47 = vld [vmem:[#allocation126_spill] sm:$0xff] }
 0x664   :  { %v4127_v1 = vpop.eup %4126  ;;  %v2681_v62 = vmul.f32 %v4125_v38, %v4117_v37  ;;  %v7088_v37 = vld [vmem:[#allocation121_spill] sm:$0xff]  ;;  %v7094_v38 = vld [vmem:[#allocation127_spill] sm:$0xff] }
 0x665   :  { %4128 = vtanh.f32 %v5807_v51  ;;  %v2673_v11 = vadd.f32 1.0, %v4127_v1  ;;  %v7096_v1 = vld [vmem:[#allocation129_spill] sm:$0xff] }
 0x666   :  { %4130 = vrcp.f32 %v2672_v54  ;;  %v5811_v29 = vadd.f32 %v2681_v62, %v2679_v18  ;;  %v7095_v54 = vld [vmem:[#allocation128_spill] sm:$0xff]  ;;  %v7097_v18 = vld [vmem:[#allocation130_spill] sm:$0xff]  ;;  %v7098_v62 = vld [vmem:[#allocation131_spill] sm:$0xff] }
 0x667   :  { %4132 = vrcp.f32 %v2673_v11  ;;  %v7099_v11 = vld [vmem:[#allocation132_spill] sm:$0xff] }
 0x668   :  { %4134 = vtanh.f32 %v5811_v29 }
 0x672   :  { %v4129_v16 = vpop.eup %4128 }
 0x673   :  { %v4131_v17 = vpop.eup %4130 }
 0x674   :  { %v4133_v0 = vpop.eup %4132  ;;  %v2686_v45 = vmul.f32 %v4131_v17, %v4129_v16  ;;  %v7100_v16 = vld [vmem:[#allocation133_spill] sm:$0xff]  ;;  %v7101_v17 = vld [vmem:[#allocation134_spill] sm:$0xff] }
 0x675   :  { %v4135_v59 = vpop.eup %4134 }
 0x676   :  { %v2687_v35 = vmul.f32 %v4135_v59, %v4133_v0  ;;  %v5814_v52 = vpack.c.bf16 %v2686_v45, %v2686_v45  ;;  %v7102_v0 = vld [vmem:[#allocation135_spill] sm:$0xff]  ;;  %v7103_v59 = vld [vmem:[#allocation136_spill] sm:$0xff]  ;;  %v7104_v45 = vld [vmem:[#allocation137_spill] sm:$0xff] }
 0x678   :  { %v2697_v19 = vpack.c.bf16 %v2687_v35, %v2687_v35  ;;  %v7105_v35 = vld [vmem:[#allocation138_spill] sm:$0xff] }
 0x67a   :  { %2730 = vmatprep.mubr.bf16.mxu1 %v2697_v19  ;;  %2771 = vmatprep.mubr.bf16.mxu0 %v2697_v19 }
 0x67b   :  { %2731 = vmatmul.mubr.bf16.vlgmr.msra.gmra.mxu1 %v5814_v52  ;;  %2772 = vmatmul.mubr.bf16.vlgmr.msra.gmra.mxu0 %v5814_v52 }
 0x67c   :  { %2781 = vmatpush1.bf16.msra.mxu1 %v6698_v23  ;;  %2822 = vmatpush1.bf16.msra.mxu0 %v6699_v41 }
 0x67d   :  { %2812 = vmatprep.mubr.bf16.mxu1 %v2697_v19  ;;  %2853 = vmatprep.mubr.bf16.mxu0 %v2697_v19  ;;  %v7106_v19 = vld [vmem:[#allocation139_spill] sm:$0xff] }
 0x67e   :  { %2782 = vmatprep.subr.bf16.mxu1 %v6700_v26  ;;  %2823 = vmatprep.subr.bf16.mxu0 %v6701_v61 }
 0x680   :  { %2783 = vmatpush1.bf16.msra.mxu1 %v6702_v9  ;;  %2824 = vmatpush1.bf16.msra.mxu0 %v6703_v24 }
 0x681   :  { %2784 = vmatprep.subr.bf16.mxu1 %v6704_v56  ;;  %2825 = vmatprep.subr.bf16.mxu0 %v6705_v44 }
 0x684   :  { %2785 = vmatpush1.bf16.msra.mxu1 %v6706_v27  ;;  %2826 = vmatpush1.bf16.msra.mxu0 %v6707_v22 }
 0x685   :  { %2786 = vmatprep.subr.bf16.mxu1 %v6708_v33  ;;  %2827 = vmatprep.subr.bf16.mxu0 %v6709_v10 }
 0x688   :  { %2787 = vmatpush1.bf16.msra.mxu1 %v6710_v48  ;;  %2828 = vmatpush1.bf16.msra.mxu0 %v6711_v30 }
 0x689   :  { %2788 = vmatprep.subr.bf16.mxu1 %v6712_v36  ;;  %2829 = vmatprep.subr.bf16.mxu0 %v6713_v63 }
 0x68c   :  { %2789 = vmatpush1.bf16.msra.mxu1 %v6714_v7  ;;  %2830 = vmatpush1.bf16.msra.mxu0 %v6715_v28 }
 0x68d   :  { %2790 = vmatprep.subr.bf16.mxu1 %v6802_v49  ;;  %2831 = vmatprep.subr.bf16.mxu0 %v6803_v39 }
 0x690   :  { %2791 = vmatpush1.bf16.msra.mxu1 %v6804_v60  ;;  %2832 = vmatpush1.bf16.msra.mxu0 %v6805_v4 }
 0x691   :  { %2792 = vmatprep.subr.bf16.mxu1 %v6806_v3  ;;  %2833 = vmatprep.subr.bf16.mxu0 %v6807_v5 }
 0x694   :  { %2793 = vmatpush1.bf16.msra.mxu1 %v6808_v58  ;;  %2834 = vmatpush1.bf16.msra.mxu0 %v6809_v57 }
 0x695   :  { %2794 = vmatprep.subr.bf16.mxu1 %v6810_v6  ;;  %2835 = vmatprep.subr.bf16.mxu0 %v6811_v32 }
 0x698   :  { %2795 = vmatpush1.bf16.msra.mxu1 %v6812_v15  ;;  %2836 = vmatpush1.bf16.msra.mxu0 %v6813_v34 }
 0x699   :  { %2796 = vmatprep.subr.bf16.mxu1 %v6897_v40  ;;  %2837 = vmatprep.subr.bf16.mxu0 %v6815_v42 }
 0x69c   :  { %2797 = vmatpush2.bf16.msra.mxu1 %v6816_v14  ;;  %2838 = vmatpush2.bf16.msra.mxu0 %v6817_v2 }
 0x69d   :  { %2798 = vmatprep.subr.bf16.mxu1 %v6818_v50  ;;  %2839 = vmatprep.subr.bf16.mxu0 %v6819_v13 }
 0x6a0   :  { %2799 = vmatpush2.bf16.msra.mxu1 %v6820_v46  ;;  %2840 = vmatpush2.bf16.msra.mxu0 %v6735_v8 }
 0x6a1   :  { %2800 = vmatprep.subr.bf16.mxu1 %v6736_v43  ;;  %2841 = vmatprep.subr.bf16.mxu0 %v6737_v31 }
 0x6a4   :  { %2801 = vmatpush2.bf16.msra.mxu1 %v6821_v12  ;;  %2842 = vmatpush2.bf16.msra.mxu0 %v7087_v20 }
 0x6a5   :  { %2802 = vmatprep.subr.bf16.mxu1 %v7088_v37  ;;  %2843 = vmatprep.subr.bf16.mxu0 %v7089_v53 }
 0x6a8   :  { %2803 = vmatpush2.bf16.msra.mxu1 %v7090_v25  ;;  %2844 = vmatpush2.bf16.msra.mxu0 %v7091_v21  ;;  %v7176_v21 = vld [vmem:[#allocation146_spill] sm:$0xff] }
 0x6a9   :  { %2804 = vmatprep.subr.bf16.mxu1 %v7092_v55  ;;  %2845 = vmatprep.subr.bf16.mxu0 %v7093_v47  ;;  %v7174_v47 = vld [vmem:[#allocation144_spill] sm:$0xff]  ;;  %v7175_v55 = vld [vmem:[#allocation171_spill] sm:$0xff] }
 0x6ac   :  { %2805 = vmatpush2.bf16.msra.mxu1 %v7094_v38  ;;  %2846 = vmatpush2.bf16.msra.mxu0 %v7095_v54 }
 0x6ad   :  { %2806 = vmatprep.subr.bf16.mxu1 %v7096_v1  ;;  %2847 = vmatprep.subr.bf16.mxu0 %v7097_v18  ;;  %v7107_v1 = vld [vmem:[#allocation140_spill] sm:$0xff]  ;;  %v7108_v18 = vld [vmem:[#allocation13_spill] sm:$0xff] }
 0x6b0   :  { %2807 = vmatpush2.bf16.msra.mxu1 %v7098_v62  ;;  %2848 = vmatpush2.bf16.msra.mxu0 %v7099_v11  ;;  %v7109_v62 = vld [vmem:[#allocation14_spill] sm:$0xff] }
 0x6b1   :  { %2808 = vmatprep.subr.bf16.mxu1 %v7100_v16  ;;  %2849 = vmatprep.subr.bf16.mxu0 %v7101_v17  ;;  %v7110_v17 = vld [vmem:[#allocation15_spill] sm:$0xff]  ;;  %v7119_v16 = vld [vmem:[#allocation24_spill] sm:$0xff] }
 0x6b4   :  { %2809 = vmatpush2.bf16.msra.mxu1 %v7102_v0  ;;  %2850 = vmatpush2.bf16.msra.mxu0 %v7103_v59  ;;  %v7111_v0 = vld [vmem:[#allocation16_spill] sm:$0xff]  ;;  %v7112_v59 = vld [vmem:[#allocation17_spill] sm:$0xff] }
 0x6b5   :  { %2810 = vmatprep.subr.bf16.mxu1 %v7104_v45  ;;  %2851 = vmatprep.subr.bf16.mxu0 %v7105_v35  ;;  %v7113_v45 = vld [vmem:[#allocation18_spill] sm:$0xff]  ;;  %v7114_v35 = vld [vmem:[#allocation19_spill] sm:$0xff] }
 0x6b8   :  { %2811 = vmatpush2.bf16.msra.mxu1 %v7106_v19  ;;  %2852 = vmatpush2.bf16.msra.mxu0 %v7107_v1  ;;  %v7115_v19 = vld [vmem:[#allocation20_spill] sm:$0xff]  ;;  %v7116_v1 = vld [vmem:[#allocation21_spill] sm:$0xff] }
 0x6b9   :  { %2928 = vmatprep.subr.bf16.mxu1 %v7108_v18  ;;  %2969 = vmatprep.subr.bf16.mxu0 %v7109_v62  ;;  %v7117_v18 = vld [vmem:[#allocation22_spill] sm:$0xff]  ;;  %v7118_v62 = vld [vmem:[#allocation23_spill] sm:$0xff] }
 0x6bb   :  { %2813 = vmatmul.mubr.bf16.vlgmr.msra.gmra.mxu1 %v5814_v52  ;;  %2854 = vmatmul.mubr.bf16.vlgmr.msra.gmra.mxu0 %v5814_v52  ;;  %v7120_v52 = vld [vmem:[#allocation25_spill] sm:$0xff] }
 0x6bc   :  { %2929 = vmatpush1.bf16.msra.mxu1 %v7110_v17  ;;  %2970 = vmatpush1.bf16.msra.mxu0 %v7111_v0  ;;  %v7121_v17 = vld [vmem:[#allocation26_spill] sm:$0xff]  ;;  %v7122_v0 = vld [vmem:[#allocation27_spill] sm:$0xff] }
 0x6bd   :  { %2930 = vmatprep.subr.bf16.mxu1 %v7112_v59  ;;  %2971 = vmatprep.subr.bf16.mxu0 %v7113_v45  ;;  %v7123_v59 = vld [vmem:[#allocation28_spill] sm:$0xff]  ;;  %v7124_v45 = vld [vmem:[#allocation29_spill] sm:$0xff] }
 0x6c0   :  { %2931 = vmatpush1.bf16.msra.mxu1 %v7114_v35  ;;  %2972 = vmatpush1.bf16.msra.mxu0 %v7115_v19  ;;  %v7125_v35 = vld [vmem:[#allocation30_spill] sm:$0xff]  ;;  %v7126_v19 = vld [vmem:[#allocation31_spill] sm:$0xff] }
 0x6c1   :  { %2932 = vmatprep.subr.bf16.mxu1 %v7116_v1  ;;  %2973 = vmatprep.subr.bf16.mxu0 %v7117_v18  ;;  %v7127_v1 = vld [vmem:[#allocation32_spill] sm:$0xff]  ;;  %v7128_v18 = vld [vmem:[#allocation33_spill] sm:$0xff] }
 0x6c4   :  { %2933 = vmatpush1.bf16.msra.mxu1 %v7118_v62  ;;  %2974 = vmatpush1.bf16.msra.mxu0 %v7119_v16  ;;  %v7129_v62 = vld [vmem:[#allocation34_spill] sm:$0xff]  ;;  %v7130_v16 = vld [vmem:[#allocation35_spill] sm:$0xff] }
 0x6c5   :  { %2934 = vmatprep.subr.bf16.mxu1 %v7120_v52  ;;  %2975 = vmatprep.subr.bf16.mxu0 %v7121_v17  ;;  %v7131_v52 = vld [vmem:[#allocation36_spill] sm:$0xff]  ;;  %v7132_v17 = vld [vmem:[#allocation37_spill] sm:$0xff] }
 0x6c8   :  { %2935 = vmatpush1.bf16.msra.mxu1 %v7122_v0  ;;  %2976 = vmatpush1.bf16.msra.mxu0 %v7123_v59  ;;  %v7133_v0 = vld [vmem:[#allocation38_spill] sm:$0xff]  ;;  %v7134_v59 = vld [vmem:[#allocation39_spill] sm:$0xff] }
 0x6c9   :  { %2936 = vmatprep.subr.bf16.mxu1 %v7124_v45  ;;  %2977 = vmatprep.subr.bf16.mxu0 %v7125_v35  ;;  %v7135_v45 = vld [vmem:[#allocation40_spill] sm:$0xff]  ;;  %v7136_v35 = vld [vmem:[#allocation41_spill] sm:$0xff] }
 0x6cc   :  { %2937 = vmatpush1.bf16.msra.mxu1 %v7126_v19  ;;  %2978 = vmatpush1.bf16.msra.mxu0 %v7127_v1  ;;  %v7137_v19 = vld [vmem:[#allocation42_spill] sm:$0xff]  ;;  %v7138_v1 = vld [vmem:[#allocation43_spill] sm:$0xff] }
 0x6cd   :  { %2938 = vmatprep.subr.bf16.mxu1 %v7128_v18  ;;  %2979 = vmatprep.subr.bf16.mxu0 %v7129_v62  ;;  %v7139_v18 = vld [vmem:[#allocation44_spill] sm:$0xff]  ;;  %v7140_v62 = vld [vmem:[#allocation45_spill] sm:$0xff] }
 0x6d0   :  { %2939 = vmatpush1.bf16.msra.mxu1 %v7130_v16  ;;  %2980 = vmatpush1.bf16.msra.mxu0 %v7131_v52  ;;  %v7141_v16 = vld [vmem:[#allocation46_spill] sm:$0xff]  ;;  %v7142_v52 = vld [vmem:[#allocation47_spill] sm:$0xff] }
 0x6d1   :  { %2940 = vmatprep.subr.bf16.mxu1 %v7132_v17  ;;  %2981 = vmatprep.subr.bf16.mxu0 %v7133_v0  ;;  %v7143_v17 = vld [vmem:[#allocation48_spill] sm:$0xff]  ;;  %v7144_v0 = vld [vmem:[#allocation49_spill] sm:$0xff] }
 0x6d4   :  { %2941 = vmatpush1.bf16.msra.mxu1 %v7134_v59  ;;  %2982 = vmatpush1.bf16.msra.mxu0 %v7135_v45  ;;  %v7145_v59 = vld [vmem:[#allocation50_spill] sm:$0xff]  ;;  %v7146_v45 = vld [vmem:[#allocation51_spill] sm:$0xff] }
 0x6d5   :  { %2942 = vmatprep.subr.bf16.mxu1 %v7136_v35  ;;  %2983 = vmatprep.subr.bf16.mxu0 %v7137_v19  ;;  %v7147_v35 = vld [vmem:[#allocation52_spill] sm:$0xff]  ;;  %v7148_v19 = vld [vmem:[#allocation53_spill] sm:$0xff] }
 0x6d8   :  { %2943 = vmatpush1.bf16.msra.mxu1 %v7138_v1  ;;  %2984 = vmatpush1.bf16.msra.mxu0 %v7139_v18  ;;  %v7149_v1 = vld [vmem:[#allocation54_spill] sm:$0xff]  ;;  %v7150_v18 = vld [vmem:[#allocation55_spill] sm:$0xff] }
 0x6d9   :  { %2944 = vmatprep.subr.bf16.mxu1 %v7140_v62  ;;  %2985 = vmatprep.subr.bf16.mxu0 %v7141_v16  ;;  %v7151_v62 = vld [vmem:[#allocation56_spill] sm:$0xff]  ;;  %v7152_v16 = vld [vmem:[#allocation57_spill] sm:$0xff] }
 0x6dc   :  { %2945 = vmatpush2.bf16.msra.mxu1 %v7142_v52  ;;  %2986 = vmatpush2.bf16.msra.mxu0 %v7143_v17  ;;  %v7153_v52 = vld [vmem:[#allocation58_spill] sm:$0xff]  ;;  %v7154_v17 = vld [vmem:[#allocation59_spill] sm:$0xff] }
 0x6dd   :  { %2946 = vmatprep.subr.bf16.mxu1 %v7144_v0  ;;  %2987 = vmatprep.subr.bf16.mxu0 %v7145_v59  ;;  %v7155_v0 = vld [vmem:[#allocation60_spill] sm:$0xff]  ;;  %v7156_v59 = vld [vmem:[#allocation61_spill] sm:$0xff] }
 0x6e0   :  { %2947 = vmatpush2.bf16.msra.mxu1 %v7146_v45  ;;  %2988 = vmatpush2.bf16.msra.mxu0 %v7147_v35  ;;  %v7157_v45 = vld [vmem:[#allocation62_spill] sm:$0xff]  ;;  %v7158_v35 = vld [vmem:[#allocation63_spill] sm:$0xff] }
 0x6e1   :  { %2948 = vmatprep.subr.bf16.mxu1 %v7148_v19  ;;  %2989 = vmatprep.subr.bf16.mxu0 %v7149_v1  ;;  %v7159_v19 = vld [vmem:[#allocation64_spill] sm:$0xff]  ;;  %v7160_v1 = vld [vmem:[#allocation65_spill] sm:$0xff] }
 0x6e4   :  { %2949 = vmatpush2.bf16.msra.mxu1 %v7150_v18  ;;  %2990 = vmatpush2.bf16.msra.mxu0 %v7151_v62  ;;  %v7161_v18 = vld [vmem:[#allocation66_spill] sm:$0xff]  ;;  %v7162_v62 = vld [vmem:[#allocation67_spill] sm:$0xff] }
 0x6e5   :  { %2950 = vmatprep.subr.bf16.mxu1 %v7152_v16  ;;  %2991 = vmatprep.subr.bf16.mxu0 %v7153_v52  ;;  %v7163_v16 = vld [vmem:[#allocation68_spill] sm:$0xff]  ;;  %v7164_v52 = vld [vmem:[#allocation69_spill] sm:$0xff] }
 0x6e8   :  { %2951 = vmatpush2.bf16.msra.mxu1 %v7154_v17  ;;  %2992 = vmatpush2.bf16.msra.mxu0 %v7155_v0  ;;  %v7165_v17 = vld [vmem:[#allocation70_spill] sm:$0xff]  ;;  %v7166_v0 = vld [vmem:[#allocation71_spill] sm:$0xff] }
 0x6e9   :  { %2952 = vmatprep.subr.bf16.mxu1 %v7156_v59  ;;  %2993 = vmatprep.subr.bf16.mxu0 %v7157_v45  ;;  %v7167_v59 = vld [vmem:[#allocation72_spill] sm:$0xff]  ;;  %v7168_v45 = vld [vmem:[#allocation73_spill] sm:$0xff] }
 0x6ec   :  { %2953 = vmatpush2.bf16.msra.mxu1 %v7158_v35  ;;  %2994 = vmatpush2.bf16.msra.mxu0 %v7159_v19  ;;  %v7169_v35 = vld [vmem:[#allocation74_spill] sm:$0xff]  ;;  %v7170_v19 = vld [vmem:[#allocation75_spill] sm:$0xff] }
 0x6ed   :  { %2954 = vmatprep.subr.bf16.mxu1 %v7160_v1  ;;  %2995 = vmatprep.subr.bf16.mxu0 %v7161_v18  ;;  %v7171_v1 = vld [vmem:[#allocation76_spill] sm:$0xff]  ;;  %v7172_v18 = vld [vmem:[#allocation77_spill] sm:$0xff] }
 0x6f0   :  { %2955 = vmatpush2.bf16.msra.mxu1 %v7162_v62  ;;  %2996 = vmatpush2.bf16.msra.mxu0 %v7163_v16  ;;  %v7173_v62 = vld [vmem:[#allocation78_spill] sm:$0xff] }
 0x6f1   :  { %2956 = vmatprep.subr.bf16.mxu1 %v7164_v52  ;;  %2997 = vmatprep.subr.bf16.mxu0 %v7165_v17 }
 0x6f4   :  { %2957 = vmatpush2.bf16.msra.mxu1 %v7166_v0  ;;  %2998 = vmatpush2.bf16.msra.mxu0 %v7167_v59 }
 0x6f5   :  { %2958 = vmatprep.subr.bf16.mxu1 %v7168_v45  ;;  %2999 = vmatprep.subr.bf16.mxu0 %v7169_v35 }
 0x6f8   :  { %2959 = vmatpush2.bf16.msra.mxu1 %v7170_v19  ;;  %3000 = vmatpush2.bf16.msra.mxu0 %v7171_v1  ;;  %v7177_v1 = vld [vmem:[#allocation173_spill] sm:$0xff] }
 0x6f9   :  { %3010 = vmatprep.subr.bf16.mxu1 %v7172_v18  ;;  %3051 = vmatprep.subr.bf16.mxu0 %v7173_v62 }
 0x73b   :  { %v2732_v16 = vpop.f32.mrf.mxu1  ;;  %v2773_v52 = vpop.f32.mrf.mxu0 }
 0x73c   :  { %v2862_v45 = vadd.f32 %v2732_v16, %v7174_v47  ;;  %v2864_v35 = vadd.f32 %v2773_v52, %v7175_v55 }
 0x73d   :  { %v2734_v11 = vpop.f32.mrf.mxu1  ;;  %v2775_v17 = vpop.f32.mrf.mxu0 }
 0x73e   :  { %v2863_v19 = vadd.f32 %v2734_v11, %v7176_v21  ;;  %v3827_v25 = vmul.f32 -1.442695, %v2862_v45  ;;  %v2865_v53 = vadd.f32 %v2775_v17, %v7177_v1  ;;  %v3829_v18 = vmul.f32 -1.442695, %v2864_v35  ;;  %v7178_v1 = vld [vmem:[#allocation172_spill] sm:$0xff] }
 0x73f   :  { %v2736_v54 = vpop.f32.mrf.mxu1  ;;  %v2777_v0 = vpop.f32.mrf.mxu0  ;;  %v7179_v45 = vld [vmem:[#allocation192_spill] sm:$0xff] }
 0x740   :  { %v3828_v37 = vmul.f32 -1.442695, %v2863_v19  ;;  %4136 = vpow2.f32 %v3827_v25  ;;  %v3830_v62 = vmul.f32 -1.442695, %v2865_v53  ;;  %v7181_v19 = vld [vmem:[#allocation193_spill] sm:$0xff] }
 0x741   :  { %v2737_v38 = vpop.f32.mrf.mxu1  ;;  %v2778_v59 = vpop.f32.mrf.mxu0  ;;  %4138 = vpow2.f32 %v3829_v18 }
 0x742   :  { %4140 = vpow2.f32 %v3828_v37 }
 0x743   :  { %4142 = vpow2.f32 %v3830_v62  ;;  %v7180_v62 = vld [vmem:[#allocation174_spill] sm:$0xff] }
 0x74d   :  { %v4137_v54 = vpop.eup %4136 }
 0x74e   :  { %v4139_v0 = vpop.eup %4138  ;;  %v2876_v59 = vadd.f32 1.0, %v4137_v54 }
 0x74f   :  { %v4141_v38 = vpop.eup %4140  ;;  %v2888_v47 = vadd.f32 1.0, %v4139_v0 }
 0x750   :  { %v4143_v20 = vpop.eup %4142  ;;  %v2877_v16 = vadd.f32 1.0, %v4141_v38  ;;  %4144 = vrcp.f32 %v2876_v59 }
 0x751   :  { %v2889_v55 = vadd.f32 1.0, %v4143_v20  ;;  %4146 = vrcp.f32 %v2888_v47 }
 0x752   :  { %4148 = vrcp.f32 %v2877_v16 }
 0x75d   :  { %v4145_v47 = vpop.eup %4144 }
 0x77b   :  { %v2814_v21 = vpop.f32.mrf.mxu1  ;;  %v2855_v11 = vpop.f32.mrf.mxu0 }
 0x77c   :  { %v2866_v17 = vadd.f32 %v2814_v21, %v7178_v1  ;;  %v2868_v25 = vadd.f32 %v2855_v11, %v7179_v45  ;;  %v4147_v21 = vpop.eup %4146 }
 0x77d   :  { %v2816_v53 = vpop.f32.mrf.mxu1  ;;  %v2857_v37 = vpop.f32.mrf.mxu0 }
 0x77e   :  { %4150 = vtanh.f32 %v2866_v17  ;;  %v3831_v18 = vmul.f32 -1.442695, %v2868_v25  ;;  %v2867_v35 = vadd.f32 %v2816_v53, %v7180_v62  ;;  %v2869_v52 = vadd.f32 %v2857_v37, %v7181_v19  ;;  %v4149_v16 = vpop.eup %4148 }
 0x77f   :  { %4152 = vrcp.f32 %v2889_v55  ;;  %v2818_v54 = vpop.f32.mrf.mxu1  ;;  %v2859_v0 = vpop.f32.mrf.mxu0  ;;  %v2908_v17 = vmul.f32 %v4147_v21, %v5807_v51 }
 0x780   :  { %4154 = vpow2.f32 %v3831_v18  ;;  %v3832_v20 = vmul.f32 -1.442695, %v2869_v52 }
 0x781   :  { %4156 = vtanh.f32 %v2867_v35  ;;  %v2819_v38 = vpop.f32.mrf.mxu1  ;;  %v2860_v59 = vpop.f32.mrf.mxu0 }
 0x782   :  { %4158 = vpow2.f32 %v3832_v20 }
 0x78b   :  { %v4151_v11 = vpop.eup %4150 }
 0x78c   :  { %v4153_v1 = vpop.eup %4152  ;;  %v2910_v45 = vmul.f32 %v4151_v11, %v4145_v47  ;;  %v7184_v11 = vld [vmem:[#allocation122_spill] sm:$0xff] }
 0x78d   :  { %v4155_v25 = vpop.eup %4154  ;;  %v2909_v18 = vmul.f32 %v4153_v1, %v5811_v29  ;;  %v7182_v29 = vld [vmem:[#allocation120_spill] sm:$0xff]  ;;  %v7185_v1 = vld [vmem:[#allocation123_spill] sm:$0xff] }
 0x78e   :  { %v4157_v53 = vpop.eup %4156  ;;  %v5957_v37 = vadd.f32 %v2910_v45, %v2908_v17  ;;  %v2902_v55 = vadd.f32 1.0, %v4155_v25  ;;  %v7186_v17 = vld [vmem:[#allocation124_spill] sm:$0xff]  ;;  %v7187_v45 = vld [vmem:[#allocation125_spill] sm:$0xff]  ;;  %v7188_v25 = vld [vmem:[#allocation126_spill] sm:$0xff] }
 0x78f   :  { %v4159_v62 = vpop.eup %4158  ;;  %v2911_v35 = vmul.f32 %v4157_v53, %v4149_v16  ;;  %v7183_v16 = vld [vmem:[#allocation121_spill] sm:$0xff]  ;;  %v7189_v53 = vld [vmem:[#allocation127_spill] sm:$0xff] }
 0x790   :  { %4160 = vtanh.f32 %v5957_v37  ;;  %v2903_v19 = vadd.f32 1.0, %v4159_v62  ;;  %v7191_v62 = vld [vmem:[#allocation129_spill] sm:$0xff] }
 0x791   :  { %4162 = vrcp.f32 %v2902_v55  ;;  %v5961_v52 = vadd.f32 %v2911_v35, %v2909_v18  ;;  %v7190_v55 = vld [vmem:[#allocation128_spill] sm:$0xff]  ;;  %v7192_v18 = vld [vmem:[#allocation130_spill] sm:$0xff]  ;;  %v7193_v35 = vld [vmem:[#allocation131_spill] sm:$0xff] }
 0x792   :  { %4164 = vrcp.f32 %v2903_v19  ;;  %v7194_v19 = vld [vmem:[#allocation132_spill] sm:$0xff] }
 0x793   :  { %4166 = vtanh.f32 %v5961_v52 }
 0x79d   :  { %v4161_v51 = vpop.eup %4160 }
 0x79e   :  { %v4163_v54 = vpop.eup %4162 }
 0x79f   :  { %v4165_v0 = vpop.eup %4164  ;;  %v2916_v38 = vmul.f32 %v4163_v54, %v4161_v51  ;;  %v7195_v51 = vld [vmem:[#allocation133_spill] sm:$0xff]  ;;  %v7196_v54 = vld [vmem:[#allocation134_spill] sm:$0xff] }
 0x7a0   :  { %v4167_v20 = vpop.eup %4166 }
 0x7a1   :  { %v2917_v59 = vmul.f32 %v4167_v20, %v4165_v0  ;;  %v5964_v21 = vpack.c.bf16 %v2916_v38, %v2916_v38  ;;  %v7197_v0 = vld [vmem:[#allocation135_spill] sm:$0xff]  ;;  %v7198_v20 = vld [vmem:[#allocation136_spill] sm:$0xff]  ;;  %v7199_v38 = vld [vmem:[#allocation137_spill] sm:$0xff] }
 0x7a3   :  { %v2927_v47 = vpack.c.bf16 %v2917_v59, %v2917_v59  ;;  %v7200_v59 = vld [vmem:[#allocation138_spill] sm:$0xff] }
 0x7a5   :  { %2960 = vmatprep.mubr.bf16.mxu1 %v2927_v47  ;;  %3001 = vmatprep.mubr.bf16.mxu0 %v2927_v47 }
 0x7a6   :  { %2961 = vmatmul.mubr.bf16.vlgmr.msra.gmra.mxu1 %v5964_v21  ;;  %3002 = vmatmul.mubr.bf16.vlgmr.msra.gmra.mxu0 %v5964_v21 }
 0x7a7   :  { %3011 = vmatpush1.bf16.msra.mxu1 %v6698_v23  ;;  %3052 = vmatpush1.bf16.msra.mxu0 %v6699_v41 }
 0x7a8   :  { %3042 = vmatprep.mubr.bf16.mxu1 %v2927_v47  ;;  %3083 = vmatprep.mubr.bf16.mxu0 %v2927_v47  ;;  %v7201_v47 = vld [vmem:[#allocation139_spill] sm:$0xff] }
 0x7a9   :  { %3012 = vmatprep.subr.bf16.mxu1 %v6700_v26  ;;  %3053 = vmatprep.subr.bf16.mxu0 %v6701_v61 }
 0x7ab   :  { %3013 = vmatpush1.bf16.msra.mxu1 %v6702_v9  ;;  %3054 = vmatpush1.bf16.msra.mxu0 %v6703_v24 }
 0x7ac   :  { %3014 = vmatprep.subr.bf16.mxu1 %v6704_v56  ;;  %3055 = vmatprep.subr.bf16.mxu0 %v6705_v44 }
 0x7af   :  { %3015 = vmatpush1.bf16.msra.mxu1 %v6706_v27  ;;  %3056 = vmatpush1.bf16.msra.mxu0 %v6707_v22 }
 0x7b0   :  { %3016 = vmatprep.subr.bf16.mxu1 %v6708_v33  ;;  %3057 = vmatprep.subr.bf16.mxu0 %v6709_v10 }
 0x7b3   :  { %3017 = vmatpush1.bf16.msra.mxu1 %v6710_v48  ;;  %3058 = vmatpush1.bf16.msra.mxu0 %v6711_v30 }
 0x7b4   :  { %3018 = vmatprep.subr.bf16.mxu1 %v6712_v36  ;;  %3059 = vmatprep.subr.bf16.mxu0 %v6713_v63 }
 0x7b7   :  { %3019 = vmatpush1.bf16.msra.mxu1 %v6714_v7  ;;  %3060 = vmatpush1.bf16.msra.mxu0 %v6715_v28 }
 0x7b8   :  { %3020 = vmatprep.subr.bf16.mxu1 %v6802_v49  ;;  %3061 = vmatprep.subr.bf16.mxu0 %v6803_v39 }
 0x7bb   :  { %3021 = vmatpush1.bf16.msra.mxu1 %v6804_v60  ;;  %3062 = vmatpush1.bf16.msra.mxu0 %v6805_v4 }
 0x7bc   :  { %3022 = vmatprep.subr.bf16.mxu1 %v6806_v3  ;;  %3063 = vmatprep.subr.bf16.mxu0 %v6807_v5 }
 0x7bf   :  { %3023 = vmatpush1.bf16.msra.mxu1 %v6808_v58  ;;  %3064 = vmatpush1.bf16.msra.mxu0 %v6809_v57 }
 0x7c0   :  { %3024 = vmatprep.subr.bf16.mxu1 %v6810_v6  ;;  %3065 = vmatprep.subr.bf16.mxu0 %v6811_v32 }
 0x7c3   :  { %3025 = vmatpush1.bf16.msra.mxu1 %v6812_v15  ;;  %3066 = vmatpush1.bf16.msra.mxu0 %v6813_v34 }
 0x7c4   :  { %3026 = vmatprep.subr.bf16.mxu1 %v6897_v40  ;;  %3067 = vmatprep.subr.bf16.mxu0 %v6815_v42 }
 0x7c7   :  { %3027 = vmatpush2.bf16.msra.mxu1 %v6816_v14  ;;  %3068 = vmatpush2.bf16.msra.mxu0 %v6817_v2 }
 0x7c8   :  { %3028 = vmatprep.subr.bf16.mxu1 %v6818_v50  ;;  %3069 = vmatprep.subr.bf16.mxu0 %v6819_v13 }
 0x7cb   :  { %3029 = vmatpush2.bf16.msra.mxu1 %v6820_v46  ;;  %3070 = vmatpush2.bf16.msra.mxu0 %v6735_v8 }
 0x7cc   :  { %3030 = vmatprep.subr.bf16.mxu1 %v6736_v43  ;;  %3071 = vmatprep.subr.bf16.mxu0 %v6737_v31 }
 0x7cf   :  { %3031 = vmatpush2.bf16.msra.mxu1 %v6821_v12  ;;  %3072 = vmatpush2.bf16.msra.mxu0 %v7182_v29 }
 0x7d0   :  { %3032 = vmatprep.subr.bf16.mxu1 %v7183_v16  ;;  %3073 = vmatprep.subr.bf16.mxu0 %v7184_v11 }
 0x7d3   :  { %3033 = vmatpush2.bf16.msra.mxu1 %v7185_v1  ;;  %3074 = vmatpush2.bf16.msra.mxu0 %v7186_v17  ;;  %v7271_v17 = vld [vmem:[#allocation150_spill] sm:$0xff] }
 0x7d4   :  { %3034 = vmatprep.subr.bf16.mxu1 %v7187_v45  ;;  %3075 = vmatprep.subr.bf16.mxu0 %v7188_v25  ;;  %v7269_v25 = vld [vmem:[#allocation148_spill] sm:$0xff]  ;;  %v7270_v45 = vld [vmem:[#allocation175_spill] sm:$0xff] }
 0x7d7   :  { %3035 = vmatpush2.bf16.msra.mxu1 %v7189_v53  ;;  %3076 = vmatpush2.bf16.msra.mxu0 %v7190_v55 }
 0x7d8   :  { %3036 = vmatprep.subr.bf16.mxu1 %v7191_v62  ;;  %3077 = vmatprep.subr.bf16.mxu0 %v7192_v18  ;;  %v7202_v62 = vld [vmem:[#allocation140_spill] sm:$0xff]  ;;  %v7203_v18 = vld [vmem:[#allocation13_spill] sm:$0xff] }
 0x7db   :  { %3037 = vmatpush2.bf16.msra.mxu1 %v7193_v35  ;;  %3078 = vmatpush2.bf16.msra.mxu0 %v7194_v19  ;;  %v7204_v35 = vld [vmem:[#allocation14_spill] sm:$0xff] }
 0x7dc   :  { %3038 = vmatprep.subr.bf16.mxu1 %v7195_v51  ;;  %3079 = vmatprep.subr.bf16.mxu0 %v7196_v54  ;;  %v7205_v54 = vld [vmem:[#allocation15_spill] sm:$0xff]  ;;  %v7214_v51 = vld [vmem:[#allocation24_spill] sm:$0xff] }
 0x7df   :  { %3039 = vmatpush2.bf16.msra.mxu1 %v7197_v0  ;;  %3080 = vmatpush2.bf16.msra.mxu0 %v7198_v20  ;;  %v7206_v0 = vld [vmem:[#allocation16_spill] sm:$0xff]  ;;  %v7207_v20 = vld [vmem:[#allocation17_spill] sm:$0xff] }
 0x7e0   :  { %3040 = vmatprep.subr.bf16.mxu1 %v7199_v38  ;;  %3081 = vmatprep.subr.bf16.mxu0 %v7200_v59  ;;  %v7208_v38 = vld [vmem:[#allocation18_spill] sm:$0xff]  ;;  %v7209_v59 = vld [vmem:[#allocation19_spill] sm:$0xff] }
 0x7e3   :  { %3041 = vmatpush2.bf16.msra.mxu1 %v7201_v47  ;;  %3082 = vmatpush2.bf16.msra.mxu0 %v7202_v62  ;;  %v7210_v47 = vld [vmem:[#allocation20_spill] sm:$0xff]  ;;  %v7211_v62 = vld [vmem:[#allocation21_spill] sm:$0xff] }
 0x7e4   :  { %3158 = vmatprep.subr.bf16.mxu1 %v7203_v18  ;;  %3199 = vmatprep.subr.bf16.mxu0 %v7204_v35  ;;  %v7212_v18 = vld [vmem:[#allocation22_spill] sm:$0xff]  ;;  %v7213_v35 = vld [vmem:[#allocation23_spill] sm:$0xff] }
 0x7e6   :  { %3043 = vmatmul.mubr.bf16.vlgmr.msra.gmra.mxu1 %v5964_v21  ;;  %3084 = vmatmul.mubr.bf16.vlgmr.msra.gmra.mxu0 %v5964_v21  ;;  %v7215_v21 = vld [vmem:[#allocation25_spill] sm:$0xff] }
 0x7e7   :  { %3159 = vmatpush1.bf16.msra.mxu1 %v7205_v54  ;;  %3200 = vmatpush1.bf16.msra.mxu0 %v7206_v0  ;;  %v7216_v54 = vld [vmem:[#allocation26_spill] sm:$0xff]  ;;  %v7217_v0 = vld [vmem:[#allocation27_spill] sm:$0xff] }
 0x7e8   :  { %3160 = vmatprep.subr.bf16.mxu1 %v7207_v20  ;;  %3201 = vmatprep.subr.bf16.mxu0 %v7208_v38  ;;  %v7218_v20 = vld [vmem:[#allocation28_spill] sm:$0xff]  ;;  %v7219_v38 = vld [vmem:[#allocation29_spill] sm:$0xff] }
 0x7eb   :  { %3161 = vmatpush1.bf16.msra.mxu1 %v7209_v59  ;;  %3202 = vmatpush1.bf16.msra.mxu0 %v7210_v47  ;;  %v7220_v59 = vld [vmem:[#allocation30_spill] sm:$0xff]  ;;  %v7221_v47 = vld [vmem:[#allocation31_spill] sm:$0xff] }
 0x7ec   :  { %3162 = vmatprep.subr.bf16.mxu1 %v7211_v62  ;;  %3203 = vmatprep.subr.bf16.mxu0 %v7212_v18  ;;  %v7222_v62 = vld [vmem:[#allocation32_spill] sm:$0xff]  ;;  %v7223_v18 = vld [vmem:[#allocation33_spill] sm:$0xff] }
 0x7ef   :  { %3163 = vmatpush1.bf16.msra.mxu1 %v7213_v35  ;;  %3204 = vmatpush1.bf16.msra.mxu0 %v7214_v51  ;;  %v7224_v35 = vld [vmem:[#allocation34_spill] sm:$0xff]  ;;  %v7225_v51 = vld [vmem:[#allocation35_spill] sm:$0xff] }
 0x7f0   :  { %3164 = vmatprep.subr.bf16.mxu1 %v7215_v21  ;;  %3205 = vmatprep.subr.bf16.mxu0 %v7216_v54  ;;  %v7226_v21 = vld [vmem:[#allocation36_spill] sm:$0xff]  ;;  %v7227_v54 = vld [vmem:[#allocation37_spill] sm:$0xff] }
 0x7f3   :  { %3165 = vmatpush1.bf16.msra.mxu1 %v7217_v0  ;;  %3206 = vmatpush1.bf16.msra.mxu0 %v7218_v20  ;;  %v7228_v0 = vld [vmem:[#allocation38_spill] sm:$0xff]  ;;  %v7229_v20 = vld [vmem:[#allocation39_spill] sm:$0xff] }
 0x7f4   :  { %3166 = vmatprep.subr.bf16.mxu1 %v7219_v38  ;;  %3207 = vmatprep.subr.bf16.mxu0 %v7220_v59  ;;  %v7230_v38 = vld [vmem:[#allocation40_spill] sm:$0xff]  ;;  %v7231_v59 = vld [vmem:[#allocation41_spill] sm:$0xff] }
 0x7f7   :  { %3167 = vmatpush1.bf16.msra.mxu1 %v7221_v47  ;;  %3208 = vmatpush1.bf16.msra.mxu0 %v7222_v62  ;;  %v7232_v47 = vld [vmem:[#allocation42_spill] sm:$0xff]  ;;  %v7233_v62 = vld [vmem:[#allocation43_spill] sm:$0xff] }
 0x7f8   :  { %3168 = vmatprep.subr.bf16.mxu1 %v7223_v18  ;;  %3209 = vmatprep.subr.bf16.mxu0 %v7224_v35  ;;  %v7234_v18 = vld [vmem:[#allocation44_spill] sm:$0xff]  ;;  %v7235_v35 = vld [vmem:[#allocation45_spill] sm:$0xff] }
 0x7fb   :  { %3169 = vmatpush1.bf16.msra.mxu1 %v7225_v51  ;;  %3210 = vmatpush1.bf16.msra.mxu0 %v7226_v21  ;;  %v7236_v51 = vld [vmem:[#allocation46_spill] sm:$0xff]  ;;  %v7237_v21 = vld [vmem:[#allocation47_spill] sm:$0xff] }
 0x7fc   :  { %3170 = vmatprep.subr.bf16.mxu1 %v7227_v54  ;;  %3211 = vmatprep.subr.bf16.mxu0 %v7228_v0  ;;  %v7238_v54 = vld [vmem:[#allocation48_spill] sm:$0xff]  ;;  %v7239_v0 = vld [vmem:[#allocation49_spill] sm:$0xff] }
 0x7ff   :  { %3171 = vmatpush1.bf16.msra.mxu1 %v7229_v20  ;;  %3212 = vmatpush1.bf16.msra.mxu0 %v7230_v38  ;;  %v7240_v20 = vld [vmem:[#allocation50_spill] sm:$0xff]  ;;  %v7241_v38 = vld [vmem:[#allocation51_spill] sm:$0xff] }
 0x800   :  { %3172 = vmatprep.subr.bf16.mxu1 %v7231_v59  ;;  %3213 = vmatprep.subr.bf16.mxu0 %v7232_v47  ;;  %v7242_v59 = vld [vmem:[#allocation52_spill] sm:$0xff]  ;;  %v7243_v47 = vld [vmem:[#allocation53_spill] sm:$0xff] }
 0x803   :  { %3173 = vmatpush1.bf16.msra.mxu1 %v7233_v62  ;;  %3214 = vmatpush1.bf16.msra.mxu0 %v7234_v18  ;;  %v7244_v62 = vld [vmem:[#allocation54_spill] sm:$0xff]  ;;  %v7245_v18 = vld [vmem:[#allocation55_spill] sm:$0xff] }
 0x804   :  { %3174 = vmatprep.subr.bf16.mxu1 %v7235_v35  ;;  %3215 = vmatprep.subr.bf16.mxu0 %v7236_v51  ;;  %v7246_v35 = vld [vmem:[#allocation56_spill] sm:$0xff]  ;;  %v7247_v51 = vld [vmem:[#allocation57_spill] sm:$0xff] }
 0x807   :  { %3175 = vmatpush2.bf16.msra.mxu1 %v7237_v21  ;;  %3216 = vmatpush2.bf16.msra.mxu0 %v7238_v54  ;;  %v7248_v21 = vld [vmem:[#allocation58_spill] sm:$0xff]  ;;  %v7249_v54 = vld [vmem:[#allocation59_spill] sm:$0xff] }
 0x808   :  { %3176 = vmatprep.subr.bf16.mxu1 %v7239_v0  ;;  %3217 = vmatprep.subr.bf16.mxu0 %v7240_v20  ;;  %v7250_v0 = vld [vmem:[#allocation60_spill] sm:$0xff]  ;;  %v7251_v20 = vld [vmem:[#allocation61_spill] sm:$0xff] }
 0x80b   :  { %3177 = vmatpush2.bf16.msra.mxu1 %v7241_v38  ;;  %3218 = vmatpush2.bf16.msra.mxu0 %v7242_v59  ;;  %v7252_v38 = vld [vmem:[#allocation62_spill] sm:$0xff]  ;;  %v7253_v59 = vld [vmem:[#allocation63_spill] sm:$0xff] }
 0x80c   :  { %3178 = vmatprep.subr.bf16.mxu1 %v7243_v47  ;;  %3219 = vmatprep.subr.bf16.mxu0 %v7244_v62  ;;  %v7254_v47 = vld [vmem:[#allocation64_spill] sm:$0xff]  ;;  %v7255_v62 = vld [vmem:[#allocation65_spill] sm:$0xff] }
 0x80f   :  { %3179 = vmatpush2.bf16.msra.mxu1 %v7245_v18  ;;  %3220 = vmatpush2.bf16.msra.mxu0 %v7246_v35  ;;  %v7256_v18 = vld [vmem:[#allocation66_spill] sm:$0xff]  ;;  %v7257_v35 = vld [vmem:[#allocation67_spill] sm:$0xff] }
 0x810   :  { %3180 = vmatprep.subr.bf16.mxu1 %v7247_v51  ;;  %3221 = vmatprep.subr.bf16.mxu0 %v7248_v21  ;;  %v7258_v51 = vld [vmem:[#allocation68_spill] sm:$0xff]  ;;  %v7259_v21 = vld [vmem:[#allocation69_spill] sm:$0xff] }
 0x813   :  { %3181 = vmatpush2.bf16.msra.mxu1 %v7249_v54  ;;  %3222 = vmatpush2.bf16.msra.mxu0 %v7250_v0  ;;  %v7260_v54 = vld [vmem:[#allocation70_spill] sm:$0xff]  ;;  %v7261_v0 = vld [vmem:[#allocation71_spill] sm:$0xff] }
 0x814   :  { %3182 = vmatprep.subr.bf16.mxu1 %v7251_v20  ;;  %3223 = vmatprep.subr.bf16.mxu0 %v7252_v38  ;;  %v7262_v20 = vld [vmem:[#allocation72_spill] sm:$0xff]  ;;  %v7263_v38 = vld [vmem:[#allocation73_spill] sm:$0xff] }
 0x817   :  { %3183 = vmatpush2.bf16.msra.mxu1 %v7253_v59  ;;  %3224 = vmatpush2.bf16.msra.mxu0 %v7254_v47  ;;  %v7264_v59 = vld [vmem:[#allocation74_spill] sm:$0xff]  ;;  %v7265_v47 = vld [vmem:[#allocation75_spill] sm:$0xff] }
 0x818   :  { %3184 = vmatprep.subr.bf16.mxu1 %v7255_v62  ;;  %3225 = vmatprep.subr.bf16.mxu0 %v7256_v18  ;;  %v7266_v62 = vld [vmem:[#allocation76_spill] sm:$0xff]  ;;  %v7267_v18 = vld [vmem:[#allocation77_spill] sm:$0xff] }
 0x81b   :  { %3185 = vmatpush2.bf16.msra.mxu1 %v7257_v35  ;;  %3226 = vmatpush2.bf16.msra.mxu0 %v7258_v51  ;;  %v7268_v35 = vld [vmem:[#allocation78_spill] sm:$0xff] }
 0x81c   :  { %3186 = vmatprep.subr.bf16.mxu1 %v7259_v21  ;;  %3227 = vmatprep.subr.bf16.mxu0 %v7260_v54 }
 0x81f   :  { %3187 = vmatpush2.bf16.msra.mxu1 %v7261_v0  ;;  %3228 = vmatpush2.bf16.msra.mxu0 %v7262_v20 }
 0x820   :  { %3188 = vmatprep.subr.bf16.mxu1 %v7263_v38  ;;  %3229 = vmatprep.subr.bf16.mxu0 %v7264_v59 }
 0x823   :  { %3189 = vmatpush2.bf16.msra.mxu1 %v7265_v47  ;;  %3230 = vmatpush2.bf16.msra.mxu0 %v7266_v62  ;;  %v7272_v62 = vld [vmem:[#allocation177_spill] sm:$0xff] }
 0x824   :  { %3240 = vmatprep.subr.bf16.mxu1 %v7267_v18  ;;  %3281 = vmatprep.subr.bf16.mxu0 %v7268_v35 }
 0x866   :  { %v2962_v51 = vpop.f32.mrf.mxu1  ;;  %v3003_v21 = vpop.f32.mrf.mxu0 }
 0x867   :  { %v3092_v38 = vadd.f32 %v2962_v51, %v7269_v25  ;;  %v3094_v59 = vadd.f32 %v3003_v21, %v7270_v45  ;;  %v7273_v21 = vld [vmem:[#allocation176_spill] sm:$0xff] }
 0x868   :  { %v2964_v19 = vpop.f32.mrf.mxu1  ;;  %v3005_v54 = vpop.f32.mrf.mxu0 }
 0x869   :  { %v3093_v47 = vadd.f32 %v2964_v19, %v7271_v17  ;;  %v3833_v1 = vmul.f32 -1.442695, %v3092_v38  ;;  %v3095_v11 = vadd.f32 %v3005_v54, %v7272_v62  ;;  %v3835_v18 = vmul.f32 -1.442695, %v3094_v59  ;;  %v7274_v38 = vld [vmem:[#allocation194_spill] sm:$0xff] }
 0x86a   :  { %v2966_v55 = vpop.f32.mrf.mxu1  ;;  %v3007_v0 = vpop.f32.mrf.mxu0 }
 0x86b   :  { %v3834_v16 = vmul.f32 -1.442695, %v3093_v47  ;;  %4168 = vpow2.f32 %v3833_v1  ;;  %v3836_v35 = vmul.f32 -1.442695, %v3095_v11  ;;  %v7275_v47 = vld [vmem:[#allocation178_spill] sm:$0xff] }
 0x86c   :  { %v2967_v53 = vpop.f32.mrf.mxu1  ;;  %v3008_v20 = vpop.f32.mrf.mxu0  ;;  %4170 = vpow2.f32 %v3835_v18  ;;  %v7276_v18 = vld [vmem:[#allocation195_spill] sm:$0xff] }
 0x86d   :  { %4172 = vpow2.f32 %v3834_v16 }
 0x86e   :  { %4174 = vpow2.f32 %v3836_v35 }
 0x878   :  { %v4169_v55 = vpop.eup %4168 }
 0x879   :  { %v4171_v0 = vpop.eup %4170  ;;  %v3106_v20 = vadd.f32 1.0, %v4169_v55 }
 0x87a   :  { %v4173_v53 = vpop.eup %4172  ;;  %v3118_v25 = vadd.f32 1.0, %v4171_v0 }
 0x87b   :  { %v4175_v29 = vpop.eup %4174  ;;  %v3107_v51 = vadd.f32 1.0, %v4173_v53  ;;  %4176 = vrcp.f32 %v3106_v20 }
 0x87c   :  { %v3119_v45 = vadd.f32 1.0, %v4175_v29  ;;  %4178 = vrcp.f32 %v3118_v25 }
 0x87d   :  { %4180 = vrcp.f32 %v3107_v51 }
 0x888   :  { %v4177_v25 = vpop.eup %4176 }
 0x8a6   :  { %v3044_v17 = vpop.f32.mrf.mxu1  ;;  %v3085_v19 = vpop.f32.mrf.mxu0 }
 0x8a7   :  { %v3096_v54 = vadd.f32 %v3044_v17, %v7273_v21  ;;  %v3098_v1 = vadd.f32 %v3085_v19, %v7274_v38  ;;  %v4179_v17 = vpop.eup %4178 }
 0x8a8   :  { %v3046_v11 = vpop.f32.mrf.mxu1  ;;  %v3087_v16 = vpop.f32.mrf.mxu0 }
 0x8a9   :  { %4182 = vtanh.f32 %v3096_v54  ;;  %v3837_v59 = vmul.f32 -1.442695, %v3098_v1  ;;  %v3097_v62 = vadd.f32 %v3046_v11, %v7275_v47  ;;  %v3099_v35 = vadd.f32 %v3087_v16, %v7276_v18  ;;  %v4181_v51 = vpop.eup %4180 }
 0x8aa   :  { %4184 = vrcp.f32 %v3119_v45  ;;  %v3048_v55 = vpop.f32.mrf.mxu1  ;;  %v3089_v0 = vpop.f32.mrf.mxu0  ;;  %v3138_v54 = vmul.f32 %v4179_v17, %v5957_v37 }
 0x8ab   :  { %4186 = vpow2.f32 %v3837_v59  ;;  %v3838_v29 = vmul.f32 -1.442695, %v3099_v35 }
 0x8ac   :  { %4188 = vtanh.f32 %v3097_v62  ;;  %v3049_v53 = vpop.f32.mrf.mxu1  ;;  %v3090_v20 = vpop.f32.mrf.mxu0 }
 0x8ad   :  { %4190 = vpow2.f32 %v3838_v29 }
 0x8b6   :  { %v4183_v19 = vpop.eup %4182 }
 0x8b7   :  { %v4185_v21 = vpop.eup %4184  ;;  %v3140_v38 = vmul.f32 %v4183_v19, %v4177_v25  ;;  %v3383_v19 = vld [vmem:[#allocation8 + $0x28] sm:$0xff] }
 0x8b8   :  { %v4187_v1 = vpop.eup %4186  ;;  %v3139_v59 = vmul.f32 %v4185_v21, %v5961_v52  ;;  %v3384_v52 = vld [vmem:[#allocation8 + $0x30] sm:$0xff]  ;;  %v3398_v21 = vld [vmem:[#allocation8 + $0xa0] sm:$0xff] }
 0x8b9   :  { %v4189_v11 = vpop.eup %4188  ;;  %v6107_v16 = vadd.f32 %v3140_v38, %v3138_v54  ;;  %v3132_v45 = vadd.f32 1.0, %v4187_v1  ;;  %v3382_v54 = vld [vmem:[#allocation8 + $0x20] sm:$0xff]  ;;  %v3397_v38 = vld [vmem:[#allocation8 + $0x98] sm:$0xff] }
 0x8ba   :  { %v4191_v47 = vpop.eup %4190  ;;  %v3141_v62 = vmul.f32 %v4189_v11, %v4181_v51  ;;  %v3399_v51 = vld [vmem:[#allocation8 + $0xa8] sm:$0xff]  ;;  %v3381_v1 = vld [vmem:[#allocation8 + $0x18] sm:$0xff]  ;;  %v3396_v11 = vld [vmem:[#allocation8 + $0x90] sm:$0xff] }
 0x8bb   :  { %4192 = vtanh.f32 %v6107_v16  ;;  %v3133_v18 = vadd.f32 1.0, %v4191_v47  ;;  %v3395_v47 = vld [vmem:[#allocation8 + $0x88] sm:$0xff] }
 0x8bc   :  { %4194 = vrcp.f32 %v3132_v45  ;;  %v6111_v35 = vadd.f32 %v3141_v62, %v3139_v59  ;;  %v3380_v45 = vld [vmem:[#allocation8 + $0x10] sm:$0xff]  ;;  %v3379_v59 = vld [vmem:[#allocation8 + $0x8] sm:$0xff]  ;;  %v3394_v62 = vld [vmem:[#allocation8 + $0x80] sm:$0xff] }
 0x8bd   :  { %4196 = vrcp.f32 %v3133_v18  ;;  %v3378_v18 = vld [vmem:[#allocation8] sm:$0xff] }
 0x8be   :  { %4198 = vtanh.f32 %v6111_v35 }
 0x8c8   :  { %v4193_v37 = vpop.eup %4192 }
 0x8c9   :  { %v4195_v55 = vpop.eup %4194 }
 0x8ca   :  { %v4197_v0 = vpop.eup %4196  ;;  %v3146_v53 = vmul.f32 %v4195_v55, %v4193_v37 }
 0x8cb   :  { %v4199_v29 = vpop.eup %4198 }
 0x8cc   :  { %v3147_v20 = vmul.f32 %v4199_v29, %v4197_v0  ;;  %v6114_v17 = vpack.c.bf16 %v3146_v53, %v3146_v53 }
 0x8ce   :  { %v3157_v25 = vpack.c.bf16 %v3147_v20, %v3147_v20 }
 0x8d0   :  { %3190 = vmatprep.mubr.bf16.mxu1 %v3157_v25  ;;  %3231 = vmatprep.mubr.bf16.mxu0 %v3157_v25 }
 0x8d1   :  { %3191 = vmatmul.mubr.bf16.vlgmr.msra.gmra.mxu1 %v6114_v17  ;;  %3232 = vmatmul.mubr.bf16.vlgmr.msra.gmra.mxu0 %v6114_v17 }
 0x8d2   :  { %3241 = vmatpush1.bf16.msra.mxu1 %v6698_v23  ;;  %3282 = vmatpush1.bf16.msra.mxu0 %v6699_v41  ;;  %v7277_v23 = vld [vmem:[#allocation120_spill] sm:$0xff]  ;;  %v7278_v41 = vld [vmem:[#allocation121_spill] sm:$0xff] }
 0x8d3   :  { %3272 = vmatprep.mubr.bf16.mxu1 %v3157_v25  ;;  %3313 = vmatprep.mubr.bf16.mxu0 %v3157_v25 }
 0x8d4   :  { %3242 = vmatprep.subr.bf16.mxu1 %v6700_v26  ;;  %3283 = vmatprep.subr.bf16.mxu0 %v6701_v61  ;;  %v7279_v26 = vld [vmem:[#allocation122_spill] sm:$0xff]  ;;  %v7280_v61 = vld [vmem:[#allocation123_spill] sm:$0xff] }
 0x8d6   :  { %3243 = vmatpush1.bf16.msra.mxu1 %v6702_v9  ;;  %3284 = vmatpush1.bf16.msra.mxu0 %v6703_v24  ;;  %v7281_v9 = vld [vmem:[#allocation124_spill] sm:$0xff]  ;;  %v7282_v24 = vld [vmem:[#allocation125_spill] sm:$0xff] }
 0x8d7   :  { %3244 = vmatprep.subr.bf16.mxu1 %v6704_v56  ;;  %3285 = vmatprep.subr.bf16.mxu0 %v6705_v44  ;;  %v7283_v56 = vld [vmem:[#allocation126_spill] sm:$0xff]  ;;  %v7284_v44 = vld [vmem:[#allocation127_spill] sm:$0xff] }
 0x8da   :  { %3245 = vmatpush1.bf16.msra.mxu1 %v6706_v27  ;;  %3286 = vmatpush1.bf16.msra.mxu0 %v6707_v22  ;;  %v7285_v27 = vld [vmem:[#allocation128_spill] sm:$0xff]  ;;  %v7286_v22 = vld [vmem:[#allocation129_spill] sm:$0xff] }
 0x8db   :  { %3246 = vmatprep.subr.bf16.mxu1 %v6708_v33  ;;  %3287 = vmatprep.subr.bf16.mxu0 %v6709_v10  ;;  %v7287_v33 = vld [vmem:[#allocation130_spill] sm:$0xff]  ;;  %v7288_v10 = vld [vmem:[#allocation131_spill] sm:$0xff] }
 0x8de   :  { %3247 = vmatpush1.bf16.msra.mxu1 %v6710_v48  ;;  %3288 = vmatpush1.bf16.msra.mxu0 %v6711_v30  ;;  %v7289_v48 = vld [vmem:[#allocation132_spill] sm:$0xff]  ;;  %v7290_v30 = vld [vmem:[#allocation133_spill] sm:$0xff] }
 0x8df   :  { %3248 = vmatprep.subr.bf16.mxu1 %v6712_v36  ;;  %3289 = vmatprep.subr.bf16.mxu0 %v6713_v63  ;;  %v7291_v36 = vld [vmem:[#allocation134_spill] sm:$0xff]  ;;  %v7292_v63 = vld [vmem:[#allocation135_spill] sm:$0xff] }
 0x8e2   :  { %3249 = vmatpush1.bf16.msra.mxu1 %v6714_v7  ;;  %3290 = vmatpush1.bf16.msra.mxu0 %v6715_v28  ;;  %v7293_v7 = vld [vmem:[#allocation136_spill] sm:$0xff]  ;;  %v7294_v28 = vld [vmem:[#allocation137_spill] sm:$0xff] }
 0x8e3   :  { %3250 = vmatprep.subr.bf16.mxu1 %v6802_v49  ;;  %3291 = vmatprep.subr.bf16.mxu0 %v6803_v39  ;;  %v7298_v49 = vmov 0.0   ;;  %v3409_v39 = vld [vmem:[#allocation8 + $0xf8] sm:$0xff] }
 0x8e6   :  { %3251 = vmatpush1.bf16.msra.mxu1 %v6804_v60  ;;  %3292 = vmatpush1.bf16.msra.mxu0 %v6805_v4  ;;  %v3393_v60 = vld [vmem:[#allocation8 + $0x78] sm:$0xff]  ;;  %v3408_v4 = vld [vmem:[#allocation8 + $0xf0] sm:$0xff] }
 0x8e7   :  { %3252 = vmatprep.subr.bf16.mxu1 %v6806_v3  ;;  %3293 = vmatprep.subr.bf16.mxu0 %v6807_v5  ;;  %v3392_v3 = vld [vmem:[#allocation8 + $0x70] sm:$0xff]  ;;  %v3407_v5 = vld [vmem:[#allocation8 + $0xe8] sm:$0xff] }
 0x8ea   :  { %3253 = vmatpush1.bf16.msra.mxu1 %v6808_v58  ;;  %3294 = vmatpush1.bf16.msra.mxu0 %v6809_v57  ;;  %v3391_v58 = vld [vmem:[#allocation8 + $0x68] sm:$0xff]  ;;  %v3406_v57 = vld [vmem:[#allocation8 + $0xe0] sm:$0xff] }
 0x8eb   :  { %3254 = vmatprep.subr.bf16.mxu1 %v6810_v6  ;;  %3295 = vmatprep.subr.bf16.mxu0 %v6811_v32  ;;  %v3390_v6 = vld [vmem:[#allocation8 + $0x60] sm:$0xff]  ;;  %v3405_v32 = vld [vmem:[#allocation8 + $0xd8] sm:$0xff] }
 0x8ee   :  { %3255 = vmatpush1.bf16.msra.mxu1 %v6812_v15  ;;  %3296 = vmatpush1.bf16.msra.mxu0 %v6813_v34  ;;  %v3389_v15 = vld [vmem:[#allocation8 + $0x58] sm:$0xff]  ;;  %v3404_v34 = vld [vmem:[#allocation8 + $0xd0] sm:$0xff] }
 0x8ef   :  { %3256 = vmatprep.subr.bf16.mxu1 %v6897_v40  ;;  %3297 = vmatprep.subr.bf16.mxu0 %v6815_v42  ;;  %v3388_v42 = vld [vmem:[#allocation8 + $0x50] sm:$0xff] }
 0x8f0   :  { %v3400_v40 = vld [vmem:[#allocation8 + $0xb0] sm:$0xff] }
 0x8f2   :  { %3257 = vmatpush2.bf16.msra.mxu1 %v6816_v14  ;;  %3298 = vmatpush2.bf16.msra.mxu0 %v6817_v2  ;;  %v3403_v14 = vld [vmem:[#allocation8 + $0xc8] sm:$0xff] }
 0x8f3   :  { %3258 = vmatprep.subr.bf16.mxu1 %v6818_v50  ;;  %3299 = vmatprep.subr.bf16.mxu0 %v6819_v13  ;;  %v3387_v2 = vld [vmem:[#allocation8 + $0x48] sm:$0xff]  ;;  %v3402_v50 = vld [vmem:[#allocation8 + $0xc0] sm:$0xff] }
 0x8f4   :  { %v3386_v13 = vld [vmem:[#allocation8 + $0x40] sm:$0xff] }
 0x8f6   :  { %3259 = vmatpush2.bf16.msra.mxu1 %v6820_v46  ;;  %3300 = vmatpush2.bf16.msra.mxu0 %v6735_v8  ;;  %v7295_v8 = vld [vmem:[#allocation138_spill] sm:$0xff] }
 0x8f7   :  { %3260 = vmatprep.subr.bf16.mxu1 %v6736_v43  ;;  %3301 = vmatprep.subr.bf16.mxu0 %v6737_v31  ;;  %v7296_v43 = vld [vmem:[#allocation139_spill] sm:$0xff]  ;;  %v7297_v31 = vld [vmem:[#allocation140_spill] sm:$0xff]  ;;  %v3401_v46 = vld [vmem:[#allocation8 + $0xb8] sm:$0xff] }
 0x8fa   :  { %3261 = vmatpush2.bf16.msra.mxu1 %v6821_v12  ;;  %3302 = vmatpush2.bf16.msra.mxu0 %v7277_v23  ;;  %v3385_v12 = vld [vmem:[#allocation8 + $0x38] sm:$0xff]  ;;  %v7299_v23 = vld [vmem:[#allocation152_spill] sm:$0xff] }
 0x8fb   :  { %3262 = vmatprep.subr.bf16.mxu1 %v7278_v41  ;;  %3303 = vmatprep.subr.bf16.mxu0 %v7279_v26  ;;  %v7300_v26 = vld [vmem:[#allocation179_spill] sm:$0xff] }
 0x8fe   :  { %3263 = vmatpush2.bf16.msra.mxu1 %v7280_v61  ;;  %3304 = vmatpush2.bf16.msra.mxu0 %v7281_v9  ;;  %v7301_v9 = vld [vmem:[#allocation154_spill] sm:$0xff] }
 0x8ff   :  { %3264 = vmatprep.subr.bf16.mxu1 %v7282_v24  ;;  %3305 = vmatprep.subr.bf16.mxu0 %v7283_v56 }
 0x902   :  { %3265 = vmatpush2.bf16.msra.mxu1 %v7284_v44  ;;  %3306 = vmatpush2.bf16.msra.mxu0 %v7285_v27  ;;  %v7302_v44 = vld [vmem:[#allocation181_spill] sm:$0xff] }
 0x903   :  { %3266 = vmatprep.subr.bf16.mxu1 %v7286_v22  ;;  %3307 = vmatprep.subr.bf16.mxu0 %v7287_v33 }
 0x906   :  { %3267 = vmatpush2.bf16.msra.mxu1 %v7288_v10  ;;  %3308 = vmatpush2.bf16.msra.mxu0 %v7289_v48 }
 0x907   :  { %3268 = vmatprep.subr.bf16.mxu1 %v7290_v30  ;;  %3309 = vmatprep.subr.bf16.mxu0 %v7291_v36 }
 0x90a   :  { %3269 = vmatpush2.bf16.msra.mxu1 %v7292_v63  ;;  %3310 = vmatpush2.bf16.msra.mxu0 %v7293_v7 }
 0x90b   :  { %3270 = vmatprep.subr.bf16.mxu1 %v7294_v28  ;;  %3311 = vmatprep.subr.bf16.mxu0 %v7295_v8 }
 0x90e   :  { %3271 = vmatpush2.bf16.msra.mxu1 %v7296_v43  ;;  %3312 = vmatpush2.bf16.msra.mxu0 %v7297_v31 }
 0x90f   :  { %3918 = vmatprep.subr.mxu0 %v7298_v49  ;;  %3855 = vmatprep.subr.mxu1 %v3409_v39 }
 0x911   :  { %3273 = vmatmul.mubr.bf16.vlgmr.msra.gmra.mxu1 %v6114_v17  ;;  %3314 = vmatmul.mubr.bf16.vlgmr.msra.gmra.mxu0 %v6114_v17 }
 0x912   :  { %3950 = vmatprep.mubr.msk.f32.mxu0 %vm4333_vm1, %v7298_v49  ;;  %3856 = vmatpush3.msra.mxu1 %v3393_v60  ;;  %v7303_v60 = vld [vmem:[#allocation180_spill] sm:$0xff] }
 0x913   :  { %3857 = vmatprep.subr.mxu1 %v3408_v4 }
 0x914   :  { %3858 = vmatpush3.msra.mxu1 %v3392_v3  ;;  %v7304_v3 = vld [vmem:[#allocation196_spill] sm:$0xff] }
 0x915   :  { %3859 = vmatprep.subr.mxu1 %v3407_v5 }
 0x916   :  { %3860 = vmatpush3.msra.mxu1 %v3391_v58 }
 0x917   :  { %3861 = vmatprep.subr.mxu1 %v3406_v57 }
 0x918   :  { %3862 = vmatpush3.msra.mxu1 %v3390_v6 }
 0x919   :  { %3863 = vmatprep.subr.mxu1 %v3405_v32  ;;  %v7305_v32 = vld [vmem:[#allocation182_spill] sm:$0xff] }
 0x91a   :  { %3864 = vmatpush3.msra.mxu1 %v3389_v15 }
 0x91b   :  { %3865 = vmatprep.subr.mxu1 %v3404_v34  ;;  %v7306_v34 = vld [vmem:[#allocation197_spill] sm:$0xff] }
 0x91c   :  { %3866 = vmatpush3.msra.mxu1 %v3388_v42 }
 0x91d   :  { %3867 = vmatprep.subr.mxu1 %v3403_v14 }
 0x91e   :  { %3868 = vmatpush3.msra.mxu1 %v3387_v2 }
 0x91f   :  { %3869 = vmatprep.subr.mxu1 %v3402_v50 }
 0x920   :  { %3870 = vmatpush3.msra.mxu1 %v3386_v13 }
 0x921   :  { %3871 = vmatprep.subr.mxu1 %v3401_v46 }
 0x922   :  { %3872 = vmatpush3.msra.mxu1 %v3385_v12 }
 0x923   :  { %3873 = vmatprep.subr.mxu1 %v3400_v40 }
 0x924   :  { %3874 = vmatpush3.msra.mxu1 %v3384_v52 }
 0x925   :  { %3875 = vmatprep.subr.mxu1 %v3399_v51 }
 0x926   :  { %3876 = vmatpush3.msra.mxu1 %v3383_v19 }
 0x927   :  { %3877 = vmatprep.subr.mxu1 %v3398_v21 }
 0x928   :  { %3878 = vmatpush3.msra.mxu1 %v3382_v54 }
 0x929   :  { %3879 = vmatprep.subr.mxu1 %v3397_v38 }
 0x92a   :  { %3880 = vmatpush3.msra.mxu1 %v3381_v1 }
 0x92b   :  { %3881 = vmatprep.subr.mxu1 %v3396_v11 }
 0x92c   :  { %3882 = vmatpush3.msra.mxu1 %v3380_v45 }
 0x92d   :  { %3883 = vmatprep.subr.mxu1 %v3395_v47 }
 0x92e   :  { %3884 = vmatpush3.msra.mxu1 %v3379_v59 }
 0x92f   :  { %3885 = vmatprep.subr.mxu1 %v3394_v62 }
 0x930   :  { %3886 = vmatpush3.msra.mxu1 %v3378_v18 }
 0x991   :  { %v3192_v37 = vpop.f32.mrf.mxu1  ;;  %v3233_v55 = vpop.f32.mrf.mxu0 }
 0x992   :  { %v3322_v41 = vadd.f32 %v3192_v37, %v7299_v23  ;;  %v3324_v61 = vadd.f32 %v3233_v55, %v7300_v26 }
 0x993   :  { %v3194_v0 = vpop.f32.mrf.mxu1  ;;  %v3235_v29 = vpop.f32.mrf.mxu0 }
 0x994   :  { %v3323_v24 = vadd.f32 %v3194_v0, %v7301_v9  ;;  %v3839_v56 = vmul.f32 -1.442695, %v3322_v41  ;;  %v3325_v27 = vadd.f32 %v3235_v29, %v7302_v44  ;;  %v3841_v22 = vmul.f32 -1.442695, %v3324_v61  ;;  %v7307_v41 = vld [vmem:[#allocation183_spill] sm:$0xff]  ;;  %v3521_v9 = vld [vmem:[#allocation8 + $0x198] sm:$0xff] }
 0x995   :  { %v3196_v53 = vpop.f32.mrf.mxu1  ;;  %v3237_v20 = vpop.f32.mrf.mxu0  ;;  %3919 = vmatpush3.msra.mxu0 %v3521_v9 }
 0x996   :  { %v3840_v33 = vmul.f32 -1.442695, %v3323_v24  ;;  %4200 = vpow2.f32 %v3839_v56  ;;  %v3842_v10 = vmul.f32 -1.442695, %v3325_v27  ;;  %v3520_v24 = vld [vmem:[#allocation8 + $0x190] sm:$0xff]  ;;  %3920 = vmatprep.subr.mxu0 %v7298_v49  ;;  %v3519_v56 = vld [vmem:[#allocation8 + $0x188] sm:$0xff] }
 0x997   :  { %v3197_v25 = vpop.f32.mrf.mxu1  ;;  %v3238_v17 = vpop.f32.mrf.mxu0  ;;  %4202 = vpow2.f32 %v3841_v22  ;;  %3921 = vmatpush3.msra.mxu0 %v3520_v24 }
 0x998   :  { %4204 = vpow2.f32 %v3840_v33  ;;  %v3667_v25 = vld [vmem:[#allocation8 + $0x1a0] ss:$0 sm:$0xff]  ;;  %3922 = vmatprep.subr.mxu0 %v7298_v49 }
 0x999   :  { %4206 = vpow2.f32 %v3842_v10  ;;  %3923 = vmatpush3.msra.mxu0 %v3519_v56  ;;  %v3518_v10 = vld [vmem:[#allocation8 + $0x180] sm:$0xff] }
 0x99a   :  { %3924 = vmatprep.subr.mxu0 %v7298_v49 }
 0x99b   :  { %3925 = vmatpush3.msra.mxu0 %v3518_v10 }
 0x99c   :  { %3926 = vmatprep.subr.mxu0 %v7298_v49 }
 0x9a3   :  { %v4201_v48 = vpop.eup %4200 }
 0x9a4   :  { %v4203_v30 = vpop.eup %4202  ;;  %v3336_v63 = vadd.f32 1.0, %v4201_v48  ;;  %v3517_v48 = vld [vmem:[#allocation8 + $0x178] sm:$0xff] }
 0x9a5   :  { %v4205_v36 = vpop.eup %4204  ;;  %v3348_v28 = vadd.f32 1.0, %v4203_v30  ;;  %3927 = vmatpush3.msra.mxu0 %v3517_v48  ;;  %v3516_v30 = vld [vmem:[#allocation8 + $0x170] sm:$0xff] }
 0x9a6   :  { %v4207_v7 = vpop.eup %4206  ;;  %v3337_v8 = vadd.f32 1.0, %v4205_v36  ;;  %4208 = vrcp.f32 %v3336_v63  ;;  %3928 = vmatprep.subr.mxu0 %v7298_v49  ;;  %v3515_v36 = vld [vmem:[#allocation8 + $0x168] sm:$0xff]  ;;  %v3514_v63 = vld [vmem:[#allocation8 + $0x160] sm:$0xff] }
 0x9a7   :  { %v3349_v43 = vadd.f32 1.0, %v4207_v7  ;;  %4210 = vrcp.f32 %v3348_v28  ;;  %3929 = vmatpush3.msra.mxu0 %v3516_v30  ;;  %v3513_v7 = vld [vmem:[#allocation8 + $0x158] sm:$0xff]  ;;  %v3512_v28 = vld [vmem:[#allocation8 + $0x150] sm:$0xff] }
 0x9a8   :  { %4212 = vrcp.f32 %v3337_v8  ;;  %3930 = vmatprep.subr.mxu0 %v7298_v49  ;;  %v3511_v8 = vld [vmem:[#allocation8 + $0x148] sm:$0xff] }
 0x9a9   :  { %3931 = vmatpush3.msra.mxu0 %v3515_v36 }
 0x9aa   :  { %3932 = vmatprep.subr.mxu0 %v7298_v49 }
 0x9ab   :  { %3933 = vmatpush3.msra.mxu0 %v3514_v63 }
 0x9ac   :  { %3934 = vmatprep.subr.mxu0 %v7298_v49 }
 0x9ad   :  { %3935 = vmatpush3.msra.mxu0 %v3513_v7 }
 0x9ae   :  { %3936 = vmatprep.subr.mxu0 %v7298_v49 }
 0x9af   :  { %3937 = vmatpush3.msra.mxu0 %v3512_v28 }
 0x9b0   :  { %3938 = vmatprep.subr.mxu0 %v7298_v49 }
 0x9b1   :  { %3939 = vmatpush3.msra.mxu0 %v3511_v8 }
 0x9b2   :  { %3940 = vmatprep.subr.mxu0 %v7298_v49 }
 0x9b3   :  { %v4209_v12 = vpop.eup %4208 }
 0x9b4   :  { %v4211_v40 = vpop.eup %4210 }
 0x9b5   :  { %v4213_v52 = vpop.eup %4212  ;;  %v3368_v21 = vmul.f32 %v4211_v40, %v6107_v16 }
 0x9d1   :  { %v3274_v31 = vpop.f32.mrf.mxu1  ;;  %v3315_v39 = vpop.f32.mrf.mxu0 }
 0x9d2   :  { %v3326_v4 = vadd.f32 %v3274_v31, %v7303_v60  ;;  %v3328_v5 = vadd.f32 %v3315_v39, %v7304_v3  ;;  %v3509_v31 = vld [vmem:[#allocation8 + $0x138] sm:$0xff]  ;;  %v3508_v39 = vld [vmem:[#allocation8 + $0x130] sm:$0xff]  ;;  %v3507_v60 = vld [vmem:[#allocation8 + $0x128] sm:$0xff] }
 0x9d3   :  { %v3276_v58 = vpop.f32.mrf.mxu1  ;;  %v3317_v57 = vpop.f32.mrf.mxu0 }
 0x9d4   :  { %4214 = vtanh.f32 %v3326_v4  ;;  %v3843_v6 = vmul.f32 -1.442695, %v3328_v5  ;;  %v3327_v15 = vadd.f32 %v3276_v58, %v7305_v32  ;;  %v3329_v42 = vadd.f32 %v3317_v57, %v7306_v34  ;;  %v3506_v4 = vld [vmem:[#allocation8 + $0x120] sm:$0xff] }
 0x9d5   :  { %4216 = vrcp.f32 %v3349_v43  ;;  %v3278_v14 = vpop.f32.mrf.mxu1  ;;  %v3319_v2 = vpop.f32.mrf.mxu0  ;;  %v3510_v43 = vld [vmem:[#allocation8 + $0x140] sm:$0xff] }
 0x9d6   :  { %4218 = vpow2.f32 %v3843_v6  ;;  %v3844_v50 = vmul.f32 -1.442695, %v3329_v42  ;;  %3941 = vmatpush3.msra.mxu0 %v3510_v43  ;;  %v3845_v34 = vld [vmem:[#allocation8 + $0x1a1] ss:$0 sm:$0xff]  ;;  %v3846_v14 = vld [vmem:[#allocation8 + $0x1a2] ss:$0 sm:$0xff] }
 0x9d7   :  { %4220 = vtanh.f32 %v3327_v15  ;;  %v3279_v13 = vpop.f32.mrf.mxu1  ;;  %v3320_v46 = vpop.f32.mrf.mxu0  ;;  %3942 = vmatprep.subr.mxu0 %v7298_v49 }
 0x9d8   :  { %4222 = vpow2.f32 %v3844_v50  ;;  %3943 = vmatpush3.msra.mxu0 %v3509_v31  ;;  %v3847_v13 = vld [vmem:[#allocation8 + $0x1a3] ss:$0 sm:$0xff] }
 0x9d9   :  { %3944 = vmatprep.subr.mxu0 %v7298_v49 }
 0x9da   :  { %3945 = vmatpush3.msra.mxu0 %v3508_v39 }
 0x9db   :  { %3946 = vmatprep.subr.mxu0 %v7298_v49 }
 0x9dc   :  { %3947 = vmatpush3.msra.mxu0 %v3507_v60 }
 0x9dd   :  { %3948 = vmatprep.subr.mxu0 %v7298_v49  ;;  %v3848_v49 = vld [vmem:[#allocation8 + $0x1a4] ss:$0 sm:$0xff] }
 0x9de   :  { %3949 = vmatpush3.msra.mxu0 %v3506_v4 }
 0x9e1   :  { %v4215_v51 = vpop.eup %4214 }
 0x9e2   :  { %v4217_v19 = vpop.eup %4216  ;;  %v3370_v54 = vmul.f32 %v4215_v51, %v4209_v12 }
 0x9e3   :  { %v4219_v38 = vpop.eup %4218  ;;  %v3369_v59 = vmul.f32 %v4217_v19, %v6111_v35  ;;  %v769_v35 = vadd.f32 %v3667_v25, %v7307_v41  ;;  %v3849_v19 = vld [vmem:[#allocation8 + $0x1a5] ss:$0 sm:$0xff] }
 0x9e4   :  { %v4221_v1 = vpop.eup %4220  ;;  %v3372_v11 = vadd.f32 %v3370_v54, %v3368_v21  ;;  %v3362_v45 = vadd.f32 1.0, %v4219_v38 }
 0x9e5   :  { %v4223_v47 = vpop.eup %4222  ;;  %v3371_v62 = vmul.f32 %v4221_v1, %v4213_v52 }
 0x9e6   :  { %4224 = vtanh.f32 %v3372_v11  ;;  %v3363_v18 = vadd.f32 1.0, %v4223_v47 }
 0x9e7   :  { %4226 = vrcp.f32 %v3362_v45  ;;  %v3373_v37 = vadd.f32 %v3371_v62, %v3369_v59 }
 0x9e8   :  { %4228 = vrcp.f32 %v3363_v18 }
 0x9e9   :  { %4230 = vtanh.f32 %v3373_v37 }
 0x9f3   :  { %v4225_v55 = vpop.eup %4224 }
 0x9f4   :  { %v4227_v0 = vpop.eup %4226 }
 0x9f5   :  { %v4229_v29 = vpop.eup %4228  ;;  %v3376_v53 = vmul.f32 %v4227_v0, %v4225_v55 }
 0x9f6   :  { %v4231_v16 = vpop.eup %4230 }
 0x9f7   :  { %v3377_v20 = vmul.f32 %v4231_v16, %v4229_v29 }
 0x9f9   :  { %3474 = vmatprep.mubr.f32.mxu1 %v3377_v20 }
 0x9fa   :  { %3475 = vmatmul.mubr.f32.vlgmr.msra.gmra.mxu1 %v3376_v53 }
 0xaba   :  { %v3887_v17 = vpop.f32.mrf.mxu1 }
 0xabc   :  { %v3888_v23 = vpop.f32.mrf.mxu1 }
 0xabd   :  { %v3889_v26 = vadd.f32 %v3888_v23, %v3887_v17 }
 0xabf   :  { %v3477_v61 = vadd.f32 %v3889_v26, %v769_v35 }
 0xac1   :  { %3480 = vadd.xlane.f32.xlu0 %v3477_v61 }
 0xb4a   :  { %v3481_v44 = vpop.xlane.xlu0 %3480 }
 0xb4b   :  { %v3482_v27 = vmul.f32 0.008064516, %v3481_v44 }
 0xb4d   :  { %v3483_v22 = vsub.f32 %v3477_v61, %v3482_v27  ;;  %v3487_v3 = vmul.f32 %v3482_v27, %v3482_v27 }
 0xb4f   :  { %v3484_v33 = vmul.f32 %v3483_v22, %v3483_v22  ;;  %v3488_v5 = vmul.f32 4.0, %v3487_v3 }
 0xb51   :  { %3485 = vadd.xlane.f32.xlu0 %v3484_v33 }
 0xbda   :  { %v3486_v58 = vpop.xlane.xlu0 %3485 }
 0xbdb   :  { %v3489_v57 = vsub.f32 %v3486_v58, %v3488_v5 }
 0xbdd   :  { %v3490_v6 = vmul.f32 0.008064516, %v3489_v57 }
 0xbdf   :  { %v3491_v32 = vadd.f32 1e-05, %v3490_v6 }
 0xbe1   :  { %4232 = vrsqrt.f32 %v3491_v32 }
 0xbee   :  { %v4233_v15 = vpop.eup %4232 }
 0xbef   :  { %v3493_v42 = vmul.f32 %v4233_v15, %v3483_v22 }
 0xbf1   :  { %v3499_v2 = vmul.f32 %v3845_v34, %v3493_v42 }
 0xbf3   :  { %v3505_v50 = vadd.f32 %v3846_v14, %v3499_v2 }
 0xbf5   :  { %3951 = vmatmul.mubr.f32.vlgmr.msra.gmra.mxu0 %v3505_v50 }
 0xcb5   :  { %v3593_v46 = vpop.f32.mrf.mxu0 }
 0xcb6   :  { %v3594_v12 = vadd.f32 %v3847_v13, %v3593_v46 }
 0xcb7   :  { %v3952_v40 = vpop.f32.mrf.mxu0 }
 0xcb8   :  { %v3597_v52 = vmax.f32 %v3594_v12, 0.0 }
 0xcba   :  { %v3603_v51 = vmul.f32 %v3848_v49, %v3597_v52 }
 0xcbc   :  { %3604 = vadd.xlane.f32.xlu1 %v3603_v51 }
 0xd45   :  { %v3605_v21 = vpop.xlane.xlu1 %3604 }
 0xd46   :  { %v3611_v54 = vadd.f32 %v3849_v19, %v3605_v21 }
 0xd48   :  { %4234 = vtanh.f32 %v3611_v54 }
 0xd55   :  { %v4235_v38 = vpop.eup %4234 }
 0xd56   :  { %3615 = vperm.xlu1 %3974, %v4235_v38  }
 0xdd1   :  { %v3616_v1 = vpop.permute.xlu1 %3615 }
 0xdd2   :  { %3618 = vst [vmem:[#allocation9] sm:$0xff] %v3616_v1 }
 0xdd3   :  { %4307 = shalt.err (!%p4304_p5)
}
 0xdd4   :  { %3628 = dma.vmem_to_hbm [thread:$0]  %s3626_s28, 128, %s6219_s5, [#allocation5]  }
 0xdd5   :  { %4320 = dma.done.wait [#allocation5], 128  }
 0xdd6   :  { %4321 = vsyncadd [#allocation5], 4294967168 }
 0xdd7   :  { %3632 = vsyncpa [#allocation4], 1 }
 0xdd8   :  { %3633 = vsyncpa [#allocation7], 1 }
 0xdd9   :  { %3634 = vsyncpa [#allocation5], 1 }

</bundles_post_ra>
